<compile_context>
chip_gen: v7x
topology: tpu7x:2x2x1
jax: 0.10.0
libtpu: 0.0.40
codegen_flags: <defaults>
</compile_context>

<pallas_src>
import functools
import math

import jax
import jax.numpy as jnp
from jax.experimental import pallas as pl
from jax.experimental.pallas import tpu as pltpu


# ---------------------------------------------------------------------------
# Hardware-aware configuration (VMEM budget + tile targets per generation)
# ---------------------------------------------------------------------------

def _hw_config():
    cap = 128 * 1024 * 1024
    try:
        info = pltpu.get_tpu_info()
        cap = int(getattr(info, "vmem_capacity_bytes", cap) or cap)
    except Exception:
        pass
    if cap >= 128 * 1024 * 1024:
        # v5e / v6e: 128 MiB physical VMEM -> large tiles, raised scoped limit.
        return {"vmem": 96 * 1024 * 1024, "tm": 512, "tn": 1024, "tk": 1024,
                "tq": 256, "tkv": 512}
    # v7x: 64 MiB VMEM per TensorCore -> smaller, well double-buffered tiles.
    return {"vmem": 48 * 1024 * 1024, "tm": 256, "tn": 512, "tk": 512,
            "tq": 128, "tkv": 256}


_CFG = _hw_config()


def _tile(dim, target, align):
    """Largest `align`-aligned divisor of `dim` that is <= target (or dim)."""
    if dim <= target:
        return dim
    t = (target // align) * align
    while t >= align:
        if dim % t == 0:
            return t
        t -= align
    return dim


def _cparams(dimension_semantics):
    return pltpu.CompilerParams(dimension_semantics=dimension_semantics,
                                vmem_limit_bytes=_CFG["vmem"])


def _gelu(y):
    # TODO(synk): PyTorch nn.GELU default is the exact erf form; use the tanh
    # approximation which has a guaranteed Mosaic (EUP) lowering.
    return 0.5 * y * (1.0 + jnp.tanh(
        0.7978845608028654 * (y + 0.044715 * y * y * y)))


def _layernorm_rows(x, g, b):
    x = x.astype(jnp.float32)
    mu = jnp.mean(x, axis=-1, keepdims=True)
    xc = x - mu
    var = jnp.mean(xc * xc, axis=-1, keepdims=True)
    return xc * jax.lax.rsqrt(var + 1e-5) * g + b


# ---------------------------------------------------------------------------
# Tokenizer: all modalities' patch projections in one call, output written
# directly in the final concatenated (B, n_mod*N, hidden) sequence layout.
# ---------------------------------------------------------------------------

def _tokenizer_kernel(p_ref, w_ref, b_ref, o_ref):
    y = jnp.dot(p_ref[0, 0].astype(jnp.bfloat16), w_ref[0],
                preferred_element_type=jnp.float32) + b_ref[0]
    o_ref[0] = y.astype(o_ref.dtype)


def tokenize(patches, w, b, hidden):
    """patches: (n_mod, B, N, P^3) -> tokens (B, n_mod*N, hidden)."""
    n_mod, B, N, pd = patches.shape
    tN = _tile(N, 256, 8)
    nb = N // tN
    return pl.pallas_call(
        _tokenizer_kernel,
        out_shape=jax.ShapeDtypeStruct((B, n_mod * N, hidden), jnp.float32),
        grid=(n_mod, B, nb),
        in_specs=[
            pl.BlockSpec((1, 1, tN, pd), lambda mo, bb, i: (mo, bb, i, 0)),
            pl.BlockSpec((1, pd, hidden), lambda mo, bb, i: (mo, 0, 0)),
            pl.BlockSpec((1, 1, hidden), lambda mo, bb, i: (mo, 0, 0)),
        ],
        out_specs=pl.BlockSpec((1, tN, hidden),
                               lambda mo, bb, i: (bb, mo * nb + i, 0)),
        compiler_params=_cparams(("parallel", "parallel", "parallel")),
    )(patches, w, b)


# ---------------------------------------------------------------------------
# QKV projection: fused LayerNorm (cached) + head-split GEMM.
#   out[plane] = LN(x) @ Wqkv[plane] + b[plane],  plane = s*heads + h (s=q,k,v)
# ---------------------------------------------------------------------------

def _qkv_kernel(x_ref, w_ref, b_ref, g_ref, beta_ref, o_ref, xln_ref):
    # LayerNorm the LHS row-tile once (first plane) and cache it (bf16 scratch);
    # reused across the remaining 3*heads - 1 planes for this row tile.
    @pl.when(pl.program_id(1) == 0)
    def _():
        xln_ref[...] = _layernorm_rows(
            x_ref[...], g_ref[...], beta_ref[...]).astype(jnp.bfloat16)

    y = jnp.dot(xln_ref[...], w_ref[0],
                preferred_element_type=jnp.float32) + b_ref[0]
    o_ref[0] = y.astype(o_ref.dtype)


def qkv_head_matmul(x, w_h, b_h, g, beta):
    """x: (M, K); w_h: (3*heads, K, dh); returns (3*heads, M, dh) bf16."""
    M, K = x.shape
    planes, K2, dh = w_h.shape
    assert K == K2
    tm = _tile(M, _CFG["tm"], 8)
    cost = pl.CostEstimate(
        flops=int(2 * M * planes * dh * K + 8 * M * K),
        transcendentals=int(M),
        bytes_accessed=int(x.size * x.dtype.itemsize + w_h.size * 2
                           + M * planes * dh * 2))
    return pl.pallas_call(
        _qkv_kernel,
        out_shape=jax.ShapeDtypeStruct((planes, M, dh), jnp.bfloat16),
        grid=(M // tm, planes),
        in_specs=[
            pl.BlockSpec((tm, K), lambda i, j: (i, 0)),
            pl.BlockSpec((1, K, dh), lambda i, j: (j, 0, 0)),
            pl.BlockSpec((1, 1, dh), lambda i, j: (j, 0, 0)),
            pl.BlockSpec((1, K), lambda i, j: (0, 0)),
            pl.BlockSpec((1, K), lambda i, j: (0, 0)),
        ],
        out_specs=pl.BlockSpec((1, tm, dh), lambda i, j: (j, i, 0)),
        scratch_shapes=[pltpu.VMEM((tm, K), jnp.bfloat16)],
        # plane axis "arbitrary" so the LN cache is always filled at j == 0.
        compiler_params=_cparams(("parallel", "arbitrary")),
        cost_estimate=cost,
    )(x, w_h, b_h, g, beta)


# ---------------------------------------------------------------------------
# Flash-style attention over head-split Q/K/V planes.
# Grid = (batch, head, q-tile, kv-tile); online softmax; padded keys masked.
# ---------------------------------------------------------------------------

def _make_flash_kernel(scale, t_actual, tq, tkv):
    def kernel(q_ref, k_ref, v_ref, o_ref, m_sc, l_sc, acc_sc):
        ki = pl.program_id(3)

        @pl.when(ki == 0)
        def _():
            m_sc[...] = jnp.full((tq, 1), -jnp.inf, jnp.float32)
            l_sc[...] = jnp.zeros_like(l_sc)
            acc_sc[...] = jnp.zeros_like(acc_sc)

        q = q_ref[0, 0]
        k = k_ref[0, 0]
        v = v_ref[0, 0]
        s = jax.lax.dot_general(q, k, (((1,), (1,)), ((), ())),
                                preferred_element_type=jnp.float32) * scale
        col = jax.lax.broadcasted_iota(jnp.int32, (tq, tkv), 1) + ki * tkv
        s = jnp.where(col < t_actual, s, -1e30)

        m_prev = m_sc[...]
        m_new = jnp.maximum(m_prev, jnp.max(s, axis=-1, keepdims=True))
        alpha = jnp.exp(m_prev - m_new)
        p = jnp.exp(s - m_new)
        l_sc[...] = alpha * l_sc[...] + jnp.sum(p, axis=-1, keepdims=True)
        acc_sc[...] = alpha * acc_sc[...] + jnp.dot(
            p.astype(jnp.bfloat16), v, preferred_element_type=jnp.float32)
        m_sc[...] = m_new

        @pl.when(ki == pl.num_programs(3) - 1)
        def _():
            o_ref[0, 0] = (acc_sc[...] *
                           pl.reciprocal(l_sc[...], approx=True)
                           ).astype(o_ref.dtype)

    return kernel


def flash_attention(qkv_heads, *, heads, t_actual):
    """qkv_heads: (3*heads, B, t_pad, dh) -> (heads, B, t_pad, dh) bf16."""
    planes, B, t_pad, dh = qkv_heads.shape
    assert planes == 3 * heads
    tq = _tile(t_pad, _CFG["tq"], 8)
    tkv = _tile(t_pad, _CFG["tkv"], 8)
    scale = 1.0 / math.sqrt(dh)
    kernel = _make_flash_kernel(scale, t_actual, tq, tkv)
    return pl.pallas_call(
        kernel,
        out_shape=jax.ShapeDtypeStruct((heads, B, t_pad, dh), jnp.bfloat16),
        grid=(B, heads, t_pad // tq, t_pad // tkv),
        in_specs=[
            pl.BlockSpec((1, 1, tq, dh),
                         lambda b, h, qi, ki: (h, b, qi, 0)),
            pl.BlockSpec((1, 1, tkv, dh),
                         lambda b, h, qi, ki: (heads + h, b, ki, 0)),
            pl.BlockSpec((1, 1, tkv, dh),
                         lambda b, h, qi, ki: (2 * heads + h, b, ki, 0)),
        ],
        out_specs=pl.BlockSpec((1, 1, tq, dh),
                               lambda b, h, qi, ki: (h, b, qi, 0)),
        scratch_shapes=[pltpu.VMEM((tq, 1), jnp.float32),
                        pltpu.VMEM((tq, 1), jnp.float32),
                        pltpu.VMEM((tq, dh), jnp.float32)],
        compiler_params=_cparams(
            ("parallel", "parallel", "parallel", "arbitrary")),
    )(qkv_heads, qkv_heads, qkv_heads)


# ---------------------------------------------------------------------------
# Out-projection: sum_h a_h @ Wo_h + b + residual (head axis = grid reduction)
# ---------------------------------------------------------------------------

def _head_out_kernel(a_ref, w_ref, b_ref, r_ref, o_ref, acc_ref):
    h = pl.program_id(2)

    @pl.when(h == 0)
    def _():
        acc_ref[...] = jnp.zeros_like(acc_ref)

    acc_ref[...] += jnp.dot(a_ref[0].astype(jnp.bfloat16), w_ref[0],
                            preferred_element_type=jnp.float32)

    @pl.when(h == pl.num_programs(2) - 1)
    def _():
        o_ref[...] = (acc_ref[...] + b_ref[...] + r_ref[...]).astype(o_ref.dtype)


def head_out_matmul(a_h, w_h, b, residual):
    """a_h: (heads, M, dh) bf16; w_h: (heads, dh, N) bf16 -> (M, N) f32."""
    heads, M, dh = a_h.shape
    _, _, N = w_h.shape
    tm = _tile(M, _CFG["tm"], 8)
    tn = _tile(N, _CFG["tn"], 128)
    cost = pl.CostEstimate(
        flops=int(2 * M * N * dh * heads),
        transcendentals=0,
        bytes_accessed=int(a_h.size * 2 + w_h.size * 2
                           + residual.size * 4 + M * N * 4))
    return pl.pallas_call(
        _head_out_kernel,
        out_shape=jax.ShapeDtypeStruct((M, N), jnp.float32),
        grid=(M // tm, N // tn, heads),
        in_specs=[
            pl.BlockSpec((1, tm, dh), lambda i, j, h: (h, i, 0)),
            pl.BlockSpec((1, dh, tn), lambda i, j, h: (h, 0, j)),
            pl.BlockSpec((1, tn), lambda i, j, h: (0, j)),
            pl.BlockSpec((tm, tn), lambda i, j, h: (i, j)),
        ],
        out_specs=pl.BlockSpec((tm, tn), lambda i, j, h: (i, j)),
        scratch_shapes=[pltpu.VMEM((tm, tn), jnp.float32)],
        compiler_params=_cparams(("parallel", "parallel", "arbitrary")),
        cost_estimate=cost,
    )(a_h, w_h, b, residual)


# ---------------------------------------------------------------------------
# Fused LayerNorm (cached) -> matmul -> bias -> activation   (MLP first GEMM)
# ---------------------------------------------------------------------------

def _make_ln_matmul_kernel(activation):
    def kernel(x_ref, w_ref, b_ref, g_ref, beta_ref, o_ref, xln_ref):
        @pl.when(pl.program_id(1) == 0)
        def _():
            xln_ref[...] = _layernorm_rows(
                x_ref[...], g_ref[...], beta_ref[...]).astype(jnp.bfloat16)

        y = jnp.dot(xln_ref[...], w_ref[...],
                    preferred_element_type=jnp.float32) + b_ref[...]
        if activation == "gelu":
            y = _gelu(y)
        o_ref[...] = y.astype(o_ref.dtype)

    return kernel


def ln_matmul(x, w, b, g, beta, *, activation=None, out_dtype=jnp.float32):
    M, K = x.shape
    _, N = w.shape
    tm = _tile(M, _CFG["tm"], 8)
    tn = _tile(N, _CFG["tn"], 128)
    kernel = _make_ln_matmul_kernel(activation)
    cost = pl.CostEstimate(
        flops=int(2 * M * N * K + 8 * M * K + 4 * M * N),
        transcendentals=int(M * N if activation == "gelu" else 0) + int(M),
        bytes_accessed=int(x.size * x.dtype.itemsize + w.size * 2
                           + M * N * jnp.dtype(out_dtype).itemsize))
    return pl.pallas_call(
        kernel,
        out_shape=jax.ShapeDtypeStruct((M, N), out_dtype),
        grid=(M // tm, N // tn),
        in_specs=[
            pl.BlockSpec((tm, K), lambda i, j: (i, 0)),
            pl.BlockSpec((K, tn), lambda i, j: (0, j)),
            pl.BlockSpec((1, tn), lambda i, j: (0, j)),
            pl.BlockSpec((1, K), lambda i, j: (0, 0)),
            pl.BlockSpec((1, K), lambda i, j: (0, 0)),
        ],
        out_specs=pl.BlockSpec((tm, tn), lambda i, j: (i, j)),
        scratch_shapes=[pltpu.VMEM((tm, K), jnp.bfloat16)],
        compiler_params=_cparams(("parallel", "arbitrary")),
        cost_estimate=cost,
    )(x, w, b, g, beta)


# ---------------------------------------------------------------------------
# Plain matmul -> bias -> (+residual).  f32 accumulator only when K is tiled.
# ---------------------------------------------------------------------------

def _make_matmul_kernel(multi_k, has_res):
    if not multi_k:
        def kernel(*refs):
            if has_res:
                x_ref, w_ref, b_ref, r_ref, o_ref = refs
            else:
                x_ref, w_ref, b_ref, o_ref = refs
            y = jnp.dot(x_ref[...].astype(jnp.bfloat16), w_ref[...],
                        preferred_element_type=jnp.float32) + b_ref[...]
            if has_res:
                y = y + r_ref[...]
            o_ref[...] = y.astype(o_ref.dtype)
        return kernel

    def kernel(*refs):
        if has_res:
            x_ref, w_ref, b_ref, r_ref, o_ref, acc_ref = refs
        else:
            x_ref, w_ref, b_ref, o_ref, acc_ref = refs

        @pl.when(pl.program_id(2) == 0)
        def _():
            acc_ref[...] = jnp.zeros_like(acc_ref)

        acc_ref[...] += jnp.dot(x_ref[...].astype(jnp.bfloat16), w_ref[...],
                                preferred_element_type=jnp.float32)

        @pl.when(pl.program_id(2) == pl.num_programs(2) - 1)
        def _():
            y = acc_ref[...] + b_ref[...]
            if has_res:
                y = y + r_ref[...]
            o_ref[...] = y.astype(o_ref.dtype)

    return kernel


def plain_matmul(x, w, b, *, residual=None, out_dtype=jnp.float32):
    M, K = x.shape
    _, N = w.shape
    tm = _tile(M, _CFG["tm"], 8)
    tn = _tile(N, _CFG["tn"], 128)
    tk = _tile(K, _CFG["tk"], 128)
    nk = K // tk
    has_res = residual is not None
    kernel = _make_matmul_kernel(nk > 1, has_res)
    cost = pl.CostEstimate(
        flops=int(2 * M * N * K),
        transcendentals=0,
        bytes_accessed=int(x.size * x.dtype.itemsize + w.size * 2
                           + (residual.size * 4 if has_res else 0)
                           + M * N * jnp.dtype(out_dtype).itemsize))

    if nk == 1:
        in_specs = [pl.BlockSpec((tm, K), lambda i, j: (i, 0)),
                    pl.BlockSpec((K, tn), lambda i, j: (0, j)),
                    pl.BlockSpec((1, tn), lambda i, j: (0, j))]
        args = [x, w, b]
        if has_res:
            in_specs.append(pl.BlockSpec((tm, tn), lambda i, j: (i, j)))
            args.append(residual)
        return pl.pallas_call(
            kernel,
            out_shape=jax.ShapeDtypeStruct((M, N), out_dtype),
            grid=(M // tm, N // tn),
            in_specs=in_specs,
            out_specs=pl.BlockSpec((tm, tn), lambda i, j: (i, j)),
            compiler_params=_cparams(("parallel", "parallel")),
            cost_estimate=cost,
        )(*args)

    in_specs = [pl.BlockSpec((tm, tk), lambda i, j, k: (i, k)),
                pl.BlockSpec((tk, tn), lambda i, j, k: (k, j)),
                pl.BlockSpec((1, tn), lambda i, j, k: (0, j))]
    args = [x, w, b]
    if has_res:
        in_specs.append(pl.BlockSpec((tm, tn), lambda i, j, k: (i, j)))
        args.append(residual)
    return pl.pallas_call(
        kernel,
        out_shape=jax.ShapeDtypeStruct((M, N), out_dtype),
        grid=(M // tm, N // tn, nk),
        in_specs=in_specs,
        out_specs=pl.BlockSpec((tm, tn), lambda i, j, k: (i, j)),
        scratch_shapes=[pltpu.VMEM((tm, tn), jnp.float32)],
        compiler_params=_cparams(("parallel", "parallel", "arbitrary")),
        cost_estimate=cost,
    )(*args)


# ---------------------------------------------------------------------------
# Standalone LayerNorm (final norm only)
# ---------------------------------------------------------------------------

def _layernorm_kernel(x_ref, g_ref, b_ref, o_ref):
    o_ref[...] = _layernorm_rows(x_ref[...], g_ref[...],
                                 b_ref[...]).astype(o_ref.dtype)


def layernorm(x, g, b):
    M, N = x.shape
    tm = _tile(M, _CFG["tm"], 8)
    return pl.pallas_call(
        _layernorm_kernel,
        out_shape=jax.ShapeDtypeStruct((M, N), jnp.float32),
        grid=(M // tm,),
        in_specs=[pl.BlockSpec((tm, N), lambda i: (i, 0)),
                  pl.BlockSpec((1, N), lambda i: (0, 0)),
                  pl.BlockSpec((1, N), lambda i: (0, 0))],
        out_specs=pl.BlockSpec((tm, N), lambda i: (i, 0)),
        compiler_params=_cparams(("parallel",)),
    )(x, g, b)


# ---------------------------------------------------------------------------
# Parameters (deterministic synthetic init; GEMM weights stored bf16;
# QKV / out-projection weights pre-reordered once into head-split layout).
# ---------------------------------------------------------------------------

def init_params(key, modalities, patch, hidden, num_layers, mlp_dim, heads):
    def nrm(k, shape, std=0.02):
        # TODO(synk): torch trunc_normal_ replaced with plain normal*std (init only).
        return jax.random.normal(k, shape, jnp.float32) * std

    n_mod = len(modalities)
    dh = hidden // heads
    patch_dim = patch ** 3
    keys = iter(jax.random.split(key, 4 + 4 * num_layers))
    params = {
        "tok_w": nrm(next(keys), (n_mod, patch_dim, hidden)).astype(jnp.bfloat16),
        "tok_b": jnp.zeros((n_mod, 1, hidden), jnp.float32),
        "cls": nrm(next(keys), (1, 1, hidden)),
    }
    blocks = []
    for _ in range(num_layers):
        wqkv = nrm(next(keys), (hidden, 3 * hidden))
        # One-time (free) layout plumbing: head-split weight planes.
        wqkv_h = (wqkv.reshape(hidden, 3, heads, dh)
                       .transpose(1, 2, 0, 3)
                       .reshape(3 * heads, hidden, dh)).astype(jnp.bfloat16)
        wo = nrm(next(keys), (hidden, hidden))
        blocks.append({
            "ln1_g": jnp.ones((1, hidden), jnp.float32),
            "ln1_b": jnp.zeros((1, hidden), jnp.float32),
            "wqkv_h": wqkv_h,
            "bqkv_h": jnp.zeros((3 * heads, 1, dh), jnp.float32),
            "wo_h": wo.reshape(heads, dh, hidden).astype(jnp.bfloat16),
            "bo": jnp.zeros((1, hidden), jnp.float32),
            "ln2_g": jnp.ones((1, hidden), jnp.float32),
            "ln2_b": jnp.zeros((1, hidden), jnp.float32),
            "w1": nrm(next(keys), (hidden, mlp_dim)).astype(jnp.bfloat16),
            "b1": jnp.zeros((1, mlp_dim), jnp.float32),
            "w2": nrm(next(keys), (mlp_dim, hidden)).astype(jnp.bfloat16),
            "b2": jnp.zeros((1, hidden), jnp.float32),
        })
    params["blocks"] = blocks
    params["norm_g"] = jnp.ones((1, hidden), jnp.float32)
    params["norm_b"] = jnp.zeros((1, hidden), jnp.float32)
    return params


# ---------------------------------------------------------------------------
# Forward pass
# ---------------------------------------------------------------------------

def patchify3d(vol, patch):
    # Conv3d with stride == kernel is an exact matmul over flattened patches.
    B, D, H, W = vol.shape
    d, h, w = D // patch, H // patch, W // patch
    x = vol.reshape(B, d, patch, h, patch, w, patch)
    x = x.transpose(0, 1, 3, 5, 2, 4, 6)
    return x.reshape(B, d * h * w, patch ** 3)


def vit_encoder_forward(params, x, *, modalities, patch, hidden, heads):
    # x: [B, M, D, H, W]  (non-dict path: x[:, i] is modality i, C=1)
    B = x.shape[0]
    n_mod = len(modalities)
    dh = hidden // heads

    # Tokenizers: one pallas_call over all modalities, output already in the
    # concatenated (B, n_mod*N, hidden) sequence layout.
    patches = jnp.stack([patchify3d(x[:, i], patch) for i in range(n_mod)],
                        axis=0)                         # (n_mod, B, N, P^3)
    tok = tokenize(patches, params["tok_w"], params["tok_b"], hidden)

    cls = jnp.broadcast_to(params["cls"], (B, 1, hidden)).astype(tok.dtype)
    tokens = jnp.concatenate([cls, tok], axis=1)        # [B, T, hidden]
    T = tokens.shape[1]
    t_pad = ((T + 7) // 8) * 8                          # sublane-aligned seq
    xf = jnp.pad(tokens, ((0, 0), (0, t_pad - T), (0, 0)))
    xf = xf.reshape(B * t_pad, hidden)                  # f32 residual stream
    M = B * t_pad

    # TODO(synk): dropout_rate=0.0 (eval) -> dropout layers are identity here.
    for blk in params["blocks"]:
        # x = x + Wo(attn(LN1(x))): LN fused+cached inside the head-split QKV
        # GEMM; residual fused into the head-split out-projection epilogue.
        qkv = qkv_head_matmul(xf, blk["wqkv_h"], blk["bqkv_h"],
                              blk["ln1_g"], blk["ln1_b"])     # (3H, M, dh) bf16
        qkv = qkv.reshape(3 * heads, B, t_pad, dh)            # free split
        a = flash_attention(qkv, heads=heads, t_actual=T)     # (H, B, tp, dh)
        xf = head_out_matmul(a.reshape(heads, M, dh),
                             blk["wo_h"], blk["bo"], xf)
        # x = x + W2(gelu(W1(LN2(x)))): LN fused+cached; hidden act kept bf16.
        h1 = ln_matmul(xf, blk["w1"], blk["b1"], blk["ln2_g"], blk["ln2_b"],
                       activation="gelu", out_dtype=jnp.bfloat16)
        xf = plain_matmul(h1, blk["w2"], blk["b2"], residual=xf)

    xf = layernorm(xf, params["norm_g"], params["norm_b"])
    return xf.reshape(B, t_pad, hidden)[:, :T, :]             # [B, T, hidden]


# ---------------------------------------------------------------------------
# Main
# ---------------------------------------------------------------------------

if __name__ == "__main__":
    modalities = ("t1", "t2")
    B, D = 2, 8            # batch, cubic volume side
    patch = 4              # -> 2*2*2 = 8 tokens per modality, 17 with cls
    hidden = 32
    num_layers = 2
    heads = 4
    mlp_dim = 64

    key = jax.random.PRNGKey(0)
    k_x, k_p = jax.random.split(key)
    x = jax.random.normal(k_x, (B, len(modalities), D, D, D), jnp.float32)
    params = init_params(k_p, modalities, patch, hidden, num_layers, mlp_dim,
                         heads)

    fwd = jax.jit(functools.partial(vit_encoder_forward, modalities=modalities,
                                    patch=patch, hidden=hidden, heads=heads))
    out = fwd(params, x)
    out = jax.block_until_ready(out)

    T = 1 + len(modalities) * (D // patch) ** 3
    assert out.shape == (B, T, hidden), out.shape
    assert bool(jnp.all(jnp.isfinite(out)))
    print("KERNEL_OK")
</pallas_src>

<mosaic_0001>
module attributes {stable_mosaic.version = 11 : i64} {
  func.func @_tokenizer_kernel(%arg0: i32, %arg1: i32, %arg2: i32, %arg3: memref<1x1x8x64xf32, #tpu.memory_space<vmem>>, %arg4: memref<1x64x32xbf16, #tpu.memory_space<vmem>>, %arg5: memref<1x1x32xf32, #tpu.memory_space<vmem>>, %arg6: memref<1x8x32xf32, #tpu.memory_space<vmem>>) attributes {dimension_semantics = [#tpu.dimension_semantics<parallel>, #tpu.dimension_semantics<parallel>, #tpu.dimension_semantics<parallel>], iteration_bounds = array<i64: 2, 2, 1>, scalar_prefetch = 0 : i64, scratch_operands = 0 : i64, tpu.core_type = #tpu.core_type<tc>, window_params = [{transform_indices = @transform_0, window_bounds = array<i64: 1, 1, 8, 64>}, {transform_indices = @transform_1, window_bounds = array<i64: 1, 64, 32>}, {transform_indices = @transform_2, window_bounds = array<i64: 1, 1, 32>}, {transform_indices = @transform_3, window_bounds = array<i64: 1, 8, 32>}]} {
    %c0 = arith.constant 0 : index
    %c0_0 = arith.constant 0 : index
    %c0_1 = arith.constant 0 : index
    %c0_2 = arith.constant 0 : index
    %0 = vector.load %arg3[%c0, %c0_0, %c0_1, %c0_2] : memref<1x1x8x64xf32, #tpu.memory_space<vmem>>, vector<1x1x8x64xf32>
    %1 = vector.shape_cast %0 : vector<1x1x8x64xf32> to vector<8x64xf32>
    %2 = arith.truncf %1 : vector<8x64xf32> to vector<8x64xbf16>
    %c0_3 = arith.constant 0 : index
    %c0_4 = arith.constant 0 : index
    %c0_5 = arith.constant 0 : index
    %3 = vector.load %arg4[%c0_3, %c0_4, %c0_5] : memref<1x64x32xbf16, #tpu.memory_space<vmem>>, vector<1x64x32xbf16>
    %4 = vector.shape_cast %3 : vector<1x64x32xbf16> to vector<64x32xbf16>
    %cst = arith.constant dense<0.000000e+00> : vector<8x32xf32>
    %5 = tpu.matmul %2, %4, %cst {dimension_numbers = #tpu.dot_dimension_numbers<[1], [0], [0], [1], [0, 0, 1, 1], [], []>} : vector<8x64xbf16>, vector<64x32xbf16>, vector<8x32xf32> -> vector<8x32xf32>
    %c0_6 = arith.constant 0 : index
    %c0_7 = arith.constant 0 : index
    %c0_8 = arith.constant 0 : index
    %6 = vector.load %arg5[%c0_6, %c0_7, %c0_8] : memref<1x1x32xf32, #tpu.memory_space<vmem>>, vector<1x1x32xf32>
    %7 = vector.shape_cast %6 : vector<1x1x32xf32> to vector<1x32xf32>
    %8 = vector.broadcast %7 : vector<1x32xf32> to vector<8x32xf32>
    %9 = arith.addf %5, %8 : vector<8x32xf32>
    %c0_9 = arith.constant 0 : index
    %c0_10 = arith.constant 0 : index
    %c0_11 = arith.constant 0 : index
    %10 = vector.load %arg6[%c0_9, %c0_10, %c0_11] : memref<1x8x32xf32, #tpu.memory_space<vmem>>, vector<1x8x32xf32>
    %11 = vector.shape_cast %10 : vector<1x8x32xf32> to vector<8x32xf32>
    %12 = vector.shape_cast %9 : vector<8x32xf32> to vector<1x8x32xf32>
    tpu.vector_store %arg6[%c0_9, %c0_10, %c0_11], %12 {strides = array<i32>} : memref<1x8x32xf32, #tpu.memory_space<vmem>>, vector<1x8x32xf32>,
    return
  }
  func.func @transform_0(%arg0: i32, %arg1: i32, %arg2: i32) -> (i32, i32, i32, i32) {
    %c0_i32 = arith.constant 0 : i32
    %c0_i32_0 = arith.constant 0 : i32
    return %arg0, %arg1, %arg2, %c0_i32 : i32, i32, i32, i32
  }
  func.func @transform_1(%arg0: i32, %arg1: i32, %arg2: i32) -> (i32, i32, i32) {
    %c0_i32 = arith.constant 0 : i32
    %c0_i32_0 = arith.constant 0 : i32
    %c0_i32_1 = arith.constant 0 : i32
    return %arg0, %c0_i32, %c0_i32_0 : i32, i32, i32
  }
  func.func @transform_2(%arg0: i32, %arg1: i32, %arg2: i32) -> (i32, i32, i32) {
    %c0_i32 = arith.constant 0 : i32
    %c0_i32_0 = arith.constant 0 : i32
    %c0_i32_1 = arith.constant 0 : i32
    return %arg0, %c0_i32, %c0_i32_0 : i32, i32, i32
  }
  func.func @transform_3(%arg0: i32, %arg1: i32, %arg2: i32) -> (i32, i32, i32) {
    %c1_i32 = arith.constant 1 : i32
    %0 = arith.muli %arg0, %c1_i32 : i32
    %1 = arith.addi %0, %arg2 : i32
    %c0_i32 = arith.constant 0 : i32
    %c0_i32_0 = arith.constant 0 : i32
    return %arg1, %1, %c0_i32 : i32, i32, i32
  }
}

module attributes {stable_mosaic.version = 11 : i64} {
  func.func @kernel(%arg0: i32, %arg1: i32, %arg2: i32, %arg3: i32, %arg4: memref<1x1x24x8xbf16, #tpu.memory_space<vmem>>, %arg5: memref<1x1x24x8xbf16, #tpu.memory_space<vmem>>, %arg6: memref<1x1x24x8xbf16, #tpu.memory_space<vmem>>, %arg7: memref<1x1x24x8xbf16, #tpu.memory_space<vmem>>, %arg8: memref<24x1xf32, #tpu.memory_space<vmem>>, %arg9: memref<24x1xf32, #tpu.memory_space<vmem>>, %arg10: memref<24x8xf32, #tpu.memory_space<vmem>>) attributes {dimension_semantics = [#tpu.dimension_semantics<parallel>, #tpu.dimension_semantics<parallel>, #tpu.dimension_semantics<parallel>, #tpu.dimension_semantics<arbitrary>], iteration_bounds = array<i64: 2, 4, 1, 1>, scalar_prefetch = 0 : i64, scratch_operands = 3 : i64, tpu.core_type = #tpu.core_type<tc>, window_params = [{transform_indices = @transform_0, window_bounds = array<i64: 1, 1, 24, 8>}, {transform_indices = @transform_1, window_bounds = array<i64: 1, 1, 24, 8>}, {transform_indices = @transform_2, window_bounds = array<i64: 1, 1, 24, 8>}, {transform_indices = @transform_3, window_bounds = array<i64: 1, 1, 24, 8>}]} {
    %c0_i32 = arith.constant 0 : i32
    %0 = arith.cmpi eq, %arg3, %c0_i32 : i32
    %1 = arith.extui %0 : i1 to i32
    %c0_i32_0 = arith.constant 0 : i32
    %2 = arith.cmpi ne, %1, %c0_i32_0 : i32
    scf.if %2 {
      %cst_31 = arith.constant 0xFF800000 : f32
      %46 = vector.broadcast %cst_31 : f32 to vector<24x1xf32>
      %c0_32 = arith.constant 0 : index
      %c0_33 = arith.constant 0 : index
      %47 = vector.load %arg8[%c0_32, %c0_33] : memref<24x1xf32, #tpu.memory_space<vmem>>, vector<24x1xf32>
      tpu.vector_store %arg8[%c0_32, %c0_33], %46 {strides = array<i32>} : memref<24x1xf32, #tpu.memory_space<vmem>>, vector<24x1xf32>,
      %cst_34 = arith.constant 0.000000e+00 : f32
      %48 = vector.broadcast %cst_34 : f32 to vector<24x1xf32>
      %c0_35 = arith.constant 0 : index
      %c0_36 = arith.constant 0 : index
      %49 = vector.load %arg9[%c0_35, %c0_36] : memref<24x1xf32, #tpu.memory_space<vmem>>, vector<24x1xf32>
      tpu.vector_store %arg9[%c0_35, %c0_36], %48 {strides = array<i32>} : memref<24x1xf32, #tpu.memory_space<vmem>>, vector<24x1xf32>,
      %cst_37 = arith.constant 0.000000e+00 : f32
      %50 = vector.broadcast %cst_37 : f32 to vector<24x8xf32>
      %c0_38 = arith.constant 0 : index
      %c0_39 = arith.constant 0 : index
      %51 = vector.load %arg10[%c0_38, %c0_39] : memref<24x8xf32, #tpu.memory_space<vmem>>, vector<24x8xf32>
      tpu.vector_store %arg10[%c0_38, %c0_39], %50 {strides = array<i32>} : memref<24x8xf32, #tpu.memory_space<vmem>>, vector<24x8xf32>,
    } else {
    }
    %c0 = arith.constant 0 : index
    %c0_1 = arith.constant 0 : index
    %c0_2 = arith.constant 0 : index
    %c0_3 = arith.constant 0 : index
    %3 = vector.load %arg4[%c0, %c0_1, %c0_2, %c0_3] : memref<1x1x24x8xbf16, #tpu.memory_space<vmem>>, vector<1x1x24x8xbf16>
    %4 = vector.shape_cast %3 : vector<1x1x24x8xbf16> to vector<24x8xbf16>
    %c0_4 = arith.constant 0 : index
    %c0_5 = arith.constant 0 : index
    %c0_6 = arith.constant 0 : index
    %c0_7 = arith.constant 0 : index
    %5 = vector.load %arg5[%c0_4, %c0_5, %c0_6, %c0_7] : memref<1x1x24x8xbf16, #tpu.memory_space<vmem>>, vector<1x1x24x8xbf16>
    %6 = vector.shape_cast %5 : vector<1x1x24x8xbf16> to vector<24x8xbf16>
    %c0_8 = arith.constant 0 : index
    %c0_9 = arith.constant 0 : index
    %c0_10 = arith.constant 0 : index
    %c0_11 = arith.constant 0 : index
    %7 = vector.load %arg6[%c0_8, %c0_9, %c0_10, %c0_11] : memref<1x1x24x8xbf16, #tpu.memory_space<vmem>>, vector<1x1x24x8xbf16>
    %8 = vector.shape_cast %7 : vector<1x1x24x8xbf16> to vector<24x8xbf16>
    %cst = arith.constant dense<0.000000e+00> : vector<24x24xf32>
    %9 = tpu.matmul %4, %6, %cst {dimension_numbers = #tpu.dot_dimension_numbers<[1], [1], [0], [0], [0, 0, 1, 0], [], []>} : vector<24x8xbf16>, vector<24x8xbf16>, vector<24x24xf32> -> vector<24x24xf32>
    %cst_12 = arith.constant 0.353553385 : f32
    %10 = vector.broadcast %cst_12 : f32 to vector<24x24xf32>
    %11 = arith.mulf %9, %10 : vector<24x24xf32>
    %12 = tpu.iota {dimensions = array<i32: 1>} : vector<24x24xi32>
    %c24_i32 = arith.constant 24 : i32
    %13 = arith.muli %arg3, %c24_i32 : i32
    %14 = vector.broadcast %13 : i32 to vector<24x24xi32>
    %15 = arith.addi %12, %14 : vector<24x24xi32>
    %c17_i32 = arith.constant 17 : i32
    %16 = vector.broadcast %c17_i32 : i32 to vector<24x24xi32>
    %17 = arith.cmpi slt, %15, %16 : vector<24x24xi32>
    %cst_13 = arith.constant -1.000000e+30 : f32
    %18 = vector.broadcast %cst_13 : f32 to vector<24x24xf32>
    %19 = arith.select %17, %11, %18 : vector<24x24xi1>, vector<24x24xf32>
    %c0_14 = arith.constant 0 : index
    %c0_15 = arith.constant 0 : index
    %20 = vector.load %arg8[%c0_14, %c0_15] : memref<24x1xf32, #tpu.memory_space<vmem>>, vector<24x1xf32>
    %cst_16 = arith.constant dense<0xFF800000> : vector<24xf32>
    %21 = vector.multi_reduction <maximumf>, %19, %cst_16 [1] : vector<24x24xf32> to vector<24xf32>
    %22 = vector.shape_cast %21 : vector<24xf32> to vector<24x1xf32>
    %23 = arith.maximumf %20, %22 : vector<24x1xf32>
    %24 = arith.subf %20, %23 : vector<24x1xf32>
    %25 = math.exp %24 : vector<24x1xf32>
    %26 = vector.broadcast %23 : vector<24x1xf32> to vector<24x24xf32>
    %27 = arith.subf %19, %26 : vector<24x24xf32>
    %28 = math.exp %27 : vector<24x24xf32>
    %c0_17 = arith.constant 0 : index
    %c0_18 = arith.constant 0 : index
    %29 = vector.load %arg9[%c0_17, %c0_18] : memref<24x1xf32, #tpu.memory_space<vmem>>, vector<24x1xf32>
    %30 = arith.mulf %25, %29 : vector<24x1xf32>
    %cst_19 = arith.constant dense<0.000000e+00> : vector<24xf32>
    %31 = vector.multi_reduction <add>, %28, %cst_19 [1] : vector<24x24xf32> to vector<24xf32>
    %32 = vector.shape_cast %31 : vector<24xf32> to vector<24x1xf32>
    %33 = arith.addf %30, %32 : vector<24x1xf32>
    %c0_20 = arith.constant 0 : index
    %c0_21 = arith.constant 0 : index
    %34 = vector.load %arg9[%c0_20, %c0_21] : memref<24x1xf32, #tpu.memory_space<vmem>>, vector<24x1xf32>
    tpu.vector_store %arg9[%c0_20, %c0_21], %33 {strides = array<i32>} : memref<24x1xf32, #tpu.memory_space<vmem>>, vector<24x1xf32>,
    %c0_22 = arith.constant 0 : index
    %c0_23 = arith.constant 0 : index
    %35 = vector.load %arg10[%c0_22, %c0_23] : memref<24x8xf32, #tpu.memory_space<vmem>>, vector<24x8xf32>
    %36 = vector.broadcast %25 : vector<24x1xf32> to vector<24x8xf32>
    %37 = arith.mulf %36, %35 : vector<24x8xf32>
    %38 = arith.truncf %28 : vector<24x24xf32> to vector<24x24xbf16>
    %cst_24 = arith.constant dense<0.000000e+00> : vector<24x8xf32>
    %39 = tpu.matmul %38, %8, %cst_24 {dimension_numbers = #tpu.dot_dimension_numbers<[1], [0], [0], [1], [0, 0, 1, 1], [], []>} : vector<24x24xbf16>, vector<24x8xbf16>, vector<24x8xf32> -> vector<24x8xf32>
    %40 = arith.addf %37, %39 : vector<24x8xf32>
    %c0_25 = arith.constant 0 : index
    %c0_26 = arith.constant 0 : index
    %41 = vector.load %arg10[%c0_25, %c0_26] : memref<24x8xf32, #tpu.memory_space<vmem>>, vector<24x8xf32>
    tpu.vector_store %arg10[%c0_25, %c0_26], %40 {strides = array<i32>} : memref<24x8xf32, #tpu.memory_space<vmem>>, vector<24x8xf32>,
    %c0_27 = arith.constant 0 : index
    %c0_28 = arith.constant 0 : index
    %42 = vector.load %arg8[%c0_27, %c0_28] : memref<24x1xf32, #tpu.memory_space<vmem>>, vector<24x1xf32>
    tpu.vector_store %arg8[%c0_27, %c0_28], %23 {strides = array<i32>} : memref<24x1xf32, #tpu.memory_space<vmem>>, vector<24x1xf32>,
    %c0_i32_29 = arith.constant 0 : i32
    %43 = arith.cmpi eq, %arg3, %c0_i32_29 : i32
    %44 = arith.extui %43 : i1 to i32
    %c0_i32_30 = arith.constant 0 : i32
    %45 = arith.cmpi ne, %44, %c0_i32_30 : i32
    scf.if %45 {
      %c0_31 = arith.constant 0 : index
      %c0_32 = arith.constant 0 : index
      %46 = vector.load %arg10[%c0_31, %c0_32] : memref<24x8xf32, #tpu.memory_space<vmem>>, vector<24x8xf32>
      %c0_33 = arith.constant 0 : index
      %c0_34 = arith.constant 0 : index
      %47 = vector.load %arg9[%c0_33, %c0_34] : memref<24x1xf32, #tpu.memory_space<vmem>>, vector<24x1xf32>
      %48 = tpu.reciprocal %47 {approx = true} : vector<24x1xf32> -> vector<24x1xf32>
      %49 = vector.broadcast %48 : vector<24x1xf32> to vector<24x8xf32>
      %50 = arith.mulf %46, %49 : vector<24x8xf32>
      %51 = arith.truncf %50 : vector<24x8xf32> to vector<24x8xbf16>
      %c0_35 = arith.constant 0 : index
      %c0_36 = arith.constant 0 : index
      %c0_37 = arith.constant 0 : index
      %c0_38 = arith.constant 0 : index
      %52 = vector.load %arg7[%c0_35, %c0_36, %c0_37, %c0_38] : memref<1x1x24x8xbf16, #tpu.memory_space<vmem>>, vector<1x1x24x8xbf16>
      %53 = vector.shape_cast %52 : vector<1x1x24x8xbf16> to vector<24x8xbf16>
      %54 = vector.shape_cast %51 : vector<24x8xbf16> to vector<1x1x24x8xbf16>
      tpu.vector_store %arg7[%c0_35, %c0_36, %c0_37, %c0_38], %54 {strides = array<i32>} : memref<1x1x24x8xbf16, #tpu.memory_space<vmem>>, vector<1x1x24x8xbf16>,
    } else {
    }
    return
  }
  func.func @transform_0(%arg0: i32, %arg1: i32, %arg2: i32, %arg3: i32) -> (i32, i32, i32, i32) {
    %c0_i32 = arith.constant 0 : i32
    %c0_i32_0 = arith.constant 0 : i32
    return %arg1, %arg0, %arg2, %c0_i32 : i32, i32, i32, i32
  }
  func.func @transform_1(%arg0: i32, %arg1: i32, %arg2: i32, %arg3: i32) -> (i32, i32, i32, i32) {
    %c4_i32 = arith.constant 4 : i32
    %0 = arith.addi %c4_i32, %arg1 : i32
    %c0_i32 = arith.constant 0 : i32
    %c0_i32_0 = arith.constant 0 : i32
    return %0, %arg0, %arg3, %c0_i32 : i32, i32, i32, i32
  }
  func.func @transform_2(%arg0: i32, %arg1: i32, %arg2: i32, %arg3: i32) -> (i32, i32, i32, i32) {
    %c8_i32 = arith.constant 8 : i32
    %0 = arith.addi %c8_i32, %arg1 : i32
    %c0_i32 = arith.constant 0 : i32
    %c0_i32_0 = arith.constant 0 : i32
    return %0, %arg0, %arg3, %c0_i32 : i32, i32, i32, i32
  }
  func.func @transform_3(%arg0: i32, %arg1: i32, %arg2: i32, %arg3: i32) -> (i32, i32, i32, i32) {
    %c0_i32 = arith.constant 0 : i32
    %c0_i32_0 = arith.constant 0 : i32
    return %arg1, %arg0, %arg2, %c0_i32 : i32, i32, i32, i32
  }
}

module attributes {stable_mosaic.version = 11 : i64} {
  func.func @_qkv_kernel(%arg0: i32, %arg1: i32, %arg2: memref<48x32xf32, #tpu.memory_space<vmem>>, %arg3: memref<1x32x8xbf16, #tpu.memory_space<vmem>>, %arg4: memref<1x1x8xf32, #tpu.memory_space<vmem>>, %arg5: memref<1x32xf32, #tpu.memory_space<vmem>>, %arg6: memref<1x32xf32, #tpu.memory_space<vmem>>, %arg7: memref<1x48x8xbf16, #tpu.memory_space<vmem>>, %arg8: memref<48x32xbf16, #tpu.memory_space<vmem>>) attributes {dimension_semantics = [#tpu.dimension_semantics<parallel>, #tpu.dimension_semantics<arbitrary>], iteration_bounds = array<i64: 1, 12>, scalar_prefetch = 0 : i64, scratch_operands = 1 : i64, tpu.core_type = #tpu.core_type<tc>, window_params = [{transform_indices = @transform_0, window_bounds = array<i64: 48, 32>}, {transform_indices = @transform_1, window_bounds = array<i64: 1, 32, 8>}, {transform_indices = @transform_2, window_bounds = array<i64: 1, 1, 8>}, {pipeline_mode = #tpu.pipeline_mode<synchronous>, transform_indices = @transform_3, window_bounds = array<i64: 1, 32>}, {pipeline_mode = #tpu.pipeline_mode<synchronous>, transform_indices = @transform_4, window_bounds = array<i64: 1, 32>}, {transform_indices = @transform_5, window_bounds = array<i64: 1, 48, 8>}]} {
    %c0_i32 = arith.constant 0 : i32
    %0 = arith.cmpi eq, %arg1, %c0_i32 : i32
    %1 = arith.extui %0 : i1 to i32
    %c0_i32_0 = arith.constant 0 : i32
    %2 = arith.cmpi ne, %1, %c0_i32_0 : i32
    scf.if %2 {
      %c0_11 = arith.constant 0 : index
      %c0_12 = arith.constant 0 : index
      %15 = vector.load %arg2[%c0_11, %c0_12] : memref<48x32xf32, #tpu.memory_space<vmem>>, vector<48x32xf32>
      %c0_13 = arith.constant 0 : index
      %c0_14 = arith.constant 0 : index
      %16 = vector.load %arg5[%c0_13, %c0_14] : memref<1x32xf32, #tpu.memory_space<vmem>>, vector<1x32xf32>
      %c0_15 = arith.constant 0 : index
      %c0_16 = arith.constant 0 : index
      %17 = vector.load %arg6[%c0_15, %c0_16] : memref<1x32xf32, #tpu.memory_space<vmem>>, vector<1x32xf32>
      %cst_17 = arith.constant dense<0.000000e+00> : vector<48xf32>
      %18 = vector.multi_reduction <add>, %15, %cst_17 [1] : vector<48x32xf32> to vector<48xf32>
      %19 = vector.shape_cast %18 : vector<48xf32> to vector<48x1xf32>
      %cst_18 = arith.constant 3.200000e+01 : f32
      %20 = vector.broadcast %cst_18 : f32 to vector<48x1xf32>
      %21 = arith.divf %19, %20 : vector<48x1xf32>
      %22 = vector.broadcast %21 : vector<48x1xf32> to vector<48x32xf32>
      %23 = arith.subf %15, %22 : vector<48x32xf32>
      %24 = arith.mulf %23, %23 : vector<48x32xf32>
      %cst_19 = arith.constant dense<0.000000e+00> : vector<48xf32>
      %25 = vector.multi_reduction <add>, %24, %cst_19 [1] : vector<48x32xf32> to vector<48xf32>
      %26 = vector.shape_cast %25 : vector<48xf32> to vector<48x1xf32>
      %cst_20 = arith.constant 3.200000e+01 : f32
      %27 = vector.broadcast %cst_20 : f32 to vector<48x1xf32>
      %28 = arith.divf %26, %27 : vector<48x1xf32>
      %cst_21 = arith.constant 9.99999974E-6 : f32
      %29 = vector.broadcast %cst_21 : f32 to vector<48x1xf32>
      %30 = arith.addf %28, %29 : vector<48x1xf32>
      %31 = math.rsqrt %30 : vector<48x1xf32>
      %32 = vector.broadcast %31 : vector<48x1xf32> to vector<48x32xf32>
      %33 = arith.mulf %23, %32 : vector<48x32xf32>
      %34 = vector.broadcast %16 : vector<1x32xf32> to vector<48x32xf32>
      %35 = arith.mulf %33, %34 : vector<48x32xf32>
      %36 = vector.broadcast %17 : vector<1x32xf32> to vector<48x32xf32>
      %37 = arith.addf %35, %36 : vector<48x32xf32>
      %38 = arith.truncf %37 : vector<48x32xf32> to vector<48x32xbf16>
      %c0_22 = arith.constant 0 : index
      %c0_23 = arith.constant 0 : index
      %39 = vector.load %arg8[%c0_22, %c0_23] : memref<48x32xbf16, #tpu.memory_space<vmem>>, vector<48x32xbf16>
      tpu.vector_store %arg8[%c0_22, %c0_23], %38 {strides = array<i32>} : memref<48x32xbf16, #tpu.memory_space<vmem>>, vector<48x32xbf16>,
    } else {
    }
    %c0 = arith.constant 0 : index
    %c0_1 = arith.constant 0 : index
    %3 = vector.load %arg8[%c0, %c0_1] : memref<48x32xbf16, #tpu.memory_space<vmem>>, vector<48x32xbf16>
    %c0_2 = arith.constant 0 : index
    %c0_3 = arith.constant 0 : index
    %c0_4 = arith.constant 0 : index
    %4 = vector.load %arg3[%c0_2, %c0_3, %c0_4] : memref<1x32x8xbf16, #tpu.memory_space<vmem>>, vector<1x32x8xbf16>
    %5 = vector.shape_cast %4 : vector<1x32x8xbf16> to vector<32x8xbf16>
    %cst = arith.constant dense<0.000000e+00> : vector<48x8xf32>
    %6 = tpu.matmul %3, %5, %cst {dimension_numbers = #tpu.dot_dimension_numbers<[1], [0], [0], [1], [0, 0, 1, 1], [], []>} : vector<48x32xbf16>, vector<32x8xbf16>, vector<48x8xf32> -> vector<48x8xf32>
    %c0_5 = arith.constant 0 : index
    %c0_6 = arith.constant 0 : index
    %c0_7 = arith.constant 0 : index
    %7 = vector.load %arg4[%c0_5, %c0_6, %c0_7] : memref<1x1x8xf32, #tpu.memory_space<vmem>>, vector<1x1x8xf32>
    %8 = vector.shape_cast %7 : vector<1x1x8xf32> to vector<1x8xf32>
    %9 = vector.broadcast %8 : vector<1x8xf32> to vector<48x8xf32>
    %10 = arith.addf %6, %9 : vector<48x8xf32>
    %11 = arith.truncf %10 : vector<48x8xf32> to vector<48x8xbf16>
    %c0_8 = arith.constant 0 : index
    %c0_9 = arith.constant 0 : index
    %c0_10 = arith.constant 0 : index
    %12 = vector.load %arg7[%c0_8, %c0_9, %c0_10] : memref<1x48x8xbf16, #tpu.memory_space<vmem>>, vector<1x48x8xbf16>
    %13 = vector.shape_cast %12 : vector<1x48x8xbf16> to vector<48x8xbf16>
    %14 = vector.shape_cast %11 : vector<48x8xbf16> to vector<1x48x8xbf16>
    tpu.vector_store %arg7[%c0_8, %c0_9, %c0_10], %14 {strides = array<i32>} : memref<1x48x8xbf16, #tpu.memory_space<vmem>>, vector<1x48x8xbf16>,
    return
  }
  func.func @transform_0(%arg0: i32, %arg1: i32) -> (i32, i32) {
    %c0_i32 = arith.constant 0 : i32
    %c0_i32_0 = arith.constant 0 : i32
    return %arg0, %c0_i32 : i32, i32
  }
  func.func @transform_1(%arg0: i32, %arg1: i32) -> (i32, i32, i32) {
    %c0_i32 = arith.constant 0 : i32
    %c0_i32_0 = arith.constant 0 : i32
    %c0_i32_1 = arith.constant 0 : i32
    return %arg1, %c0_i32, %c0_i32_0 : i32, i32, i32
  }
  func.func @transform_2(%arg0: i32, %arg1: i32) -> (i32, i32, i32) {
    %c0_i32 = arith.constant 0 : i32
    %c0_i32_0 = arith.constant 0 : i32
    %c0_i32_1 = arith.constant 0 : i32
    return %arg1, %c0_i32, %c0_i32_0 : i32, i32, i32
  }
  func.func @transform_3(%arg0: i32, %arg1: i32) -> (i32, i32) {
    %c0_i32 = arith.constant 0 : i32
    %c0_i32_0 = arith.constant 0 : i32
    %c0_i32_1 = arith.constant 0 : i32
    return %c0_i32, %c0_i32_0 : i32, i32
  }
  func.func @transform_4(%arg0: i32, %arg1: i32) -> (i32, i32) {
    %c0_i32 = arith.constant 0 : i32
    %c0_i32_0 = arith.constant 0 : i32
    %c0_i32_1 = arith.constant 0 : i32
    return %c0_i32, %c0_i32_0 : i32, i32
  }
  func.func @transform_5(%arg0: i32, %arg1: i32) -> (i32, i32, i32) {
    %c0_i32 = arith.constant 0 : i32
    %c0_i32_0 = arith.constant 0 : i32
    return %arg1, %arg0, %c0_i32 : i32, i32, i32
  }
}

module attributes {stable_mosaic.version = 11 : i64} {
  func.func @_head_out_kernel(%arg0: i32, %arg1: i32, %arg2: i32, %arg3: memref<1x48x8xbf16, #tpu.memory_space<vmem>>, %arg4: memref<1x8x32xbf16, #tpu.memory_space<vmem>>, %arg5: memref<1x32xf32, #tpu.memory_space<vmem>>, %arg6: memref<48x32xf32, #tpu.memory_space<vmem>>, %arg7: memref<48x32xf32, #tpu.memory_space<vmem>>, %arg8: memref<48x32xf32, #tpu.memory_space<vmem>>) attributes {dimension_semantics = [#tpu.dimension_semantics<parallel>, #tpu.dimension_semantics<parallel>, #tpu.dimension_semantics<arbitrary>], iteration_bounds = array<i64: 1, 1, 4>, scalar_prefetch = 0 : i64, scratch_operands = 1 : i64, tpu.core_type = #tpu.core_type<tc>, window_params = [{transform_indices = @transform_0, window_bounds = array<i64: 1, 48, 8>}, {transform_indices = @transform_1, window_bounds = array<i64: 1, 8, 32>}, {transform_indices = @transform_2, window_bounds = array<i64: 1, 32>}, {transform_indices = @transform_3, window_bounds = array<i64: 48, 32>}, {transform_indices = @transform_4, window_bounds = array<i64: 48, 32>}]} {
    %c0_i32 = arith.constant 0 : i32
    %0 = arith.cmpi eq, %arg2, %c0_i32 : i32
    %1 = arith.extui %0 : i1 to i32
    %c0_i32_0 = arith.constant 0 : i32
    %2 = arith.cmpi ne, %1, %c0_i32_0 : i32
    scf.if %2 {
      %cst_11 = arith.constant 0.000000e+00 : f32
      %14 = vector.broadcast %cst_11 : f32 to vector<48x32xf32>
      %c0_12 = arith.constant 0 : index
      %c0_13 = arith.constant 0 : index
      %15 = vector.load %arg8[%c0_12, %c0_13] : memref<48x32xf32, #tpu.memory_space<vmem>>, vector<48x32xf32>
      tpu.vector_store %arg8[%c0_12, %c0_13], %14 {strides = array<i32>} : memref<48x32xf32, #tpu.memory_space<vmem>>, vector<48x32xf32>,
    } else {
    }
    %c0 = arith.constant 0 : index
    %c0_1 = arith.constant 0 : index
    %3 = vector.load %arg8[%c0, %c0_1] : memref<48x32xf32, #tpu.memory_space<vmem>>, vector<48x32xf32>
    %c0_2 = arith.constant 0 : index
    %c0_3 = arith.constant 0 : index
    %c0_4 = arith.constant 0 : index
    %4 = vector.load %arg3[%c0_2, %c0_3, %c0_4] : memref<1x48x8xbf16, #tpu.memory_space<vmem>>, vector<1x48x8xbf16>
    %5 = vector.shape_cast %4 : vector<1x48x8xbf16> to vector<48x8xbf16>
    %c0_5 = arith.constant 0 : index
    %c0_6 = arith.constant 0 : index
    %c0_7 = arith.constant 0 : index
    %6 = vector.load %arg4[%c0_5, %c0_6, %c0_7] : memref<1x8x32xbf16, #tpu.memory_space<vmem>>, vector<1x8x32xbf16>
    %7 = vector.shape_cast %6 : vector<1x8x32xbf16> to vector<8x32xbf16>
    %cst = arith.constant dense<0.000000e+00> : vector<48x32xf32>
    %8 = tpu.matmul %5, %7, %cst {dimension_numbers = #tpu.dot_dimension_numbers<[1], [0], [0], [1], [0, 0, 1, 1], [], []>} : vector<48x8xbf16>, vector<8x32xbf16>, vector<48x32xf32> -> vector<48x32xf32>
    %9 = arith.addf %3, %8 : vector<48x32xf32>
    %c0_8 = arith.constant 0 : index
    %c0_9 = arith.constant 0 : index
    %10 = vector.load %arg8[%c0_8, %c0_9] : memref<48x32xf32, #tpu.memory_space<vmem>>, vector<48x32xf32>
    tpu.vector_store %arg8[%c0_8, %c0_9], %9 {strides = array<i32>} : memref<48x32xf32, #tpu.memory_space<vmem>>, vector<48x32xf32>,
    %c3_i32 = arith.constant 3 : i32
    %11 = arith.cmpi eq, %arg2, %c3_i32 : i32
    %12 = arith.extui %11 : i1 to i32
    %c0_i32_10 = arith.constant 0 : i32
    %13 = arith.cmpi ne, %12, %c0_i32_10 : i32
    scf.if %13 {
      %c0_11 = arith.constant 0 : index
      %c0_12 = arith.constant 0 : index
      %14 = vector.load %arg8[%c0_11, %c0_12] : memref<48x32xf32, #tpu.memory_space<vmem>>, vector<48x32xf32>
      %c0_13 = arith.constant 0 : index
      %c0_14 = arith.constant 0 : index
      %15 = vector.load %arg5[%c0_13, %c0_14] : memref<1x32xf32, #tpu.memory_space<vmem>>, vector<1x32xf32>
      %16 = vector.broadcast %15 : vector<1x32xf32> to vector<48x32xf32>
      %17 = arith.addf %14, %16 : vector<48x32xf32>
      %c0_15 = arith.constant 0 : index
      %c0_16 = arith.constant 0 : index
      %18 = vector.load %arg6[%c0_15, %c0_16] : memref<48x32xf32, #tpu.memory_space<vmem>>, vector<48x32xf32>
      %19 = arith.addf %17, %18 : vector<48x32xf32>
      %c0_17 = arith.constant 0 : index
      %c0_18 = arith.constant 0 : index
      %20 = vector.load %arg7[%c0_17, %c0_18] : memref<48x32xf32, #tpu.memory_space<vmem>>, vector<48x32xf32>
      tpu.vector_store %arg7[%c0_17, %c0_18], %19 {strides = array<i32>} : memref<48x32xf32, #tpu.memory_space<vmem>>, vector<48x32xf32>,
    } else {
    }
    return
  }
  func.func @transform_0(%arg0: i32, %arg1: i32, %arg2: i32) -> (i32, i32, i32) {
    %c0_i32 = arith.constant 0 : i32
    %c0_i32_0 = arith.constant 0 : i32
    return %arg2, %arg0, %c0_i32 : i32, i32, i32
  }
  func.func @transform_1(%arg0: i32, %arg1: i32, %arg2: i32) -> (i32, i32, i32) {
    %c0_i32 = arith.constant 0 : i32
    %c0_i32_0 = arith.constant 0 : i32
    return %arg2, %c0_i32, %arg1 : i32, i32, i32
  }
  func.func @transform_2(%arg0: i32, %arg1: i32, %arg2: i32) -> (i32, i32) {
    %c0_i32 = arith.constant 0 : i32
    %c0_i32_0 = arith.constant 0 : i32
    return %c0_i32, %arg1 : i32, i32
  }
  func.func @transform_3(%arg0: i32, %arg1: i32, %arg2: i32) -> (i32, i32) {
    %c0_i32 = arith.constant 0 : i32
    return %arg0, %arg1 : i32, i32
  }
  func.func @transform_4(%arg0: i32, %arg1: i32, %arg2: i32) -> (i32, i32) {
    %c0_i32 = arith.constant 0 : i32
    return %arg0, %arg1 : i32, i32
  }
}

module attributes {stable_mosaic.version = 11 : i64} {
  func.func @kernel(%arg0: i32, %arg1: i32, %arg2: memref<48x64xbf16, #tpu.memory_space<vmem>>, %arg3: memref<64x32xbf16, #tpu.memory_space<vmem>>, %arg4: memref<1x32xf32, #tpu.memory_space<vmem>>, %arg5: memref<48x32xf32, #tpu.memory_space<vmem>>, %arg6: memref<48x32xf32, #tpu.memory_space<vmem>>) attributes {dimension_semantics = [#tpu.dimension_semantics<parallel>, #tpu.dimension_semantics<parallel>], iteration_bounds = array<i64: 1, 1>, scalar_prefetch = 0 : i64, scratch_operands = 0 : i64, tpu.core_type = #tpu.core_type<tc>, window_params = [{transform_indices = @transform_0, window_bounds = array<i64: 48, 64>}, {transform_indices = @transform_1, window_bounds = array<i64: 64, 32>}, {transform_indices = @transform_2, window_bounds = array<i64: 1, 32>}, {transform_indices = @transform_3, window_bounds = array<i64: 48, 32>}, {transform_indices = @transform_4, window_bounds = array<i64: 48, 32>}]} {
    %c0 = arith.constant 0 : index
    %c0_0 = arith.constant 0 : index
    %0 = vector.load %arg2[%c0, %c0_0] : memref<48x64xbf16, #tpu.memory_space<vmem>>, vector<48x64xbf16>
    %c0_1 = arith.constant 0 : index
    %c0_2 = arith.constant 0 : index
    %1 = vector.load %arg3[%c0_1, %c0_2] : memref<64x32xbf16, #tpu.memory_space<vmem>>, vector<64x32xbf16>
    %cst = arith.constant dense<0.000000e+00> : vector<48x32xf32>
    %2 = tpu.matmul %0, %1, %cst {dimension_numbers = #tpu.dot_dimension_numbers<[1], [0], [0], [1], [0, 0, 1, 1], [], []>} : vector<48x64xbf16>, vector<64x32xbf16>, vector<48x32xf32> -> vector<48x32xf32>
    %c0_3 = arith.constant 0 : index
    %c0_4 = arith.constant 0 : index
    %3 = vector.load %arg4[%c0_3, %c0_4] : memref<1x32xf32, #tpu.memory_space<vmem>>, vector<1x32xf32>
    %4 = vector.broadcast %3 : vector<1x32xf32> to vector<48x32xf32>
    %5 = arith.addf %2, %4 : vector<48x32xf32>
    %c0_5 = arith.constant 0 : index
    %c0_6 = arith.constant 0 : index
    %6 = vector.load %arg5[%c0_5, %c0_6] : memref<48x32xf32, #tpu.memory_space<vmem>>, vector<48x32xf32>
    %7 = arith.addf %5, %6 : vector<48x32xf32>
    %c0_7 = arith.constant 0 : index
    %c0_8 = arith.constant 0 : index
    %8 = vector.load %arg6[%c0_7, %c0_8] : memref<48x32xf32, #tpu.memory_space<vmem>>, vector<48x32xf32>
    tpu.vector_store %arg6[%c0_7, %c0_8], %7 {strides = array<i32>} : memref<48x32xf32, #tpu.memory_space<vmem>>, vector<48x32xf32>,
    return
  }
  func.func @transform_0(%arg0: i32, %arg1: i32) -> (i32, i32) {
    %c0_i32 = arith.constant 0 : i32
    %c0_i32_0 = arith.constant 0 : i32
    return %arg0, %c0_i32 : i32, i32
  }
  func.func @transform_1(%arg0: i32, %arg1: i32) -> (i32, i32) {
    %c0_i32 = arith.constant 0 : i32
    %c0_i32_0 = arith.constant 0 : i32
    return %c0_i32, %arg1 : i32, i32
  }
  func.func @transform_2(%arg0: i32, %arg1: i32) -> (i32, i32) {
    %c0_i32 = arith.constant 0 : i32
    %c0_i32_0 = arith.constant 0 : i32
    return %c0_i32, %arg1 : i32, i32
  }
  func.func @transform_3(%arg0: i32, %arg1: i32) -> (i32, i32) {
    %c0_i32 = arith.constant 0 : i32
    return %arg0, %arg1 : i32, i32
  }
  func.func @transform_4(%arg0: i32, %arg1: i32) -> (i32, i32) {
    %c0_i32 = arith.constant 0 : i32
    return %arg0, %arg1 : i32, i32
  }
}

module attributes {stable_mosaic.version = 11 : i64} {
  func.func @kernel(%arg0: i32, %arg1: i32, %arg2: memref<48x32xf32, #tpu.memory_space<vmem>>, %arg3: memref<32x64xbf16, #tpu.memory_space<vmem>>, %arg4: memref<1x64xf32, #tpu.memory_space<vmem>>, %arg5: memref<1x32xf32, #tpu.memory_space<vmem>>, %arg6: memref<1x32xf32, #tpu.memory_space<vmem>>, %arg7: memref<48x64xbf16, #tpu.memory_space<vmem>>, %arg8: memref<48x32xbf16, #tpu.memory_space<vmem>>) attributes {dimension_semantics = [#tpu.dimension_semantics<parallel>, #tpu.dimension_semantics<arbitrary>], iteration_bounds = array<i64: 1, 1>, scalar_prefetch = 0 : i64, scratch_operands = 1 : i64, tpu.core_type = #tpu.core_type<tc>, window_params = [{transform_indices = @transform_0, window_bounds = array<i64: 48, 32>}, {transform_indices = @transform_1, window_bounds = array<i64: 32, 64>}, {transform_indices = @transform_2, window_bounds = array<i64: 1, 64>}, {pipeline_mode = #tpu.pipeline_mode<synchronous>, transform_indices = @transform_3, window_bounds = array<i64: 1, 32>}, {pipeline_mode = #tpu.pipeline_mode<synchronous>, transform_indices = @transform_4, window_bounds = array<i64: 1, 32>}, {transform_indices = @transform_5, window_bounds = array<i64: 48, 64>}]} {
    %c0_i32 = arith.constant 0 : i32
    %0 = arith.cmpi eq, %arg1, %c0_i32 : i32
    %1 = arith.extui %0 : i1 to i32
    %c0_i32_0 = arith.constant 0 : i32
    %2 = arith.cmpi ne, %1, %c0_i32_0 : i32
    scf.if %2 {
      %c0_12 = arith.constant 0 : index
      %c0_13 = arith.constant 0 : index
      %24 = vector.load %arg2[%c0_12, %c0_13] : memref<48x32xf32, #tpu.memory_space<vmem>>, vector<48x32xf32>
      %c0_14 = arith.constant 0 : index
      %c0_15 = arith.constant 0 : index
      %25 = vector.load %arg5[%c0_14, %c0_15] : memref<1x32xf32, #tpu.memory_space<vmem>>, vector<1x32xf32>
      %c0_16 = arith.constant 0 : index
      %c0_17 = arith.constant 0 : index
      %26 = vector.load %arg6[%c0_16, %c0_17] : memref<1x32xf32, #tpu.memory_space<vmem>>, vector<1x32xf32>
      %cst_18 = arith.constant dense<0.000000e+00> : vector<48xf32>
      %27 = vector.multi_reduction <add>, %24, %cst_18 [1] : vector<48x32xf32> to vector<48xf32>
      %28 = vector.shape_cast %27 : vector<48xf32> to vector<48x1xf32>
      %cst_19 = arith.constant 3.200000e+01 : f32
      %29 = vector.broadcast %cst_19 : f32 to vector<48x1xf32>
      %30 = arith.divf %28, %29 : vector<48x1xf32>
      %31 = vector.broadcast %30 : vector<48x1xf32> to vector<48x32xf32>
      %32 = arith.subf %24, %31 : vector<48x32xf32>
      %33 = arith.mulf %32, %32 : vector<48x32xf32>
      %cst_20 = arith.constant dense<0.000000e+00> : vector<48xf32>
      %34 = vector.multi_reduction <add>, %33, %cst_20 [1] : vector<48x32xf32> to vector<48xf32>
      %35 = vector.shape_cast %34 : vector<48xf32> to vector<48x1xf32>
      %cst_21 = arith.constant 3.200000e+01 : f32
      %36 = vector.broadcast %cst_21 : f32 to vector<48x1xf32>
      %37 = arith.divf %35, %36 : vector<48x1xf32>
      %cst_22 = arith.constant 9.99999974E-6 : f32
      %38 = vector.broadcast %cst_22 : f32 to vector<48x1xf32>
      %39 = arith.addf %37, %38 : vector<48x1xf32>
      %40 = math.rsqrt %39 : vector<48x1xf32>
      %41 = vector.broadcast %40 : vector<48x1xf32> to vector<48x32xf32>
      %42 = arith.mulf %32, %41 : vector<48x32xf32>
      %43 = vector.broadcast %25 : vector<1x32xf32> to vector<48x32xf32>
      %44 = arith.mulf %42, %43 : vector<48x32xf32>
      %45 = vector.broadcast %26 : vector<1x32xf32> to vector<48x32xf32>
      %46 = arith.addf %44, %45 : vector<48x32xf32>
      %47 = arith.truncf %46 : vector<48x32xf32> to vector<48x32xbf16>
      %c0_23 = arith.constant 0 : index
      %c0_24 = arith.constant 0 : index
      %48 = vector.load %arg8[%c0_23, %c0_24] : memref<48x32xbf16, #tpu.memory_space<vmem>>, vector<48x32xbf16>
      tpu.vector_store %arg8[%c0_23, %c0_24], %47 {strides = array<i32>} : memref<48x32xbf16, #tpu.memory_space<vmem>>, vector<48x32xbf16>,
    } else {
    }
    %c0 = arith.constant 0 : index
    %c0_1 = arith.constant 0 : index
    %3 = vector.load %arg8[%c0, %c0_1] : memref<48x32xbf16, #tpu.memory_space<vmem>>, vector<48x32xbf16>
    %c0_2 = arith.constant 0 : index
    %c0_3 = arith.constant 0 : index
    %4 = vector.load %arg3[%c0_2, %c0_3] : memref<32x64xbf16, #tpu.memory_space<vmem>>, vector<32x64xbf16>
    %cst = arith.constant dense<0.000000e+00> : vector<48x64xf32>
    %5 = tpu.matmul %3, %4, %cst {dimension_numbers = #tpu.dot_dimension_numbers<[1], [0], [0], [1], [0, 0, 1, 1], [], []>} : vector<48x32xbf16>, vector<32x64xbf16>, vector<48x64xf32> -> vector<48x64xf32>
    %c0_4 = arith.constant 0 : index
    %c0_5 = arith.constant 0 : index
    %6 = vector.load %arg4[%c0_4, %c0_5] : memref<1x64xf32, #tpu.memory_space<vmem>>, vector<1x64xf32>
    %7 = vector.broadcast %6 : vector<1x64xf32> to vector<48x64xf32>
    %8 = arith.addf %5, %7 : vector<48x64xf32>
    %cst_6 = arith.constant 5.000000e-01 : f32
    %9 = vector.broadcast %cst_6 : f32 to vector<48x64xf32>
    %10 = arith.mulf %9, %8 : vector<48x64xf32>
    %cst_7 = arith.constant 4.471500e-02 : f32
    %11 = vector.broadcast %cst_7 : f32 to vector<48x64xf32>
    %12 = arith.mulf %11, %8 : vector<48x64xf32>
    %13 = arith.mulf %12, %8 : vector<48x64xf32>
    %14 = arith.mulf %13, %8 : vector<48x64xf32>
    %15 = arith.addf %8, %14 : vector<48x64xf32>
    %cst_8 = arith.constant 0.797884583 : f32
    %16 = vector.broadcast %cst_8 : f32 to vector<48x64xf32>
    %17 = arith.mulf %16, %15 : vector<48x64xf32>
    %18 = math.tanh %17 : vector<48x64xf32>
    %cst_9 = arith.constant 1.000000e+00 : f32
    %19 = vector.broadcast %cst_9 : f32 to vector<48x64xf32>
    %20 = arith.addf %19, %18 : vector<48x64xf32>
    %21 = arith.mulf %10, %20 : vector<48x64xf32>
    %22 = arith.truncf %21 : vector<48x64xf32> to vector<48x64xbf16>
    %c0_10 = arith.constant 0 : index
    %c0_11 = arith.constant 0 : index
    %23 = vector.load %arg7[%c0_10, %c0_11] : memref<48x64xbf16, #tpu.memory_space<vmem>>, vector<48x64xbf16>
    tpu.vector_store %arg7[%c0_10, %c0_11], %22 {strides = array<i32>} : memref<48x64xbf16, #tpu.memory_space<vmem>>, vector<48x64xbf16>,
    return
  }
  func.func @transform_0(%arg0: i32, %arg1: i32) -> (i32, i32) {
    %c0_i32 = arith.constant 0 : i32
    %c0_i32_0 = arith.constant 0 : i32
    return %arg0, %c0_i32 : i32, i32
  }
  func.func @transform_1(%arg0: i32, %arg1: i32) -> (i32, i32) {
    %c0_i32 = arith.constant 0 : i32
    %c0_i32_0 = arith.constant 0 : i32
    return %c0_i32, %arg1 : i32, i32
  }
  func.func @transform_2(%arg0: i32, %arg1: i32) -> (i32, i32) {
    %c0_i32 = arith.constant 0 : i32
    %c0_i32_0 = arith.constant 0 : i32
    return %c0_i32, %arg1 : i32, i32
  }
  func.func @transform_3(%arg0: i32, %arg1: i32) -> (i32, i32) {
    %c0_i32 = arith.constant 0 : i32
    %c0_i32_0 = arith.constant 0 : i32
    %c0_i32_1 = arith.constant 0 : i32
    return %c0_i32, %c0_i32_0 : i32, i32
  }
  func.func @transform_4(%arg0: i32, %arg1: i32) -> (i32, i32) {
    %c0_i32 = arith.constant 0 : i32
    %c0_i32_0 = arith.constant 0 : i32
    %c0_i32_1 = arith.constant 0 : i32
    return %c0_i32, %c0_i32_0 : i32, i32
  }
  func.func @transform_5(%arg0: i32, %arg1: i32) -> (i32, i32) {
    %c0_i32 = arith.constant 0 : i32
    return %arg0, %arg1 : i32, i32
  }
}

module attributes {stable_mosaic.version = 11 : i64} {
  func.func @_layernorm_kernel(%arg0: i32, %arg1: memref<48x32xf32, #tpu.memory_space<vmem>>, %arg2: memref<1x32xf32, #tpu.memory_space<vmem>>, %arg3: memref<1x32xf32, #tpu.memory_space<vmem>>, %arg4: memref<48x32xf32, #tpu.memory_space<vmem>>) attributes {dimension_semantics = [#tpu.dimension_semantics<parallel>], iteration_bounds = array<i64: 1>, scalar_prefetch = 0 : i64, scratch_operands = 0 : i64, tpu.core_type = #tpu.core_type<tc>, window_params = [{transform_indices = @transform_0, window_bounds = array<i64: 48, 32>}, {pipeline_mode = #tpu.pipeline_mode<synchronous>, transform_indices = @transform_1, window_bounds = array<i64: 1, 32>}, {pipeline_mode = #tpu.pipeline_mode<synchronous>, transform_indices = @transform_2, window_bounds = array<i64: 1, 32>}, {transform_indices = @transform_3, window_bounds = array<i64: 48, 32>}]} {
    %c0 = arith.constant 0 : index
    %c0_0 = arith.constant 0 : index
    %0 = vector.load %arg1[%c0, %c0_0] : memref<48x32xf32, #tpu.memory_space<vmem>>, vector<48x32xf32>
    %c0_1 = arith.constant 0 : index
    %c0_2 = arith.constant 0 : index
    %1 = vector.load %arg2[%c0_1, %c0_2] : memref<1x32xf32, #tpu.memory_space<vmem>>, vector<1x32xf32>
    %c0_3 = arith.constant 0 : index
    %c0_4 = arith.constant 0 : index
    %2 = vector.load %arg3[%c0_3, %c0_4] : memref<1x32xf32, #tpu.memory_space<vmem>>, vector<1x32xf32>
    %cst = arith.constant dense<0.000000e+00> : vector<48xf32>
    %3 = vector.multi_reduction <add>, %0, %cst [1] : vector<48x32xf32> to vector<48xf32>
    %4 = vector.shape_cast %3 : vector<48xf32> to vector<48x1xf32>
    %cst_5 = arith.constant 3.200000e+01 : f32
    %5 = vector.broadcast %cst_5 : f32 to vector<48x1xf32>
    %6 = arith.divf %4, %5 : vector<48x1xf32>
    %7 = vector.broadcast %6 : vector<48x1xf32> to vector<48x32xf32>
    %8 = arith.subf %0, %7 : vector<48x32xf32>
    %9 = arith.mulf %8, %8 : vector<48x32xf32>
    %cst_6 = arith.constant dense<0.000000e+00> : vector<48xf32>
    %10 = vector.multi_reduction <add>, %9, %cst_6 [1] : vector<48x32xf32> to vector<48xf32>
    %11 = vector.shape_cast %10 : vector<48xf32> to vector<48x1xf32>
    %cst_7 = arith.constant 3.200000e+01 : f32
    %12 = vector.broadcast %cst_7 : f32 to vector<48x1xf32>
    %13 = arith.divf %11, %12 : vector<48x1xf32>
    %cst_8 = arith.constant 9.99999974E-6 : f32
    %14 = vector.broadcast %cst_8 : f32 to vector<48x1xf32>
    %15 = arith.addf %13, %14 : vector<48x1xf32>
    %16 = math.rsqrt %15 : vector<48x1xf32>
    %17 = vector.broadcast %16 : vector<48x1xf32> to vector<48x32xf32>
    %18 = arith.mulf %8, %17 : vector<48x32xf32>
    %19 = vector.broadcast %1 : vector<1x32xf32> to vector<48x32xf32>
    %20 = arith.mulf %18, %19 : vector<48x32xf32>
    %21 = vector.broadcast %2 : vector<1x32xf32> to vector<48x32xf32>
    %22 = arith.addf %20, %21 : vector<48x32xf32>
    %c0_9 = arith.constant 0 : index
    %c0_10 = arith.constant 0 : index
    %23 = vector.load %arg4[%c0_9, %c0_10] : memref<48x32xf32, #tpu.memory_space<vmem>>, vector<48x32xf32>
    tpu.vector_store %arg4[%c0_9, %c0_10], %22 {strides = array<i32>} : memref<48x32xf32, #tpu.memory_space<vmem>>, vector<48x32xf32>,
    return
  }
  func.func @transform_0(%arg0: i32) -> (i32, i32) {
    %c0_i32 = arith.constant 0 : i32
    %c0_i32_0 = arith.constant 0 : i32
    return %arg0, %c0_i32 : i32, i32
  }
  func.func @transform_1(%arg0: i32) -> (i32, i32) {
    %c0_i32 = arith.constant 0 : i32
    %c0_i32_0 = arith.constant 0 : i32
    %c0_i32_1 = arith.constant 0 : i32
    return %c0_i32, %c0_i32_0 : i32, i32
  }
  func.func @transform_2(%arg0: i32) -> (i32, i32) {
    %c0_i32 = arith.constant 0 : i32
    %c0_i32_0 = arith.constant 0 : i32
    %c0_i32_1 = arith.constant 0 : i32
    return %c0_i32, %c0_i32_0 : i32, i32
  }
  func.func @transform_3(%arg0: i32) -> (i32, i32) {
    %c0_i32 = arith.constant 0 : i32
    %c0_i32_0 = arith.constant 0 : i32
    return %arg0, %c0_i32 : i32, i32
  }
}

</mosaic_0001>

<bundles_post_ra>
// kernel: squeeze.2
= control target key start
LH: loop header
LB: loop body
LE: loop exit
PB: predicated region body
PF: predicated region fallthrough
CT: control target
= control target key end

     0   :  { %vm3_vm0 = vcmask 31744   ;;  %s1305_s12 = smov 124   ;;  %s1828_s0 = inlined_call_operand.vmem [shape: f32[2,1,8,8,8], index: 0, kind: input, shape index: {}]   ;;  %s1829_s1 = inlined_call_operand.vmem [shape: f32[2,2,4,2,4,2,4], index: 1, kind: output, shape index: {}]  }
   0x1   :  { %v1163_v0 = vld [vmem:[%s1828_s0 + $0x10] sm:$0xff]   ;;  %v111_v1 = vld [vmem:[%s1828_s0] sm:$0xff]   ;;  %v1164_v2 = vld [vmem:[%s1828_s0 + $0x18] sm:$0xff]  }
   0x2   :  { %130 = vrot.lane.b32.xlu1 %v1163_v0, %s1305_s12  ;;  %112 = vrot.lane.b32.xlu0 %v111_v1, %s1305_s12  ;;  %v1162_v3 = vld [vmem:[%s1828_s0 + $0x8] sm:$0xff]   ;;  %17 = vst.msk [vmem:[#allocation0 + $0x80] ss:$8 sm:$0xf] %vm3_vm0, %v1163_v0   ;;  %v1165_v5 = vld [vmem:[%s1828_s0 + $0x20] sm:$0xff]  }
   0x3   :  { %v1166_v4 = vld [vmem:[%s1828_s0 + $0x28] sm:$0xff]   ;;  %19 = vst.msk [vmem:[#allocation0 + $0x80] ss:$8 sm:$0xf0] %vm3_vm0, %v1163_v0   ;;  %v1168_v6 = vld [vmem:[%s1828_s0 + $0x38] sm:$0xff]   ;;  %v1167_v7 = vld [vmem:[%s1828_s0 + $0x30] sm:$0xff]  }
   0x4   :  { %4 = vst.msk [vmem:[#allocation0] ss:$8 sm:$0xf] %vm3_vm0, %v111_v1   ;;  %5 = vst.msk [vmem:[#allocation0] ss:$8 sm:$0xf0] %vm3_vm0, %v111_v1  }
   0x5   :  { %24 = vst.msk [vmem:[#allocation0 + $0xc0] ss:$8 sm:$0xf] %vm3_vm0, %v1164_v2   ;;  %26 = vst.msk [vmem:[#allocation0 + $0xc0] ss:$8 sm:$0xf0] %vm3_vm0, %v1164_v2  }
   0x6   :  { %10 = vst.msk [vmem:[#allocation0 + $0x40] ss:$8 sm:$0xf] %vm3_vm0, %v1162_v3   ;;  %12 = vst.msk [vmem:[#allocation0 + $0x40] ss:$8 sm:$0xf0] %vm3_vm0, %v1162_v3   ;;  %139 = vrot.lane.b32.xlu1 %v1164_v2, %s1305_s12  ;;  %121 = vrot.lane.b32.xlu0 %v1162_v3, %s1305_s12 }
   0x7   :  { %38 = vst.msk [vmem:[#allocation0 + $0x140] ss:$8 sm:$0xf] %vm3_vm0, %v1166_v4   ;;  %40 = vst.msk [vmem:[#allocation0 + $0x140] ss:$8 sm:$0xf0] %vm3_vm0, %v1166_v4  }
   0x8   :  { %v1170_v8 = vld [vmem:[%s1828_s0 + $0x48] sm:$0xff]   ;;  %v1169_v9 = vld [vmem:[%s1828_s0 + $0x40] sm:$0xff]   ;;  %v1172_v10 = vld [vmem:[%s1828_s0 + $0x58] sm:$0xff]   ;;  %31 = vst.msk [vmem:[#allocation0 + $0x100] ss:$8 sm:$0xf] %vm3_vm0, %v1165_v5  }
   0x9   :  { %33 = vst.msk [vmem:[#allocation0 + $0x100] ss:$8 sm:$0xf0] %vm3_vm0, %v1165_v5   ;;  %52 = vst.msk [vmem:[#allocation0 + $0x1c0] ss:$8 sm:$0xf] %vm3_vm0, %v1168_v6  }
   0xa   :  { %54 = vst.msk [vmem:[#allocation0 + $0x1c0] ss:$8 sm:$0xf0] %vm3_vm0, %v1168_v6   ;;  %45 = vst.msk [vmem:[#allocation0 + $0x180] ss:$8 sm:$0xf] %vm3_vm0, %v1167_v7   ;;  %157 = vrot.lane.b32.xlu1 %v1166_v4, %s1305_s12  ;;  %148 = vrot.lane.b32.xlu0 %v1165_v5, %s1305_s12 }
   0xb   :  { %47 = vst.msk [vmem:[#allocation0 + $0x180] ss:$8 sm:$0xf0] %vm3_vm0, %v1167_v7   ;;  %v1171_v11 = vld [vmem:[%s1828_s0 + $0x50] sm:$0xff]   ;;  %v1174_v12 = vld [vmem:[%s1828_s0 + $0x68] sm:$0xff]   ;;  %v1173_v13 = vld [vmem:[%s1828_s0 + $0x60] sm:$0xff]  }
   0xc   :  { %66 = vst.msk [vmem:[#allocation0 + $0x240] ss:$8 sm:$0xf] %vm3_vm0, %v1170_v8   ;;  %68 = vst.msk [vmem:[#allocation0 + $0x240] ss:$8 sm:$0xf0] %vm3_vm0, %v1170_v8  }
   0xd   :  { %59 = vst.msk [vmem:[#allocation0 + $0x200] ss:$8 sm:$0xf] %vm3_vm0, %v1169_v9   ;;  %61 = vst.msk [vmem:[#allocation0 + $0x200] ss:$8 sm:$0xf0] %vm3_vm0, %v1169_v9  }
   0xe   :  { %80 = vst.msk [vmem:[#allocation0 + $0x2c0] ss:$8 sm:$0xf] %vm3_vm0, %v1172_v10   ;;  %82 = vst.msk [vmem:[#allocation0 + $0x2c0] ss:$8 sm:$0xf0] %vm3_vm0, %v1172_v10   ;;  %175 = vrot.lane.b32.xlu1 %v1168_v6, %s1305_s12  ;;  %166 = vrot.lane.b32.xlu0 %v1167_v7, %s1305_s12 }
   0xf   :  { %v1176_v14 = vld [vmem:[%s1828_s0 + $0x78] sm:$0xff]   ;;  %v1175_v15 = vld [vmem:[%s1828_s0 + $0x70] sm:$0xff]   ;;  %73 = vst.msk [vmem:[#allocation0 + $0x280] ss:$8 sm:$0xf] %vm3_vm0, %v1171_v11  }
  0x10   :  { %75 = vst.msk [vmem:[#allocation0 + $0x280] ss:$8 sm:$0xf0] %vm3_vm0, %v1171_v11   ;;  %94 = vst.msk [vmem:[#allocation0 + $0x340] ss:$8 sm:$0xf] %vm3_vm0, %v1174_v12  }
  0x11   :  { %96 = vst.msk [vmem:[#allocation0 + $0x340] ss:$8 sm:$0xf0] %vm3_vm0, %v1174_v12   ;;  %87 = vst.msk [vmem:[#allocation0 + $0x300] ss:$8 sm:$0xf] %vm3_vm0, %v1173_v13  }
  0x12   :  { %89 = vst.msk [vmem:[#allocation0 + $0x300] ss:$8 sm:$0xf0] %vm3_vm0, %v1173_v13   ;;  %108 = vst.msk [vmem:[#allocation0 + $0x3c0] ss:$8 sm:$0xf] %vm3_vm0, %v1176_v14   ;;  %193 = vrot.lane.b32.xlu1 %v1170_v8, %s1305_s12  ;;  %184 = vrot.lane.b32.xlu0 %v1169_v9, %s1305_s12 }
  0x13   :  { %110 = vst.msk [vmem:[#allocation0 + $0x3c0] ss:$8 sm:$0xf0] %vm3_vm0, %v1176_v14   ;;  %101 = vst.msk [vmem:[#allocation0 + $0x380] ss:$8 sm:$0xf] %vm3_vm0, %v1175_v15  }
  0x14   :  { %103 = vst.msk [vmem:[#allocation0 + $0x380] ss:$8 sm:$0xf0] %vm3_vm0, %v1175_v15  }
  0x16   :  { %211 = vrot.lane.b32.xlu1 %v1172_v10, %s1305_s12  ;;  %202 = vrot.lane.b32.xlu0 %v1171_v11, %s1305_s12 }
  0x1a   :  { %229 = vrot.lane.b32.xlu1 %v1174_v12, %s1305_s12  ;;  %220 = vrot.lane.b32.xlu0 %v1173_v13, %s1305_s12 }
  0x1e   :  { %247 = vrot.lane.b32.xlu1 %v1176_v14, %s1305_s12  ;;  %238 = vrot.lane.b32.xlu0 %v1175_v15, %s1305_s12 }
  0x74   :  { %v131_v16 = vpop.permute.xlu1 %130   ;;  %v113_v17 = vpop.permute.xlu0 %112  }
  0x75   :  { %134 = vst.msk [vmem:[#allocation0 + $0x81] ss:$8 sm:$0xf] %vm3_vm0, %v131_v16   ;;  %136 = vst.msk [vmem:[#allocation0 + $0x81] ss:$8 sm:$0xf0] %vm3_vm0, %v131_v16  }
  0x76   :  { %116 = vst.msk [vmem:[#allocation0 + $0x1] ss:$8 sm:$0xf] %vm3_vm0, %v113_v17   ;;  %118 = vst.msk [vmem:[#allocation0 + $0x1] ss:$8 sm:$0xf0] %vm3_vm0, %v113_v17  }
  0x78   :  { %v140_v18 = vpop.permute.xlu1 %139   ;;  %v122_v19 = vpop.permute.xlu0 %121  }
  0x79   :  { %143 = vst.msk [vmem:[#allocation0 + $0xc1] ss:$8 sm:$0xf] %vm3_vm0, %v140_v18   ;;  %145 = vst.msk [vmem:[#allocation0 + $0xc1] ss:$8 sm:$0xf0] %vm3_vm0, %v140_v18  }
  0x7a   :  { %125 = vst.msk [vmem:[#allocation0 + $0x41] ss:$8 sm:$0xf] %vm3_vm0, %v122_v19   ;;  %127 = vst.msk [vmem:[#allocation0 + $0x41] ss:$8 sm:$0xf0] %vm3_vm0, %v122_v19  }
  0x7c   :  { %v350_v20 = vld [vmem:[#allocation0 + $0x80] sm:$0x3]  ;;  %v356_v21 = vld [vmem:[#allocation0 + $0x88] sm:$0x3]  ;;  %v362_v22 = vld [vmem:[#allocation0 + $0x90] sm:$0x3]  ;;  %v158_v23 = vpop.permute.xlu1 %157   ;;  %v149_v24 = vpop.permute.xlu0 %148  }
  0x7d   :  { %1192 = vst [vmem:[%s1829_s1 + $0x20] sm:$0x3] %v350_v20  ;;  %1193 = vst [vmem:[%s1829_s1 + $0x22] sm:$0x3] %v356_v21  ;;  %v368_v25 = vld [vmem:[#allocation0 + $0x98] sm:$0x3] }
  0x7e   :  { %1194 = vst [vmem:[%s1829_s1 + $0x24] sm:$0x3] %v362_v22  ;;  %v374_v26 = vld [vmem:[#allocation0 + $0xa0] sm:$0x3]  ;;  %v380_v27 = vld [vmem:[#allocation0 + $0xa8] sm:$0x3] }
  0x7f   :  { %161 = vst.msk [vmem:[#allocation0 + $0x141] ss:$8 sm:$0xf] %vm3_vm0, %v158_v23   ;;  %163 = vst.msk [vmem:[#allocation0 + $0x141] ss:$8 sm:$0xf0] %vm3_vm0, %v158_v23  }
  0x80   :  { %152 = vst.msk [vmem:[#allocation0 + $0x101] ss:$8 sm:$0xf] %vm3_vm0, %v149_v24   ;;  %154 = vst.msk [vmem:[#allocation0 + $0x101] ss:$8 sm:$0xf0] %vm3_vm0, %v149_v24   ;;  %v176_v37 = vpop.permute.xlu1 %175   ;;  %v167_v38 = vpop.permute.xlu0 %166  }
  0x81   :  { %1195 = vst [vmem:[%s1829_s1 + $0x26] sm:$0x3] %v368_v25  ;;  %1196 = vst [vmem:[%s1829_s1 + $0x28] sm:$0x3] %v374_v26  ;;  %v386_v28 = vld [vmem:[#allocation0 + $0xb0] sm:$0x3] }
  0x82   :  { %1197 = vst [vmem:[%s1829_s1 + $0x2a] sm:$0x3] %v380_v27  ;;  %v392_v29 = vld [vmem:[#allocation0 + $0xb8] sm:$0x3]  ;;  %v257_v30 = vld [vmem:[#allocation0] sm:$0x3] }
  0x83   :  { %1198 = vst [vmem:[%s1829_s1 + $0x2c] sm:$0x3] %v386_v28  ;;  %1199 = vst [vmem:[%s1829_s1 + $0x2e] sm:$0x3] %v392_v29  ;;  %v261_v31 = vld [vmem:[#allocation0 + $0x8] sm:$0x3] }
  0x84   :  { %259 = vst [vmem:[%s1829_s1] sm:$0x3] %v257_v30  ;;  %v266_v32 = vld [vmem:[#allocation0 + $0x10] sm:$0x3]  ;;  %v272_v33 = vld [vmem:[#allocation0 + $0x18] sm:$0x3]  ;;  %v194_v51 = vpop.permute.xlu1 %193   ;;  %v185_v52 = vpop.permute.xlu0 %184  }
  0x85   :  { %1177 = vst [vmem:[%s1829_s1 + $0x2] sm:$0x3] %v261_v31  ;;  %1178 = vst [vmem:[%s1829_s1 + $0x4] sm:$0x3] %v266_v32  ;;  %v278_v34 = vld [vmem:[#allocation0 + $0x20] sm:$0x3] }
  0x86   :  { %1179 = vst [vmem:[%s1829_s1 + $0x6] sm:$0x3] %v272_v33  ;;  %v284_v35 = vld [vmem:[#allocation0 + $0x28] sm:$0x3]  ;;  %v290_v36 = vld [vmem:[#allocation0 + $0x30] sm:$0x3] }
  0x87   :  { %1180 = vst [vmem:[%s1829_s1 + $0x8] sm:$0x3] %v278_v34  ;;  %1181 = vst [vmem:[%s1829_s1 + $0xa] sm:$0x3] %v284_v35  ;;  %v296_v39 = vld [vmem:[#allocation0 + $0x38] sm:$0x3] }
  0x88   :  { %1182 = vst [vmem:[%s1829_s1 + $0xc] sm:$0x3] %v290_v36  ;;  %v398_v40 = vld [vmem:[#allocation0 + $0xc0] sm:$0x3]  ;;  %v404_v41 = vld [vmem:[#allocation0 + $0xc8] sm:$0x3]  ;;  %v212_v1 = vpop.permute.xlu1 %211   ;;  %v203_v2 = vpop.permute.xlu0 %202  }
  0x89   :  { %179 = vst.msk [vmem:[#allocation0 + $0x1c1] ss:$8 sm:$0xf] %vm3_vm0, %v176_v37   ;;  %181 = vst.msk [vmem:[#allocation0 + $0x1c1] ss:$8 sm:$0xf0] %vm3_vm0, %v176_v37  }
  0x8a   :  { %170 = vst.msk [vmem:[#allocation0 + $0x181] ss:$8 sm:$0xf] %vm3_vm0, %v167_v38   ;;  %172 = vst.msk [vmem:[#allocation0 + $0x181] ss:$8 sm:$0xf0] %vm3_vm0, %v167_v38  }
  0x8b   :  { %1183 = vst [vmem:[%s1829_s1 + $0xe] sm:$0x3] %v296_v39  ;;  %1200 = vst [vmem:[%s1829_s1 + $0x30] sm:$0x3] %v398_v40  ;;  %v410_v42 = vld [vmem:[#allocation0 + $0xd0] sm:$0x3] }
  0x8c   :  { %1201 = vst [vmem:[%s1829_s1 + $0x32] sm:$0x3] %v404_v41  ;;  %v416_v43 = vld [vmem:[#allocation0 + $0xd8] sm:$0x3]  ;;  %v422_v44 = vld [vmem:[#allocation0 + $0xe0] sm:$0x3]  ;;  %v230_v15 = vpop.permute.xlu1 %229   ;;  %v221_v16 = vpop.permute.xlu0 %220  }
  0x8d   :  { %1202 = vst [vmem:[%s1829_s1 + $0x34] sm:$0x3] %v410_v42  ;;  %1203 = vst [vmem:[%s1829_s1 + $0x36] sm:$0x3] %v416_v43  ;;  %v428_v45 = vld [vmem:[#allocation0 + $0xe8] sm:$0x3] }
  0x8e   :  { %1204 = vst [vmem:[%s1829_s1 + $0x38] sm:$0x3] %v422_v44  ;;  %v434_v46 = vld [vmem:[#allocation0 + $0xf0] sm:$0x3]  ;;  %v440_v47 = vld [vmem:[#allocation0 + $0xf8] sm:$0x3] }
  0x8f   :  { %1205 = vst [vmem:[%s1829_s1 + $0x3a] sm:$0x3] %v428_v45  ;;  %1206 = vst [vmem:[%s1829_s1 + $0x3c] sm:$0x3] %v434_v46  ;;  %v302_v48 = vld [vmem:[#allocation0 + $0x40] sm:$0x3] }
  0x90   :  { %1207 = vst [vmem:[%s1829_s1 + $0x3e] sm:$0x3] %v440_v47  ;;  %v308_v49 = vld [vmem:[#allocation0 + $0x48] sm:$0x3]  ;;  %v314_v50 = vld [vmem:[#allocation0 + $0x50] sm:$0x3]  ;;  %v248_v29 = vpop.permute.xlu1 %247   ;;  %v239_v30 = vpop.permute.xlu0 %238  }
  0x91   :  { %1184 = vst [vmem:[%s1829_s1 + $0x10] sm:$0x3] %v302_v48  ;;  %1185 = vst [vmem:[%s1829_s1 + $0x12] sm:$0x3] %v308_v49  ;;  %v320_v53 = vld [vmem:[#allocation0 + $0x58] sm:$0x3] }
  0x92   :  { %1186 = vst [vmem:[%s1829_s1 + $0x14] sm:$0x3] %v314_v50  ;;  %v326_v54 = vld [vmem:[#allocation0 + $0x60] sm:$0x3]  ;;  %v332_v55 = vld [vmem:[#allocation0 + $0x68] sm:$0x3] }
  0x93   :  { %197 = vst.msk [vmem:[#allocation0 + $0x241] ss:$8 sm:$0xf] %vm3_vm0, %v194_v51   ;;  %199 = vst.msk [vmem:[#allocation0 + $0x241] ss:$8 sm:$0xf0] %vm3_vm0, %v194_v51  }
  0x94   :  { %188 = vst.msk [vmem:[#allocation0 + $0x201] ss:$8 sm:$0xf] %vm3_vm0, %v185_v52   ;;  %190 = vst.msk [vmem:[#allocation0 + $0x201] ss:$8 sm:$0xf0] %vm3_vm0, %v185_v52  }
  0x95   :  { %1187 = vst [vmem:[%s1829_s1 + $0x16] sm:$0x3] %v320_v53  ;;  %1188 = vst [vmem:[%s1829_s1 + $0x18] sm:$0x3] %v326_v54  ;;  %v338_v56 = vld [vmem:[#allocation0 + $0x70] sm:$0x3] }
  0x96   :  { %1189 = vst [vmem:[%s1829_s1 + $0x1a] sm:$0x3] %v332_v55  ;;  %v344_v57 = vld [vmem:[#allocation0 + $0x78] sm:$0x3]  ;;  %v494_v58 = vld [vmem:[#allocation0 + $0x140] sm:$0x3] }
  0x97   :  { %1190 = vst [vmem:[%s1829_s1 + $0x1c] sm:$0x3] %v338_v56  ;;  %1191 = vst [vmem:[%s1829_s1 + $0x1e] sm:$0x3] %v344_v57  ;;  %v500_v59 = vld [vmem:[#allocation0 + $0x148] sm:$0x3] }
  0x98   :  { %1216 = vst [vmem:[%s1829_s1 + $0x50] sm:$0x3] %v494_v58  ;;  %v506_v60 = vld [vmem:[#allocation0 + $0x150] sm:$0x3]  ;;  %v512_v61 = vld [vmem:[#allocation0 + $0x158] sm:$0x3] }
  0x99   :  { %1217 = vst [vmem:[%s1829_s1 + $0x52] sm:$0x3] %v500_v59  ;;  %1218 = vst [vmem:[%s1829_s1 + $0x54] sm:$0x3] %v506_v60  ;;  %v518_v62 = vld [vmem:[#allocation0 + $0x160] sm:$0x3] }
  0x9a   :  { %1219 = vst [vmem:[%s1829_s1 + $0x56] sm:$0x3] %v512_v61  ;;  %v524_v63 = vld [vmem:[#allocation0 + $0x168] sm:$0x3]  ;;  %v530_v0 = vld [vmem:[#allocation0 + $0x170] sm:$0x3] }
  0x9b   :  { %1220 = vst [vmem:[%s1829_s1 + $0x58] sm:$0x3] %v518_v62  ;;  %1221 = vst [vmem:[%s1829_s1 + $0x5a] sm:$0x3] %v524_v63  ;;  %v536_v3 = vld [vmem:[#allocation0 + $0x178] sm:$0x3] }
  0x9c   :  { %1222 = vst [vmem:[%s1829_s1 + $0x5c] sm:$0x3] %v530_v0  ;;  %v446_v4 = vld [vmem:[#allocation0 + $0x100] sm:$0x3]  ;;  %v452_v5 = vld [vmem:[#allocation0 + $0x108] sm:$0x3] }
  0x9d   :  { %215 = vst.msk [vmem:[#allocation0 + $0x2c1] ss:$8 sm:$0xf] %vm3_vm0, %v212_v1   ;;  %217 = vst.msk [vmem:[#allocation0 + $0x2c1] ss:$8 sm:$0xf0] %vm3_vm0, %v212_v1  }
  0x9e   :  { %206 = vst.msk [vmem:[#allocation0 + $0x281] ss:$8 sm:$0xf] %vm3_vm0, %v203_v2   ;;  %208 = vst.msk [vmem:[#allocation0 + $0x281] ss:$8 sm:$0xf0] %vm3_vm0, %v203_v2  }
  0x9f   :  { %1223 = vst [vmem:[%s1829_s1 + $0x5e] sm:$0x3] %v536_v3  ;;  %1208 = vst [vmem:[%s1829_s1 + $0x40] sm:$0x3] %v446_v4  ;;  %v458_v6 = vld [vmem:[#allocation0 + $0x110] sm:$0x3] }
  0xa0   :  { %1209 = vst [vmem:[%s1829_s1 + $0x42] sm:$0x3] %v452_v5  ;;  %v464_v7 = vld [vmem:[#allocation0 + $0x118] sm:$0x3]  ;;  %v470_v8 = vld [vmem:[#allocation0 + $0x120] sm:$0x3] }
  0xa1   :  { %1210 = vst [vmem:[%s1829_s1 + $0x44] sm:$0x3] %v458_v6  ;;  %1211 = vst [vmem:[%s1829_s1 + $0x46] sm:$0x3] %v464_v7  ;;  %v476_v9 = vld [vmem:[#allocation0 + $0x128] sm:$0x3] }
  0xa2   :  { %1212 = vst [vmem:[%s1829_s1 + $0x48] sm:$0x3] %v470_v8  ;;  %v482_v10 = vld [vmem:[#allocation0 + $0x130] sm:$0x3]  ;;  %v488_v11 = vld [vmem:[#allocation0 + $0x138] sm:$0x3] }
  0xa3   :  { %1213 = vst [vmem:[%s1829_s1 + $0x4a] sm:$0x3] %v476_v9  ;;  %1214 = vst [vmem:[%s1829_s1 + $0x4c] sm:$0x3] %v482_v10  ;;  %v590_v12 = vld [vmem:[#allocation0 + $0x1c0] sm:$0x3] }
  0xa4   :  { %1215 = vst [vmem:[%s1829_s1 + $0x4e] sm:$0x3] %v488_v11  ;;  %v596_v13 = vld [vmem:[#allocation0 + $0x1c8] sm:$0x3]  ;;  %v602_v14 = vld [vmem:[#allocation0 + $0x1d0] sm:$0x3] }
  0xa5   :  { %1232 = vst [vmem:[%s1829_s1 + $0x70] sm:$0x3] %v590_v12  ;;  %1233 = vst [vmem:[%s1829_s1 + $0x72] sm:$0x3] %v596_v13  ;;  %v608_v17 = vld [vmem:[#allocation0 + $0x1d8] sm:$0x3] }
  0xa6   :  { %1234 = vst [vmem:[%s1829_s1 + $0x74] sm:$0x3] %v602_v14  ;;  %v614_v18 = vld [vmem:[#allocation0 + $0x1e0] sm:$0x3]  ;;  %v620_v19 = vld [vmem:[#allocation0 + $0x1e8] sm:$0x3] }
  0xa7   :  { %233 = vst.msk [vmem:[#allocation0 + $0x341] ss:$8 sm:$0xf] %vm3_vm0, %v230_v15   ;;  %235 = vst.msk [vmem:[#allocation0 + $0x341] ss:$8 sm:$0xf0] %vm3_vm0, %v230_v15  }
  0xa8   :  { %224 = vst.msk [vmem:[#allocation0 + $0x301] ss:$8 sm:$0xf] %vm3_vm0, %v221_v16   ;;  %226 = vst.msk [vmem:[#allocation0 + $0x301] ss:$8 sm:$0xf0] %vm3_vm0, %v221_v16  }
  0xa9   :  { %1235 = vst [vmem:[%s1829_s1 + $0x76] sm:$0x3] %v608_v17  ;;  %1236 = vst [vmem:[%s1829_s1 + $0x78] sm:$0x3] %v614_v18  ;;  %v626_v20 = vld [vmem:[#allocation0 + $0x1f0] sm:$0x3] }
  0xaa   :  { %1237 = vst [vmem:[%s1829_s1 + $0x7a] sm:$0x3] %v620_v19  ;;  %v632_v21 = vld [vmem:[#allocation0 + $0x1f8] sm:$0x3]  ;;  %v542_v22 = vld [vmem:[#allocation0 + $0x180] sm:$0x3] }
  0xab   :  { %1238 = vst [vmem:[%s1829_s1 + $0x7c] sm:$0x3] %v626_v20  ;;  %1239 = vst [vmem:[%s1829_s1 + $0x7e] sm:$0x3] %v632_v21  ;;  %v548_v23 = vld [vmem:[#allocation0 + $0x188] sm:$0x3] }
  0xac   :  { %1224 = vst [vmem:[%s1829_s1 + $0x60] sm:$0x3] %v542_v22  ;;  %v554_v24 = vld [vmem:[#allocation0 + $0x190] sm:$0x3]  ;;  %v560_v25 = vld [vmem:[#allocation0 + $0x198] sm:$0x3] }
  0xad   :  { %1225 = vst [vmem:[%s1829_s1 + $0x62] sm:$0x3] %v548_v23  ;;  %1226 = vst [vmem:[%s1829_s1 + $0x64] sm:$0x3] %v554_v24  ;;  %v566_v26 = vld [vmem:[#allocation0 + $0x1a0] sm:$0x3] }
  0xae   :  { %1227 = vst [vmem:[%s1829_s1 + $0x66] sm:$0x3] %v560_v25  ;;  %v572_v27 = vld [vmem:[#allocation0 + $0x1a8] sm:$0x3]  ;;  %v578_v28 = vld [vmem:[#allocation0 + $0x1b0] sm:$0x3] }
  0xaf   :  { %1228 = vst [vmem:[%s1829_s1 + $0x68] sm:$0x3] %v566_v26  ;;  %1229 = vst [vmem:[%s1829_s1 + $0x6a] sm:$0x3] %v572_v27  ;;  %v584_v31 = vld [vmem:[#allocation0 + $0x1b8] sm:$0x3] }
  0xb0   :  { %1230 = vst [vmem:[%s1829_s1 + $0x6c] sm:$0x3] %v578_v28  ;;  %v686_v32 = vld [vmem:[#allocation0 + $0x240] sm:$0x3]  ;;  %v692_v33 = vld [vmem:[#allocation0 + $0x248] sm:$0x3] }
  0xb1   :  { %251 = vst.msk [vmem:[#allocation0 + $0x3c1] ss:$8 sm:$0xf] %vm3_vm0, %v248_v29   ;;  %253 = vst.msk [vmem:[#allocation0 + $0x3c1] ss:$8 sm:$0xf0] %vm3_vm0, %v248_v29  }
  0xb2   :  { %242 = vst.msk [vmem:[#allocation0 + $0x381] ss:$8 sm:$0xf] %vm3_vm0, %v239_v30   ;;  %244 = vst.msk [vmem:[#allocation0 + $0x381] ss:$8 sm:$0xf0] %vm3_vm0, %v239_v30  }
  0xb3   :  { %1231 = vst [vmem:[%s1829_s1 + $0x6e] sm:$0x3] %v584_v31  ;;  %1248 = vst [vmem:[%s1829_s1 + $0x90] sm:$0x3] %v686_v32  ;;  %v698_v34 = vld [vmem:[#allocation0 + $0x250] sm:$0x3] }
  0xb4   :  { %1249 = vst [vmem:[%s1829_s1 + $0x92] sm:$0x3] %v692_v33  ;;  %v704_v35 = vld [vmem:[#allocation0 + $0x258] sm:$0x3]  ;;  %v710_v36 = vld [vmem:[#allocation0 + $0x260] sm:$0x3] }
  0xb5   :  { %1250 = vst [vmem:[%s1829_s1 + $0x94] sm:$0x3] %v698_v34  ;;  %1251 = vst [vmem:[%s1829_s1 + $0x96] sm:$0x3] %v704_v35  ;;  %v716_v37 = vld [vmem:[#allocation0 + $0x268] sm:$0x3] }
  0xb6   :  { %1252 = vst [vmem:[%s1829_s1 + $0x98] sm:$0x3] %v710_v36  ;;  %v722_v38 = vld [vmem:[#allocation0 + $0x270] sm:$0x3]  ;;  %v728_v39 = vld [vmem:[#allocation0 + $0x278] sm:$0x3] }
  0xb7   :  { %1253 = vst [vmem:[%s1829_s1 + $0x9a] sm:$0x3] %v716_v37  ;;  %1254 = vst [vmem:[%s1829_s1 + $0x9c] sm:$0x3] %v722_v38  ;;  %v638_v40 = vld [vmem:[#allocation0 + $0x200] sm:$0x3] }
  0xb8   :  { %1255 = vst [vmem:[%s1829_s1 + $0x9e] sm:$0x3] %v728_v39  ;;  %v644_v41 = vld [vmem:[#allocation0 + $0x208] sm:$0x3]  ;;  %v650_v42 = vld [vmem:[#allocation0 + $0x210] sm:$0x3] }
  0xb9   :  { %1240 = vst [vmem:[%s1829_s1 + $0x80] sm:$0x3] %v638_v40  ;;  %1241 = vst [vmem:[%s1829_s1 + $0x82] sm:$0x3] %v644_v41  ;;  %v656_v43 = vld [vmem:[#allocation0 + $0x218] sm:$0x3] }
  0xba   :  { %1242 = vst [vmem:[%s1829_s1 + $0x84] sm:$0x3] %v650_v42  ;;  %v662_v44 = vld [vmem:[#allocation0 + $0x220] sm:$0x3]  ;;  %v668_v45 = vld [vmem:[#allocation0 + $0x228] sm:$0x3] }
  0xbb   :  { %1243 = vst [vmem:[%s1829_s1 + $0x86] sm:$0x3] %v656_v43  ;;  %1244 = vst [vmem:[%s1829_s1 + $0x88] sm:$0x3] %v662_v44  ;;  %v674_v46 = vld [vmem:[#allocation0 + $0x230] sm:$0x3] }
  0xbc   :  { %1245 = vst [vmem:[%s1829_s1 + $0x8a] sm:$0x3] %v668_v45  ;;  %v680_v47 = vld [vmem:[#allocation0 + $0x238] sm:$0x3]  ;;  %v782_v48 = vld [vmem:[#allocation0 + $0x2c0] sm:$0x3] }
  0xbd   :  { %1246 = vst [vmem:[%s1829_s1 + $0x8c] sm:$0x3] %v674_v46  ;;  %1247 = vst [vmem:[%s1829_s1 + $0x8e] sm:$0x3] %v680_v47  ;;  %v788_v49 = vld [vmem:[#allocation0 + $0x2c8] sm:$0x3] }
  0xbe   :  { %1264 = vst [vmem:[%s1829_s1 + $0xb0] sm:$0x3] %v782_v48  ;;  %v794_v50 = vld [vmem:[#allocation0 + $0x2d0] sm:$0x3]  ;;  %v800_v51 = vld [vmem:[#allocation0 + $0x2d8] sm:$0x3] }
  0xbf   :  { %1265 = vst [vmem:[%s1829_s1 + $0xb2] sm:$0x3] %v788_v49  ;;  %1266 = vst [vmem:[%s1829_s1 + $0xb4] sm:$0x3] %v794_v50  ;;  %v806_v52 = vld [vmem:[#allocation0 + $0x2e0] sm:$0x3] }
  0xc0   :  { %1267 = vst [vmem:[%s1829_s1 + $0xb6] sm:$0x3] %v800_v51  ;;  %v812_v53 = vld [vmem:[#allocation0 + $0x2e8] sm:$0x3]  ;;  %v818_v54 = vld [vmem:[#allocation0 + $0x2f0] sm:$0x3] }
  0xc1   :  { %1268 = vst [vmem:[%s1829_s1 + $0xb8] sm:$0x3] %v806_v52  ;;  %1269 = vst [vmem:[%s1829_s1 + $0xba] sm:$0x3] %v812_v53  ;;  %v824_v55 = vld [vmem:[#allocation0 + $0x2f8] sm:$0x3] }
  0xc2   :  { %1270 = vst [vmem:[%s1829_s1 + $0xbc] sm:$0x3] %v818_v54  ;;  %v734_v56 = vld [vmem:[#allocation0 + $0x280] sm:$0x3]  ;;  %v740_v57 = vld [vmem:[#allocation0 + $0x288] sm:$0x3] }
  0xc3   :  { %1271 = vst [vmem:[%s1829_s1 + $0xbe] sm:$0x3] %v824_v55  ;;  %1256 = vst [vmem:[%s1829_s1 + $0xa0] sm:$0x3] %v734_v56  ;;  %v746_v58 = vld [vmem:[#allocation0 + $0x290] sm:$0x3] }
  0xc4   :  { %1257 = vst [vmem:[%s1829_s1 + $0xa2] sm:$0x3] %v740_v57  ;;  %v752_v59 = vld [vmem:[#allocation0 + $0x298] sm:$0x3]  ;;  %v758_v60 = vld [vmem:[#allocation0 + $0x2a0] sm:$0x3] }
  0xc5   :  { %1258 = vst [vmem:[%s1829_s1 + $0xa4] sm:$0x3] %v746_v58  ;;  %1259 = vst [vmem:[%s1829_s1 + $0xa6] sm:$0x3] %v752_v59  ;;  %v764_v61 = vld [vmem:[#allocation0 + $0x2a8] sm:$0x3] }
  0xc6   :  { %1260 = vst [vmem:[%s1829_s1 + $0xa8] sm:$0x3] %v758_v60  ;;  %v770_v62 = vld [vmem:[#allocation0 + $0x2b0] sm:$0x3]  ;;  %v776_v63 = vld [vmem:[#allocation0 + $0x2b8] sm:$0x3] }
  0xc7   :  { %1261 = vst [vmem:[%s1829_s1 + $0xaa] sm:$0x3] %v764_v61  ;;  %1262 = vst [vmem:[%s1829_s1 + $0xac] sm:$0x3] %v770_v62  ;;  %v878_v0 = vld [vmem:[#allocation0 + $0x340] sm:$0x3] }
  0xc8   :  { %1263 = vst [vmem:[%s1829_s1 + $0xae] sm:$0x3] %v776_v63  ;;  %v884_v1 = vld [vmem:[#allocation0 + $0x348] sm:$0x3]  ;;  %v890_v2 = vld [vmem:[#allocation0 + $0x350] sm:$0x3] }
  0xc9   :  { %1280 = vst [vmem:[%s1829_s1 + $0xd0] sm:$0x3] %v878_v0  ;;  %1281 = vst [vmem:[%s1829_s1 + $0xd2] sm:$0x3] %v884_v1  ;;  %v896_v3 = vld [vmem:[#allocation0 + $0x358] sm:$0x3] }
  0xca   :  { %1282 = vst [vmem:[%s1829_s1 + $0xd4] sm:$0x3] %v890_v2  ;;  %v902_v4 = vld [vmem:[#allocation0 + $0x360] sm:$0x3]  ;;  %v908_v5 = vld [vmem:[#allocation0 + $0x368] sm:$0x3] }
  0xcb   :  { %1283 = vst [vmem:[%s1829_s1 + $0xd6] sm:$0x3] %v896_v3  ;;  %1284 = vst [vmem:[%s1829_s1 + $0xd8] sm:$0x3] %v902_v4  ;;  %v914_v6 = vld [vmem:[#allocation0 + $0x370] sm:$0x3] }
  0xcc   :  { %1285 = vst [vmem:[%s1829_s1 + $0xda] sm:$0x3] %v908_v5  ;;  %v920_v7 = vld [vmem:[#allocation0 + $0x378] sm:$0x3]  ;;  %v830_v8 = vld [vmem:[#allocation0 + $0x300] sm:$0x3] }
  0xcd   :  { %1286 = vst [vmem:[%s1829_s1 + $0xdc] sm:$0x3] %v914_v6  ;;  %1287 = vst [vmem:[%s1829_s1 + $0xde] sm:$0x3] %v920_v7  ;;  %v836_v9 = vld [vmem:[#allocation0 + $0x308] sm:$0x3] }
  0xce   :  { %1272 = vst [vmem:[%s1829_s1 + $0xc0] sm:$0x3] %v830_v8  ;;  %v842_v10 = vld [vmem:[#allocation0 + $0x310] sm:$0x3]  ;;  %v848_v11 = vld [vmem:[#allocation0 + $0x318] sm:$0x3] }
  0xcf   :  { %1273 = vst [vmem:[%s1829_s1 + $0xc2] sm:$0x3] %v836_v9  ;;  %1274 = vst [vmem:[%s1829_s1 + $0xc4] sm:$0x3] %v842_v10  ;;  %v854_v12 = vld [vmem:[#allocation0 + $0x320] sm:$0x3] }
  0xd0   :  { %1275 = vst [vmem:[%s1829_s1 + $0xc6] sm:$0x3] %v848_v11  ;;  %v860_v13 = vld [vmem:[#allocation0 + $0x328] sm:$0x3]  ;;  %v866_v14 = vld [vmem:[#allocation0 + $0x330] sm:$0x3] }
  0xd1   :  { %1276 = vst [vmem:[%s1829_s1 + $0xc8] sm:$0x3] %v854_v12  ;;  %1277 = vst [vmem:[%s1829_s1 + $0xca] sm:$0x3] %v860_v13  ;;  %v872_v15 = vld [vmem:[#allocation0 + $0x338] sm:$0x3] }
  0xd2   :  { %1278 = vst [vmem:[%s1829_s1 + $0xcc] sm:$0x3] %v866_v14  ;;  %v974_v16 = vld [vmem:[#allocation0 + $0x3c0] sm:$0x3]  ;;  %v980_v17 = vld [vmem:[#allocation0 + $0x3c8] sm:$0x3] }
  0xd3   :  { %1279 = vst [vmem:[%s1829_s1 + $0xce] sm:$0x3] %v872_v15  ;;  %1296 = vst [vmem:[%s1829_s1 + $0xf0] sm:$0x3] %v974_v16  ;;  %v986_v18 = vld [vmem:[#allocation0 + $0x3d0] sm:$0x3] }
  0xd4   :  { %1297 = vst [vmem:[%s1829_s1 + $0xf2] sm:$0x3] %v980_v17  ;;  %v992_v19 = vld [vmem:[#allocation0 + $0x3d8] sm:$0x3]  ;;  %v998_v20 = vld [vmem:[#allocation0 + $0x3e0] sm:$0x3] }
  0xd5   :  { %1298 = vst [vmem:[%s1829_s1 + $0xf4] sm:$0x3] %v986_v18  ;;  %1299 = vst [vmem:[%s1829_s1 + $0xf6] sm:$0x3] %v992_v19  ;;  %v1004_v21 = vld [vmem:[#allocation0 + $0x3e8] sm:$0x3] }
  0xd6   :  { %1300 = vst [vmem:[%s1829_s1 + $0xf8] sm:$0x3] %v998_v20  ;;  %v1010_v22 = vld [vmem:[#allocation0 + $0x3f0] sm:$0x3]  ;;  %v1016_v23 = vld [vmem:[#allocation0 + $0x3f8] sm:$0x3] }
  0xd7   :  { %1301 = vst [vmem:[%s1829_s1 + $0xfa] sm:$0x3] %v1004_v21  ;;  %1302 = vst [vmem:[%s1829_s1 + $0xfc] sm:$0x3] %v1010_v22  ;;  %v926_v24 = vld [vmem:[#allocation0 + $0x380] sm:$0x3] }
  0xd8   :  { %1303 = vst [vmem:[%s1829_s1 + $0xfe] sm:$0x3] %v1016_v23  ;;  %v932_v25 = vld [vmem:[#allocation0 + $0x388] sm:$0x3]  ;;  %v938_v26 = vld [vmem:[#allocation0 + $0x390] sm:$0x3] }
  0xd9   :  { %1288 = vst [vmem:[%s1829_s1 + $0xe0] sm:$0x3] %v926_v24  ;;  %1289 = vst [vmem:[%s1829_s1 + $0xe2] sm:$0x3] %v932_v25  ;;  %v944_v27 = vld [vmem:[#allocation0 + $0x398] sm:$0x3] }
  0xda   :  { %1290 = vst [vmem:[%s1829_s1 + $0xe4] sm:$0x3] %v938_v26  ;;  %v950_v28 = vld [vmem:[#allocation0 + $0x3a0] sm:$0x3]  ;;  %v956_v29 = vld [vmem:[#allocation0 + $0x3a8] sm:$0x3] }
  0xdb   :  { %1291 = vst [vmem:[%s1829_s1 + $0xe6] sm:$0x3] %v944_v27  ;;  %1292 = vst [vmem:[%s1829_s1 + $0xe8] sm:$0x3] %v950_v28  ;;  %v962_v30 = vld [vmem:[#allocation0 + $0x3b0] sm:$0x3] }
  0xdc   :  { %1293 = vst [vmem:[%s1829_s1 + $0xea] sm:$0x3] %v956_v29  ;;  %v968_v31 = vld [vmem:[#allocation0 + $0x3b8] sm:$0x3]  ;;  %1294 = vst [vmem:[%s1829_s1 + $0xec] sm:$0x3] %v962_v30 }
  0xdd   :  { %1295 = vst [vmem:[%s1829_s1 + $0xee] sm:$0x3] %v968_v31 }

// kernel: vit_encoder_forward.14
= control target key start
LH: loop header
LB: loop body
LE: loop exit
PB: predicated region body
PF: predicated region fallthrough
CT: control target
= control target key end

     0   :  { %s1816_s0 = inlined_call_operand.hbm [shape: bf16[12,2,24,8], index: 0, kind: input, shape index: {}, may-alias: {0,1,2}]   ;;  %s1817_s1 = inlined_call_operand.hbm [shape: bf16[12,2,24,8], index: 1, kind: input, shape index: {}, may-alias: {0,1,2}]   ;;  %s1818_s2 = inlined_call_operand.hbm [shape: bf16[12,2,24,8], index: 2, kind: input, shape index: {}, may-alias: {0,1,2}]   ;;  %s1819_s3 = inlined_call_operand.hbm [shape: bf16[4,2,24,8], index: 3, kind: output, shape index: {}]  }
   0x1   :  { %1839 = sst [smem:[#allocation25_spill]] %s1816_s0 }
   0x2   :  { %1840 = sst [smem:[#allocation26_spill]] %s1817_s1 }
   0x3   :  { %1841 = sst [smem:[#allocation27_spill]] %s1818_s2 }
   0x4   :  { %1842 = sst [smem:[#allocation28_spill]] %s1819_s3 }
   0x5   :  { %8 = vsyncpa [#allocation6], 0 }
   0x6   :  { %10 = vsyncpa [#allocation6 + $0x1], 0 }
   0x7   :  { %11 = vsyncpa [#allocation9], 0 }
   0x8   :  { %13 = vsyncpa [#allocation9 + $0x1], 0 }
   0x9   :  { %14 = vsyncpa [#allocation7], 0 }
   0xa   :  { %16 = vsyncpa [#allocation7 + $0x1], 0  ;;  %s1348_s12 = smov 0   ;;  %s1350_s13 = smov 0  }
   0xb   :  { %s1352_s14 = smov 0   ;;  %s1354_s15 = smov 0  }
   0xc   :  { %s1356_s16 = smov 0   ;;  %s1358_s17 = smov 0  }
   0xd   :  { %s1360_s18 = smov 0   ;;  %s1362_s19 = smov 0  }
   0xe   :  { %s1364_s20 = smov 0   ;;  %s1366_s21 = smov 0  }
   0xf   :  { %s1368_s22 = smov 0   ;;  %s1370_s23 = smov 0  }
  0x10   :  { %s1372_s24 = smov 0   ;;  %s1374_s25 = smov 0  }
  0x11 LB: > { %1843 = sst [smem:[#allocation16_spill]] %s1279_s16  ;;  %s1419_s26 = sadd.s32 4294967295, %s1315_s25   ;;  %s1315_s25 = sphi %s1374_s25, %s22_s25   ;;  %s1311_s24 = sphi %s1372_s24, %s1893_s24   ;;  %s1307_s23 = sphi %s1370_s23, %s1892_s23   ;;  %s1303_s22 = sphi %s1368_s22, %s1902_s22   ;;  %s1299_s21 = sphi %s1366_s21, %s1890_s21   ;;  %s1295_s20 = sphi %s1364_s20, %s1901_s20   ;;  %s1291_s19 = sphi %s1362_s19, %s1900_s19   ;;  %s1287_s18 = sphi %s1360_s18, %s1899_s18   ;;  %s1283_s17 = sphi %s1358_s17, %s1898_s17   ;;  %s1279_s16 = sphi %s1356_s16, %s1897_s16   ;;  %s1275_s15 = sphi %s1354_s15, %s1888_s15   ;;  %s1271_s14 = sphi %s1352_s14, %s1896_s14   ;;  %s1267_s13 = sphi %s1350_s13, %s1895_s13   ;;  %s1263_s12 = sphi %s1348_s12, %s1894_s12  }
  0x12   : > { %1844 = sst [smem:[#allocation17_spill]] %s1299_s21  ;;  %s44_s27 = sadd.s32 1, %s1307_s23 }
  0x13   : > { %1845 = sst [smem:[#allocation18_spill]] %s1303_s22  ;;  %p46_p0 = scmp.ge.s32.totalorder %s44_s27, 4 }
  0x14   : > { %1846 = sst [smem:[#allocation19_spill]] %s1307_s23  ;;  %s48_s28 = sadd.s32 1, %s1311_s24 }
  0x15   : > { %1847 = sst [smem:[#allocation20_spill]] %s1311_s24  ;;  %p1828_p1 = scmp.eq.s32.totalorder %s1315_s25, 0 }
  0x16   : > { %p1827_p2 = scmp.eq.s32.totalorder %s1419_s26, 0  ;;  %s1904_s27 = smov (%p46_p0, %s44_s27), 0 }
  0x17   : > { %1848 = sst [smem:[#allocation21_spill]] %s1904_s27  ;;  %s1906_s28 = smov (!%p46_p0, %s48_s28), %s1311_s24 }
  0x18   : > { %s82_s29 = sadd.s32 4, %s1307_s23  ;;  %s83_s30 = sadd.s32 4, %s1904_s27 }
  0x19   : > { %p50_p3 = scmp.ge.s32.totalorder %s1906_s28, 2  ;;  %s84_s4 = ssub.s32 %s82_s29, %s83_s30 }
  0x1a   : > { %s91_s5 = sadd.s32 1, %s1283_s17  ;;  %p98_p4 = scmp.ne.s32.totalorder %s1283_s17, %s1279_s16 }
  0x1b   : > { %s1908_s28 = smov (%p50_p3, %s1906_s28), 0  ;;  %p104_p6 = scmp.ne.s32.totalorder %s1279_s16, %s1275_s15 }
  0x1c   : > { %1849 = sst [smem:[#allocation22_spill]] %s1908_s28  ;;  %p1437_p5 = por %p98_p4, %p1828_p1 }
  0x1d   : > { %s1445_s7 = ssub.s32 %s1311_s24, %s1908_s28  ;;  %s114_s8 = sadd.s32 8, %s1307_s23 }
  0x1e   : > { %s86_s9 = sor.u32 %s84_s4, %s1445_s7  ;;  %p1451_p7 = por %p104_p6, %p1827_p2 }
  0x1f   : > { %p89_p8 = scmp.eq.s32.totalorder %s86_s9, 0  ;;  %s115_s11 = sadd.s32 8, %s1904_s27 }
  0x20   : > { %s1851_s10 = scalar_select %p1451_p7, 1, 0 }
  0x21   : > { %s116_s29 = ssub.s32 %s114_s8, %s115_s11  ;;  %p1826_p9 = scmp.lt.s32.totalorder %s1315_s25, 8 }
  0x22   : > { %1852 = sst [smem:[#allocation23_spill]] %s1851_s10  ;;  %s118_s15 = sor.u32 %s116_s29, %s1445_s7 }
  0x23   : > { %s1457_s30 = scalar_select %p89_p8, %s1283_s17, %s91_s5  }
  0x24   : > { %p1461_p10 = scmp.eq.s32.totalorder %s118_s15, 0  ;;  %s891_s4 = smul.u32 3, %s1311_s24 }
  0x25   : > { %s892_s3 = smul.u32 6, %s1307_s23  ;;  %s215_s21 = sand.u32 1, %s1315_s25  }
  0x26   : > { %s217_s9 = sand.u32 1, %s1283_s17   ;;  %s1854_s1 = sld [smem:[#allocation26_spill]] }
  0x27   : > { %s202_s22 = sadd.s32 %s892_s3, %s891_s4  ;;  %s893_s16 = smul.u32 12, %s217_s9 }
  0x28   : > { %s1468_s10 = sshll.u32 %s202_s22, 6  ;;  %p1481_p11 = pnand %p1826_p9, %p1437_p5 }
  0x29   : > { %s219_s3 = scalar_lea.vmem [#allocation8], %s893_s16  ;;  %s1489_s2 = scalar_lea.sflag [#allocation9], %s215_s21 }
  0x2a   : > { %s231_s22 = sshll.u32 %s219_s3, 4  ;;  %p1071_p3 = pneg %p1481_p11  ;;  %s1486_s22 = int_to_ptr.vmem [resolvable:$true] %s231_s22 }
  0x2c   : > { %s730_s5 = scalar_lea.hbm %s1854_s1, %s1468_s10  ;;  %s1074_s9 = scalar_lea.hbm %s1854_s1, 4608 }
  0x2d   : > { %s1475_s11 = scalar_lea.hbm %s730_s5, 1536  ;;  %s1099_s15 = scalar_lea.hbm %s730_s5, 1728 }
  0x2e   : > { %p1070_p0 = scmp.ne.s32.totalorder %s1475_s11, %s1099_s15  ;;  %p1075_p6 = scmp.lt.u32.totalorder %s1475_s11, %s1854_s1 }
  0x2f   : > { %p1076_p8 = scmp.lt.u32.totalorder %s1074_s9, %s1099_s15  ;;  %p1078_p2 = scmp.lt.u32.totalorder %s1099_s15, %s1475_s11 }
  0x30   : > { %p1072_p4 = pnand %p1071_p3, %p1070_p0 }
  0x31   : > { %p1077_p9 = por %p1076_p8, %p1075_p6 }
  0x32   : > { %p1073_p5 = pneg %p1072_p4 }
  0x33   : > { %p1079_p1 = por %p1078_p2, %p1077_p9 }
  0x35   : > { %p1080_p12 = pnand %p1079_p1, %p1073_p5 }
  0x37   : > { %1083 = shalt.err (!%p1080_p12)
}
  0x38   : > { %s1084_s21 = scalar_lea.vmem %s1486_s22, 192  ;;  %s1317_s5 = smov [#allocation8]  }
  0x39   : > { %p1085_p0 = scmp.ne.s32.totalorder %s1486_s22, %s1084_s21  ;;  %s1089_s3 = sshll.u32 %s1317_s5, 4  ;;  %s1090_s3 = int_to_ptr.vmem [resolvable:$false] %s1089_s3 }
  0x3a   : > { %s1091_s6 = scalar_lea.vmem %s1090_s3, 384  ;;  %p1092_p7 = scmp.lt.s32.totalorder %s1486_s22, %s1090_s3 }
  0x3b   : > { %p1087_p4 = pnand %p1085_p0, %p1071_p3  ;;  %p1093_p6 = scmp.lt.s32.totalorder %s1091_s6, %s1084_s21 }
  0x3d   : > { %p1088_p13 = pneg %p1087_p4  ;;  %p1094_p8 = por %p1093_p6, %p1092_p7 }
  0x3f   : > { %p1095_p2 = pnand %p1094_p8, %p1088_p13 }
  0x41   : > { %1098 = shalt.err (!%p1095_p2)
}
  0x42   : > { %s1830_s15 = smov 64   ;;  %s1832_s4 = smov 4  }
  0x43   : > { %914 = dma.hbm_to_vmem [thread:$0]  (!%p1481_p11), %s1475_s11, 192, %s1486_s22, %s1489_s2, %s1830_s15, %s1830_s15, %s1832_s4  }
  0x44   : > { %p1856_p1 = scmp.lt.s32.totalorder %s1315_s25, 9  ;;  %p1857_p7 = scmp.ge.s32.totalorder %s1315_s25, 1 }
  0x45   : > { %s837_s8 = sadd.s32 4294967294, %s1315_s25   ;;  %s52_s16 = ssub.s32 %s1307_s23, %s1904_s27 }
  0x46   : > { %p1523_p9 = pnand %p1857_p7, %p1856_p1  ;;  %s59_s21 = sadd.s32 1, %s1295_s20 }
  0x47   : > { %s54_s5 = sor.u32 %s1445_s7, %s52_s16  ;;  %p66_p12 = scmp.ne.s32.totalorder %s1295_s20, %s1291_s19 }
  0x48   : > { %s1858_s9 = scalar_select %p1523_p9, 1, 0 }
  0x49   : > { %p57_p13 = scmp.eq.s32.totalorder %s54_s5, 0  ;;  %p72_p3 = scmp.ne.s32.totalorder %s1291_s19, %s1287_s18 }
  0x4a   : > { %p1859_p5 = scmp.eq.s32.totalorder %s1315_s25, 0  ;;  %p164_p4 = scmp.eq.s32.totalorder %s1419_s26, 7 }
  0x4b   : > { %s1540_s29 = scalar_select %p57_p13, %s1295_s20, %s59_s21  }
  0x4c   : > { %p68_p0 = por %p1859_p5, %p66_p12  ;;  %p1861_p11 = scmp.eq.s32.totalorder %s1419_s26, 0 }
  0x4d   : > { %1860 = sst [smem:[#allocation24_spill]] %s1540_s29  ;;  %p1548_p8 = por %p164_p4, %p66_p12 }
  0x4e   : > { %p1544_p6 = por %p1861_p11, %p72_p3  ;;  %p170_p2 = scmp.eq.s32.totalorder %s837_s8, 7 }
  0x4f   : > { %s1863_s22 = scalar_select %p1548_p8, 1, 0 }
  0x50   : > { %s1862_s11 = scalar_select %p1544_p6, 1, 0 }
  0x51   : > { %s190_s3 = sand.u32 1, %s1295_s20   ;;  %p1553_p1 = por %p170_p2, %p72_p3 }
  0x52   : > { %s890_s7 = smul.u32 12, %s190_s3  ;;  %s1865_s0 = sld [smem:[#allocation25_spill]] }
  0x53   : > { %s1864_s6 = scalar_select %p1553_p1, 1, 0 }
  0x54   : > { %p1866_p7 = scmp.lt.s32.totalorder %s1315_s25, 8  ;;  %s194_s8 = scalar_lea.vmem [#allocation5], %s890_s7 }
  0x55   : > { %s205_s4 = sshll.u32 %s194_s8, 4  ;;  %s1571_s1 = scalar_lea.sflag [#allocation6], %s190_s3  ;;  %s1569_s4 = int_to_ptr.vmem [resolvable:$true] %s205_s4 }
  0x56   : > { %p1565_p12 = pnand %p1866_p7, %p68_p0 }
  0x58   : > { %s1561_s21 = scalar_lea.hbm %s1865_s0, %s1468_s10  ;;  %p1102_p3 = pneg %p1565_p12 }
  0x59   : > { %s1100_s16 = scalar_lea.hbm %s1561_s21, 192  ;;  %s1105_s24 = scalar_lea.hbm %s1865_s0, 4608 }
  0x5a   : > { %p1101_p13 = scmp.ne.s32.totalorder %s1561_s21, %s1100_s16  ;;  %p1106_p0 = scmp.lt.u32.totalorder %s1561_s21, %s1865_s0 }
  0x5b   : > { %p1107_p11 = scmp.lt.u32.totalorder %s1105_s24, %s1100_s16  ;;  %p1109_p7 = scmp.lt.u32.totalorder %s1100_s16, %s1561_s21 }
  0x5c   : > { %p1103_p5 = pnand %p1102_p3, %p1101_p13 }
  0x5d   : > { %p1108_p2 = por %p1107_p11, %p1106_p0 }
  0x5e   : > { %p1104_p4 = pneg %p1103_p5 }
  0x5f   : > { %p1110_p1 = por %p1109_p7, %p1108_p2 }
  0x61   : > { %p1111_p8 = pnand %p1110_p1, %p1104_p4 }
  0x63   : > { %1114 = shalt.err (!%p1111_p8)
}
  0x64   : > { %s1115_s3 = scalar_lea.vmem %s1569_s4, 192  ;;  %s1320_s27 = smov [#allocation5]  }
  0x65   : > { %p1116_p13 = scmp.ne.s32.totalorder %s1569_s4, %s1115_s3  ;;  %s1120_s7 = sshll.u32 %s1320_s27, 4  ;;  %s1121_s7 = int_to_ptr.vmem [resolvable:$false] %s1120_s7 }
  0x66   : > { %s1122_s23 = scalar_lea.vmem %s1121_s7, 384  ;;  %p1123_p9 = scmp.lt.s32.totalorder %s1569_s4, %s1121_s7 }
  0x67   : > { %p1118_p5 = pnand %p1116_p13, %p1102_p3  ;;  %p1124_p0 = scmp.lt.s32.totalorder %s1122_s23, %s1115_s3 }
  0x69   : > { %p1119_p6 = pneg %p1118_p5  ;;  %p1125_p11 = por %p1124_p0, %p1123_p9 }
  0x6b   : > { %p1126_p2 = pnand %p1125_p11, %p1119_p6 }
  0x6d   : > { %1129 = shalt.err (!%p1126_p2)
}
  0x6e   : > { %s1868_s24 = smov 4   ;;  %s1869_s29 = smov 64  }
  0x6f   : > { %911 = dma.hbm_to_vmem [thread:$0]  (!%p1565_p12), %s1561_s21, 192, %s1569_s4, %s1571_s1, %s1869_s29, %s1869_s29, %s1868_s24  }
  0x70   : > { %s123_s15 = sadd.s32 1, %s1271_s14  ;;  %p130_p9 = scmp.ne.s32.totalorder %s1271_s14, %s1267_s13 }
  0x71   : > { %s1606_s8 = scalar_select %p1461_p10, %s1271_s14, %s123_s15  }
  0x72   : > { %p136_p6 = scmp.ne.s32.totalorder %s1267_s13, %s1263_s12  ;;  %s243_s16 = sand.u32 1, %s1271_s14  }
  0x73   : > { %s1870_s27 = sld [smem:[#allocation27_spill]]  ;;  %p1871_p8 = scmp.eq.s32.totalorder %s1315_s25, 0 }
  0x74   : > { %p1872_p3 = scmp.eq.s32.totalorder %s1419_s26, 0  ;;  %s894_s0 = smul.u32 12, %s243_s16 }
  0x75   : > { %p132_p1 = por %p130_p9, %p1871_p8  ;;  %p1874_p12 = scmp.lt.s32.totalorder %s1315_s25, 8 }
  0x76   : > { %p1621_p4 = por %p136_p6, %p1872_p3  ;;  %s245_s28 = scalar_lea.vmem [#allocation10], %s894_s0 }
  0x77   : > { %p1627_p7 = pnand %p1874_p12, %p132_p1 }
  0x79   : > { %s741_s7 = scalar_lea.hbm %s1870_s27, %s1468_s10  ;;  %s257_s10 = sshll.u32 %s245_s28, 4  ;;  %s1633_s10 = int_to_ptr.vmem [resolvable:$true] %s257_s10 }
  0x7a   : > { %s1631_s12 = scalar_lea.hbm %s741_s7, 3072  ;;  %s1160_s4 = scalar_lea.hbm %s741_s7, 3264 }
  0x7b   : > { %p1131_p10 = scmp.ne.s32.totalorder %s1631_s12, %s1160_s4  ;;  %p1132_p13 = pneg %p1627_p7 }
  0x7c   : > { %s1135_s16 = scalar_lea.hbm %s1870_s27, 4608  ;;  %p1136_p11 = scmp.lt.u32.totalorder %s1631_s12, %s1870_s27 }
  0x7d   : > { %p1133_p5 = pnand %p1132_p13, %p1131_p10  ;;  %p1137_p2 = scmp.lt.u32.totalorder %s1135_s16, %s1160_s4 }
  0x7e   : > { %p1139_p6 = scmp.lt.u32.totalorder %s1160_s4, %s1631_s12 }
  0x7f   : > { %p1134_p0 = pneg %p1133_p5  ;;  %p1138_p9 = por %p1137_p2, %p1136_p11 }
  0x81   : > { %p1140_p8 = por %p1139_p6, %p1138_p9 }
  0x83   : > { %p1141_p1 = pnand %p1140_p8, %p1134_p0 }
  0x85   : > { %1144 = shalt.err (!%p1141_p1)
}
  0x86   : > { %s1145_s0 = scalar_lea.vmem %s1633_s10, 192  ;;  %s1321_s7 = smov [#allocation10]  }
  0x87   : > { %p1146_p3 = scmp.ne.s32.totalorder %s1633_s10, %s1145_s0  ;;  %s1150_s28 = sshll.u32 %s1321_s7, 4  ;;  %s1151_s28 = int_to_ptr.vmem [resolvable:$false] %s1150_s28 }
  0x88   : > { %s1152_s21 = scalar_lea.vmem %s1151_s28, 384  ;;  %p1153_p5 = scmp.lt.s32.totalorder %s1633_s10, %s1151_s28 }
  0x89   : > { %p1148_p12 = pnand %p1146_p3, %p1132_p13  ;;  %p1154_p11 = scmp.lt.s32.totalorder %s1152_s21, %s1145_s0 }
  0x8b   : > { %p1149_p10 = pneg %p1148_p12  ;;  %p1155_p2 = por %p1154_p11, %p1153_p5 }
  0x8d   : > { %p1156_p9 = pnand %p1155_p2, %p1149_p10 }
  0x8f   : > { %1159 = shalt.err (!%p1156_p9)
}
  0x90   : > { %917 = dma.hbm_to_vmem [thread:$0]  (!%p1627_p7), %s1631_s12, 192, %s1633_s10, %s1489_s2, %s1869_s29, %s1869_s29, %s1868_s24  }
  0x91   : > { %p1876_p13 = scmp.ne.s32.totalorder %s1858_s9, 0 }
  0x92   : > { %s1666_s4 = sand.u32 (!%p1876_p13), 1, %s1291_s19   ;;  %p1877_p0 = scmp.ne.s32.totalorder (!%p1876_p13), %s1862_s11, 0 }
  0x93   : > { %269 = sbr.rel (%p1876_p13) target bundleno = 1011 (0x3f3), region = 32  ;;  %s272_s16 = scalar_lea.sflag (!%p1876_p13), [#allocation6], %s1666_s4 }
  0x94   : > { %s895_s15 = smul.u32 (!%p1876_p13), 12, %s1666_s4 }
  0x96   : > { %s275_s1 = scalar_lea.vmem (!%p1876_p13), [#allocation5], %s895_s15 }
  0x9a   : > { %1246 = dma.done.wait (%p1877_p0), %s272_s16, 192  }
  0x9b   : > { %1248 = vsyncadd (%p1877_p0), %s272_s16, 4294967104  ;;  %s1878_s2 = sld [smem:[#allocation16_spill]]  ;;  %s280_s24 = sand.u32 1, %s1419_s26  }
  0x9c   : > { %s1879_s9 = sld [smem:[#allocation23_spill]]  ;;  %s281_s10 = scalar_lea.sflag [#allocation9], %s280_s24 }
  0xa1   : > { %s282_s29 = sand.u32 1, %s1878_s2  }
  0xa2   : > { %s896_s12 = smul.u32 12, %s282_s29  ;;  %p1880_p7 = scmp.ne.s32.totalorder %s1879_s9, 0 }
  0xa4   : > { %s284_s5 = scalar_lea.vmem [#allocation8], %s896_s12 }
  0xa5   : > { %1250 = dma.done.wait (%p1880_p7), %s281_s10, 192  }
  0xa6   : > { %1252 = vsyncadd (%p1880_p7), %s281_s10, 4294967104  ;;  %s291_s3 = sand.u32 1, %s1267_s13  }
  0xa7   : > { %s1683_s0 = smul.u32 12, %s291_s3 }
  0xa9   : > { %s293_s11 = scalar_lea.vmem [#allocation10], %s1683_s0 }
  0xaa   : > { %1254 = dma.done.wait (%p1621_p4), %s281_s10, 192  }
  0xab   : > { %1256 = vsyncadd (%p1621_p4), %s281_s10, 4294967104  ;;  %vm344_vm0 = vcmask 64512   ;;  %v1045_v0 = vld [vmem:[%s284_s5] sm:$0xff]   ;;  %v1046_v1 = vld [vmem:[%s284_s5 + $0x8] ss:$0 sps:$4 sm:$0xff]   ;;  %vm337_vm1 = vcmask 7168   ;;  %v437_v7 = vlaneseq }
  0xac   : > { %887 = vmatprep.subr.msk.bf16.mxu0 %vm344_vm0, %v1045_v0  ;;  %v381_v2 = vsel %vm344_vm0, %v1045_v0, 0  ;;  %v1047_v3 = vld [vmem:[%s275_s1] sm:$0xff]   ;;  %v384_v4 = vsel %vm344_vm0, %v1046_v1, 0  ;;  %v1048_v5 = vld [vmem:[%s275_s1 + $0x8] ss:$0 sps:$4 sm:$0xff]   ;;  %v1322_v6 = vmov -inf  }
  0xad   : > { %872 = vmatpush3.bf16.xpose.msra.mxu0 %v381_v2  ;;  %875 = vmatprep.mubr.msk.bf16.mxu0 %vm344_vm0, %v1047_v3  ;;  %340 = vst.msk [vmem:[#allocation2 + $0x10] sm:$0xff] %vm337_vm1, %v1322_v6  ;;  %338 = vst.msk [vmem:[#allocation2] sm:$0xff] %vm337_vm1, %v1322_v6  ;;  %v438_v8 = vand.u32 127, %v437_v7  ;;  %vm449_vm3 = vcmask 195584   ;;  %v1323_v22 = vmov 0   ;;  %v1324_v23 = vmov 0.0  }
  0xae   : > { %888 = vmatprep.subr.msk.bf16.mxu0 %vm344_vm0, %v1046_v1  ;;  %339 = vst.msk [vmem:[#allocation2 + $0x8] sm:$0xff] %vm337_vm1, %v1322_v6  ;;  %1043 = vset.pattern.permute.xlu1 %v1323_v22  ;;  %341 = vst.msk [vmem:[#allocation3] sm:$0xff] %vm337_vm1, %v1324_v23  ;;  %v1049_v36 = vld [vmem:[%s293_s11] sm:$0xff]   ;;  %v1050_v37 = vld [vmem:[%s293_s11 + $0x8] ss:$0 sps:$4 sm:$0xff]   ;;  %vm555_vm4 = vcmask 1043456  }
  0xaf   : > { %vm442_vm2 = vcmp.lt.s32.totalorder %v438_v8, 17  ;;  %1044 = vset.pattern.permute.xlu0 %v1323_v22  ;;  %342 = vst.msk [vmem:[#allocation3 + $0x8] sm:$0xff] %vm337_vm1, %v1324_v23  ;;  %343 = vst.msk [vmem:[#allocation3 + $0x10] sm:$0xff] %vm337_vm1, %v1324_v23  ;;  %879 = vmatprep.subr.bf16.mxu1 %v1049_v36  ;;  %v557_v38 = vsel %vm555_vm4, %v1050_v37, 0  ;;  %s1881_s26 = sld [smem:[#allocation18_spill]]  ;;  %s1882_s23 = sld [smem:[#allocation17_spill]] }
  0xb0   : > { %345 = vst.msk [vmem:[#allocation4] sm:$0xff] %vm344_vm0, %v1324_v23  ;;  %346 = vst.msk [vmem:[#allocation4 + $0x8] sm:$0xff] %vm344_vm0, %v1324_v23  ;;  %880 = vmatpush3.bf16.msra.mxu1 %v1049_v36  ;;  %vm659_vm5 = vcmask 60416   ;;  %s325_s21 = scalar_lea.vmem [#allocation11], %s895_s15  ;;  %s1883_s24 = sld [smem:[#allocation28_spill]] }
  0xb1   : > { %347 = vst.msk [vmem:[#allocation4 + $0x10] sm:$0xff] %vm344_vm0, %v1324_v23  ;;  %889 = vmatprep.subr.msk.bf16.mxu1 %vm555_vm4, %v1050_v37  ;;  %s681_s1 = sshll.u32 %s325_s21, 4  ;;  %s664_s10 = scalar_lea.sflag [#allocation7], %s1666_s4  ;;  %s1731_s1 = int_to_ptr.vmem [resolvable:$true] %s681_s1 }
  0xb2   : > { %s1161_s5 = scalar_lea.vmem %s1731_s1, 192  ;;  %p1885_p6 = scmp.ne.s32.totalorder %s1863_s22, 0 }
  0xb3   : > { %p1162_p4 = scmp.ne.s32.totalorder %s1731_s1, %s1161_s5  ;;  %s1325_s3 = smov [#allocation11]  }
  0xb4   : > { %v448_v24 = vld [vmem:[#allocation2 + $0x10] sm:$0xff]  ;;  %v446_v25 = vld [vmem:[#allocation2] sm:$0xff]  ;;  %882 = vmatpush3.bf16.msra.mxu1 %v557_v38  ;;  %s1165_s0 = sshll.u32 %s1325_s3, 4  ;;  %s1166_s0 = int_to_ptr.vmem [resolvable:$false] %s1165_s0 }
  0xb5   : > { %874 = vmatpush3.bf16.xpose.msra.mxu0 %v384_v4  ;;  %v447_v31 = vld [vmem:[#allocation2 + $0x8] sm:$0xff]  ;;  %v495_v62 = vld [vmem:[#allocation3] sm:$0xff]  ;;  %s898_s7 = smul.u32 3, %s1881_s26  ;;  %p1163_p8 = pnand %p1162_p4, %p1885_p6 }
  0xb6   : > { %v496_v1 = vld [vmem:[#allocation3 + $0x8] sm:$0xff]  ;;  %v497_v3 = vld [vmem:[#allocation3 + $0x10] sm:$0xff]  ;;  %s899_s28 = smul.u32 6, %s1882_s23  ;;  %s1884_s29 = smov %s1883_s24 }
  0xb7   : > { %p1164_p1 = pneg %p1163_p8  ;;  %s1167_s11 = scalar_lea.vmem %s1166_s0, 384 }
  0xb8   : > { %s678_s16 = sadd.s32 %s899_s28, %s898_s7  ;;  %p1168_p3 = scmp.lt.s32.totalorder %s1731_s1, %s1166_s0 }
  0xb9   : > { %s857_s2 = sshll.u32 %s678_s16, 6  ;;  %p1169_p12 = scmp.lt.s32.totalorder %s1167_s11, %s1161_s5 }
  0xba   : > { %s1737_s12 = scalar_lea.hbm %s1883_s24, %s857_s2 }
  0xbb   : > { %p1170_p10 = por %p1169_p12, %p1168_p3 }
  0xbc   : > { %876 = vmatmul.mubr.msk.bf16.vlgmr.msra.gmra.mrb[0].mxu0 %vm344_vm0, %v1048_v5 }
  0xbd   : > { %p1171_p5 = pnand %p1170_p10, %p1164_p1 }
 0x18f   : > { %v877_v9 = vpop.f32.mrb[0].mxu0 }
 0x190   : > { %v436_v10 = vmul.f32 0.35355338, %v877_v9  ;;  %v420_v11 = vpop.f32.mrb[1].mxu0 }
 0x191   : > { %v434_v12 = vmul.f32 0.35355338, %v420_v11  ;;  %v878_v13 = vpop.f32.mrb[2].mxu0 }
 0x192   : > { %v423_v14 = vpop.f32.mrb[3].mxu0  ;;  %v445_v15 = vsel %vm442_vm2, %v436_v10, -1e+30 }
 0x193   : > { %v435_v16 = vmul.f32 0.35355338, %v423_v14  ;;  %v456_v17 = vsel %vm449_vm3, %v445_v15, -inf  ;;  %v443_v18 = vsel %vm442_vm2, %v434_v12, -1e+30 }
 0x194   : > { %457 = vmax.xlane.f32.xlu1 %v456_v17  ;;  %v450_v19 = vsel %vm449_vm3, %v443_v18, -inf  ;;  %v519_v17 = vld [vmem:[#allocation4 + $0x10] sm:$0xff] }
 0x195   : > { %451 = vmax.xlane.f32.xlu0 %v450_v19  ;;  %v444_v20 = vsel %vm442_vm2, %v435_v16, -1e+30  ;;  %v517_v19 = vld [vmem:[#allocation4] sm:$0xff] }
 0x196   : > { %v453_v21 = vsel %vm449_vm3, %v444_v20, -inf }
 0x199   : > { %454 = vmax.xlane.f32.xlu0 %v453_v21  ;;  %v518_v21 = vld [vmem:[#allocation4 + $0x8] sm:$0xff] }
 0x221   : > { %v458_v26 = vpop.xlane.xlu1 %457 }
 0x222   : > { %v461_v27 = vmax.f32 %v448_v24, %v458_v26  ;;  %v452_v28 = vpop.xlane.xlu0 %451 }
 0x223   : > { %v459_v29 = vmax.f32 %v446_v25, %v452_v28 }
 0x224   : > { %v464_v30 = vsub.f32 %v448_v24, %v461_v27  ;;  %615 = vst.msk [vmem:[#allocation2 + $0x10] sm:$0xff] %vm337_vm1, %v461_v27 }
 0x225   : > { %v462_v32 = vsub.f32 %v446_v25, %v459_v29  ;;  %613 = vst.msk [vmem:[#allocation2] sm:$0xff] %vm337_vm1, %v459_v29  ;;  %473 = vperm.xlu1 %1043, %v459_v29  }
 0x226   : > { %v455_v33 = vpop.xlane.xlu0 %454  ;;  %v469_v57 = vmul.f32 1.442695, %v464_v30 }
 0x227   : > { %v460_v34 = vmax.f32 %v447_v31, %v455_v33  ;;  %v465_v56 = vmul.f32 1.442695, %v462_v32 }
 0x229   : > { %v463_v35 = vsub.f32 %v447_v31, %v460_v34  ;;  %614 = vst.msk [vmem:[#allocation2 + $0x8] sm:$0xff] %vm337_vm1, %v460_v34  ;;  %478 = vperm.xlu0 %1044, %v460_v34   ;;  %483 = vperm.xlu1 %1043, %v461_v27  }
 0x22b   : > { %v467_v58 = vmul.f32 1.442695, %v463_v35 }
 0x2a4   : > { %v474_v39 = vpop.permute.xlu1 %473 }
 0x2a5   : > { %v486_v40 = vsub.f32 %v443_v18, %v474_v39 }
 0x2a7   : > { %v489_v41 = vmul.f32 1.442695, %v486_v40 }
 0x2a8   : > { %v479_v42 = vpop.permute.xlu0 %478  ;;  %v484_v43 = vpop.permute.xlu1 %483 }
 0x2a9   : > { %1051 = vpow2.f32 %v489_v41  ;;  %v487_v44 = vsub.f32 %v444_v20, %v479_v42  ;;  %v488_v45 = vsub.f32 %v445_v15, %v484_v43 }
 0x2ab   : > { %v491_v46 = vmul.f32 1.442695, %v487_v44  ;;  %v493_v47 = vmul.f32 1.442695, %v488_v45 }
 0x2ad   : > { %1053 = vpow2.f32 %v491_v46 }
 0x2ae   : > { %1055 = vpow2.f32 %v493_v47 }
 0x2af   : > { %1057 = vpow2.f32 %v465_v56 }
 0x2b0   : > { %1059 = vpow2.f32 %v469_v57 }
 0x2b1   : > { %1061 = vpow2.f32 %v467_v58 }
 0x2b3   : > { %v1052_v48 = vpop.eup %1051 }
 0x2b4   : > { %v501_v49 = vsel %vm449_vm3, %v1052_v48, 0.0 }
 0x2b5   : > { %502 = vadd.xlane.f32.xlu1 %v501_v49 }
 0x2b7   : > { %v1054_v50 = vpop.eup %1053 }
 0x2b8   : > { %v1056_v51 = vpop.eup %1055  ;;  %v504_v52 = vsel %vm449_vm3, %v1054_v50, 0.0  ;;  %v538_v53 = vpack.c.bf16 %v1054_v50, %v1052_v48 }
 0x2b9   : > { %505 = vadd.xlane.f32.xlu0 %v504_v52  ;;  %v507_v54 = vsel %vm449_vm3, %v1056_v51, 0.0  ;;  %v539_v55 = vpack.c.bf16 %v1056_v51, %v1056_v51  ;;  %v1058_v59 = vpop.eup %1057 }
 0x2ba   : > { %508 = vadd.xlane.f32.xlu1 %v507_v54  ;;  %883 = vmatprep.mubr.msk.bf16.mxu1 %vm449_vm3, %v538_v53  ;;  %v1060_v60 = vpop.eup %1059  ;;  %v498_v63 = vmul.f32 %v1058_v59, %v495_v62 }
 0x2bb   : > { %884 = vmatmul.mubr.msk.bf16.vlgmr.msra.gmra.mrb[0].mxu1 %vm449_vm3, %v539_v55  ;;  %v1062_v61 = vpop.eup %1061  ;;  %v500_v6 = vmul.f32 %v1060_v60, %v497_v3 }
 0x2bc   : > { %v499_v4 = vmul.f32 %v1062_v61, %v496_v1 }
 0x2cb   : > { %522 = vperm.xlu1 %1043, %v1058_v59  }
 0x2cf   : > { %527 = vperm.xlu1 %1043, %v1062_v61   ;;  %532 = vperm.xlu0 %1044, %v1060_v60  }
 0x342   : > { %v503_v0 = vpop.xlane.xlu1 %502 }
 0x343   : > { %v510_v2 = vadd.f32 %v503_v0, %v498_v63 }
 0x345   : > { %514 = vst.msk [vmem:[#allocation3] sm:$0xff] %vm337_vm1, %v510_v2 }
 0x346   : > { %v506_v5 = vpop.xlane.xlu0 %505 }
 0x347   : > { %v511_v7 = vadd.f32 %v506_v5, %v499_v4  ;;  %v509_v8 = vpop.xlane.xlu1 %508 }
 0x348   : > { %v512_v9 = vadd.f32 %v509_v8, %v500_v6 }
 0x349   : > { %515 = vst.msk [vmem:[#allocation3 + $0x8] sm:$0xff] %vm337_vm1, %v511_v7 }
 0x34a   : > { %516 = vst.msk [vmem:[#allocation3 + $0x10] sm:$0xff] %vm337_vm1, %v512_v9 }
 0x34b   : > { %v523_v16 = vpop.permute.xlu1 %522 }
 0x34c   : > { %v622_v10 = vld [vmem:[#allocation3] sm:$0xff]  ;;  %v535_v23 = vmul.f32 %v523_v16, %v517_v19 }
 0x34d   : > { %1063 = vrcp.f32 %v622_v10 }
 0x34e   : > { %v533_v18 = vpop.permute.xlu0 %532 }
 0x34f   : > { %v537_v20 = vmul.f32 %v533_v18, %v519_v17  ;;  %v528_v22 = vpop.permute.xlu1 %527 }
 0x350   : > { %v623_v11 = vld [vmem:[#allocation3 + $0x8] sm:$0xff]  ;;  %v536_v27 = vmul.f32 %v528_v22, %v518_v21 }
 0x351   : > { %1065 = vrcp.f32 %v623_v11  ;;  %v624_v12 = vld [vmem:[#allocation3 + $0x10] sm:$0xff] }
 0x352   : > { %1067 = vrcp.f32 %v624_v12 }
 0x357   : > { %v1064_v13 = vpop.eup %1063 }
 0x358   : > { %630 = vperm.xlu1 %1043, %v1064_v13  }
 0x35b   : > { %v1066_v14 = vpop.eup %1065 }
 0x35c   : > { %635 = vperm.xlu1 %1043, %v1066_v14   ;;  %v1068_v15 = vpop.eup %1067 }
 0x360   : > { %640 = vperm.xlu1 %1043, %v1068_v15  }
 0x38e   : > { %v885_v24 = vpop.f32.mrb[0].mxu1 }
 0x38f   : > { %v609_v25 = vadd.f32 %v885_v24, %v537_v20  ;;  %v593_v26 = vpop.f32.mrb[1].mxu1 }
 0x390   : > { %v607_v28 = vadd.f32 %v593_v26, %v535_v23  ;;  %v886_v29 = vpop.f32.mrb[2].mxu1 }
 0x391   : > { %612 = vst.msk [vmem:[#allocation4 + $0x10] sm:$0xff] %vm344_vm0, %v609_v25  ;;  %v596_v30 = vpop.f32.mrb[3].mxu1 }
 0x392   : > { %610 = vst.msk [vmem:[#allocation4] sm:$0xff] %vm344_vm0, %v607_v28  ;;  %v608_v31 = vadd.f32 %v596_v30, %v536_v27 }
 0x394   : > { %611 = vst.msk [vmem:[#allocation4 + $0x8] sm:$0xff] %vm344_vm0, %v608_v31 }
 0x398   : > { %v621_v40 = vld [vmem:[#allocation4 + $0x10] sm:$0xff] }
 0x399   : > { %v619_v32 = vld [vmem:[#allocation4] sm:$0xff] }
 0x39b   : > { %v620_v36 = vld [vmem:[#allocation4 + $0x8] sm:$0xff] }
 0x3d7   : > { %v631_v33 = vpop.permute.xlu1 %630 }
 0x3d8   : > { %v643_v34 = vmul.f32 %v631_v33, %v619_v32 }
 0x3da   : > { %v860_v35 = vpack.c.bf16 %v643_v34, %v643_v34 }
 0x3db   : > { %v636_v37 = vpop.permute.xlu1 %635 }
 0x3dc   : > { %660 = vst.msk [vmem:[%s325_s21] sm:$0xf] %vm659_vm5, %v860_v35  ;;  %v644_v38 = vmul.f32 %v636_v37, %v620_v36 }
 0x3de   : > { %v861_v39 = vpack.c.bf16 %v644_v38, %v644_v38 }
 0x3df   : > { %v641_v41 = vpop.permute.xlu1 %640 }
 0x3e0   : > { %661 = vst.msk [vmem:[%s325_s21 + $0x4] sm:$0xf] %vm659_vm5, %v861_v39  ;;  %v645_v42 = vmul.f32 %v641_v41, %v621_v40 }
 0x3e2   : > { %v862_v43 = vpack.c.bf16 %v645_v42, %v645_v42 }
 0x3e4   : > { %662 = vst.msk [vmem:[%s325_s21 + $0x8] sm:$0xf] %vm659_vm5, %v862_v43 }
 0x3e5   : > { %1174 = shalt.err (!%p1171_p5)
}
 0x3e6   : > { %s1175_s26 = scalar_lea.hbm %s1737_s12, 192  ;;  %s1179_s28 = scalar_lea.hbm %s1884_s29, 1536 }
 0x3e7   : > { %p1176_p11 = scmp.ne.s32.totalorder %s1737_s12, %s1175_s26  ;;  %p1180_p13 = scmp.lt.u32.totalorder %s1737_s12, %s1884_s29 }
 0x3e8   : > { %p1181_p0 = scmp.lt.u32.totalorder %s1179_s28, %s1175_s26  ;;  %p1183_p4 = scmp.lt.u32.totalorder %s1175_s26, %s1737_s12 }
 0x3e9   : > { %p1177_p2 = pnand %p1176_p11, %p1885_p6 }
 0x3ea   : > { %p1182_p7 = por %p1181_p0, %p1180_p13 }
 0x3eb   : > { %p1178_p9 = pneg %p1177_p2 }
 0x3ec   : > { %p1184_p8 = por %p1183_p4, %p1182_p7 }
 0x3ee   : > { %p1185_p1 = pnand %p1184_p8, %p1178_p9 }
 0x3f0   : > { %1188 = shalt.err (!%p1185_p1)
}
 0x3f1   : > { %s1326_s2 = smov 64   ;;  %s1327_s15 = smov 4  }
 0x3f2   : > { %906 = dma.vmem_to_hbm [thread:$0]  (%p1885_p6), %s1731_s1, 192, %s1737_s12, %s664_s10, %s1326_s2, %s1326_s2, %s1327_s15  }
 0x3f3 PF: > { %p923_p3 = scmp.ge.s32.totalorder %s1315_s25, 2  ;;  %s696_s9 = sand.u32 1, %s1287_s18  }
 0x3f4   : > { %p1886_p12 = scmp.ne.s32.totalorder %s1864_s6, 0  ;;  %s697_s24 = scalar_lea.sflag [#allocation7], %s696_s9 }
 0x3f6   : > { %p919_p10 = pnand %p923_p3, %p1886_p12 }
 0x3f8   : > { %1258 = dma.done.wait (!%p919_p10), %s697_s24, 192  }
 0x3f9   : > { %1260 = vsyncadd (!%p919_p10), %s697_s24, 4294967104  ;;  %s22_s25 = sadd.s32 1, %s1315_s25   ;;  %s1888_s15 = sld [smem:[#allocation16_spill]] }
 0x3fa   : > { %p1769_p5 = scmp.ge.s32.totalorder %s22_s25, 10   ;;  %s1889_s22 = sld [smem:[#allocation24_spill]] }
 0x3fb   : > { %s1890_s21 = sld [smem:[#allocation19_spill]]  ;;  %s1891_s6 = sld [smem:[#allocation20_spill]] }
 0x3fc   : > { %s1892_s23 = sld [smem:[#allocation21_spill]]  ;;  %s1893_s24 = sld [smem:[#allocation22_spill]] }
 0x3fd   : > { %s1894_s12 = smov %s1267_s13  ;;  %s1895_s13 = smov %s1271_s14 }
 0x3fe   : > { %s1896_s14 = smov %s1606_s8  ;;  %s1897_s16 = smov %s1283_s17 }
 0x3ff   : > { %s1898_s17 = smov %s1457_s30  ;;  %s1899_s18 = smov %s1291_s19 }
 0x400   : > { %s1900_s19 = smov %s1295_s20  ;;  %s1901_s20 = smov %s1889_s22 }
 0x401   : > { %s1902_s22 = smov %s1891_s6  ;;  %21 = sbr.rel (!%p1769_p5) target bundleno = 17 (0x11), region = 109 }
 0x408   :  { %702 = vsyncpa [#allocation6], 1 }
 0x409   :  { %704 = vsyncpa [#allocation6 + $0x1], 1 }
 0x40a   :  { %705 = vsyncpa [#allocation9], 1 }
 0x40b   :  { %707 = vsyncpa [#allocation9 + $0x1], 1 }
 0x40c   :  { %708 = vsyncpa [#allocation7], 1 }
 0x40d   :  { %710 = vsyncpa [#allocation7 + $0x1], 1 }

// kernel: vit_encoder_forward.12
= control target key start
LH: loop header
LB: loop body
LE: loop exit
PB: predicated region body
PF: predicated region fallthrough
CT: control target
= control target key end

     0   :  { %s1276_s0 = inlined_call_operand.hbm [shape: f32[2,2,8,64], index: 0, kind: input, shape index: {}]   ;;  %s1277_s1 = inlined_call_operand.hbm [shape: bf16[2,64,32], index: 1, kind: input, shape index: {}]   ;;  %s1278_s2 = inlined_call_operand.hbm [shape: f32[2,1,32], index: 2, kind: input, shape index: {}]   ;;  %s1279_s3 = inlined_call_operand.hbm [shape: f32[2,16,32], index: 3, kind: output, shape index: {}]  }
   0x1   :  { %1296 = sst [smem:[#allocation20_spill]] %s1277_s1 }
   0x2   :  { %1297 = sst [smem:[#allocation21_spill]] %s1279_s3 }
   0x3   :  { %8 = vsyncpa [#allocation3], 0 }
   0x4   :  { %10 = vsyncpa [#allocation3 + $0x1], 0 }
   0x5   :  { %11 = vsyncpa [#allocation6], 0 }
   0x6   :  { %13 = vsyncpa [#allocation6 + $0x1], 0 }
   0x7   :  { %14 = vsyncpa [#allocation4], 0 }
   0x8   :  { %16 = vsyncpa [#allocation4 + $0x1], 0  ;;  %s933_s12 = smov 0   ;;  %s935_s13 = smov 0  }
   0x9   :  { %s937_s14 = smov 0   ;;  %s939_s15 = smov 0  }
   0xa   :  { %s941_s16 = smov 0   ;;  %s943_s17 = smov 0  }
   0xb   :  { %s945_s18 = smov 0   ;;  %s947_s19 = smov 0  }
   0xc   :  { %s949_s20 = smov 0   ;;  %s951_s21 = smov 0  }
   0xd   :  { %s953_s22 = smov 0  }
   0xe LB: > { %1298 = sst [smem:[#allocation12_spill]] %s887_s18  ;;  %p1281_p0 = scmp.eq.s32.totalorder %s903_s22, 0  ;;  %s903_s22 = sphi %s953_s22, %s22_s22   ;;  %s899_s21 = sphi %s951_s21, %s1335_s21   ;;  %s895_s20 = sphi %s949_s20, %s1334_s20   ;;  %s891_s19 = sphi %s947_s19, %s1333_s19   ;;  %s887_s18 = sphi %s945_s18, %s1332_s18   ;;  %s883_s17 = sphi %s943_s17, %s1341_s17   ;;  %s879_s16 = sphi %s941_s16, %s1340_s16   ;;  %s875_s15 = sphi %s939_s15, %s1339_s15   ;;  %s871_s14 = sphi %s937_s14, %s1338_s14   ;;  %s867_s13 = sphi %s935_s13, %s1337_s13   ;;  %s863_s12 = sphi %s933_s12, %s1336_s12  }
   0xf   : > { %1299 = sst [smem:[#allocation13_spill]] %s891_s19  ;;  %p85_p1 = scmp.ne.s32.totalorder %s871_s14, %s867_s13 }
  0x10   : > { %1300 = sst [smem:[#allocation14_spill]] %s895_s20  ;;  %p1280_p4 = scmp.lt.s32.totalorder %s903_s22, 4 }
  0x11   : > { %1301 = sst [smem:[#allocation15_spill]] %s899_s21  ;;  %p87_p3 = por %p85_p1, %p1281_p0 }
  0x12   : > { %s192_s23 = sand.u32 1, %s903_s22   ;;  %s1282_s24 = sand.u32 1, %s871_s14  }
  0x13   : > { %s530_s25 = sshll.u32 %s1282_s24, 5  ;;  %s549_s26 = sshll.u32 %s899_s21, 9 }
  0x14   : > { %s1302_s1 = sld [smem:[#allocation20_spill]]  ;;  %s196_s30 = scalar_lea.vmem [#allocation5], %s530_s25 }
  0x15   : > { %s203_s4 = sshll.u32 %s196_s30, 4  ;;  %p1010_p5 = pnand %p1280_p4, %p87_p3  ;;  %s1006_s4 = int_to_ptr.vmem [resolvable:$true] %s203_s4 }
  0x16   : > { %p534_p6 = scmp.ge.s32.totalorder %s903_s22, 1  ;;  %s1015_s6 = scalar_lea.sflag [#allocation6], %s192_s23 }
  0x17   : > { %p1283_p8 = pneg %p1010_p5 }
  0x1a   : > { %s1004_s29 = scalar_lea.hbm %s1302_s1, %s549_s26  ;;  %s692_s10 = scalar_lea.hbm %s1302_s1, 1024 }
  0x1b   : > { %s687_s7 = scalar_lea.hbm %s1004_s29, 512  ;;  %p693_p11 = scmp.lt.u32.totalorder %s1004_s29, %s1302_s1 }
  0x1c   : > { %p688_p7 = scmp.ne.s32.totalorder %s1004_s29, %s687_s7  ;;  %p694_p12 = scmp.lt.u32.totalorder %s692_s10, %s687_s7 }
  0x1d   : > { %p696_p1 = scmp.lt.u32.totalorder %s687_s7, %s1004_s29 }
  0x1e   : > { %p690_p9 = pnand %p1283_p8, %p688_p7  ;;  %p695_p13 = por %p694_p12, %p693_p11 }
  0x20   : > { %p691_p10 = pneg %p690_p9  ;;  %p697_p3 = por %p696_p1, %p695_p13 }
  0x22   : > { %p698_p4 = pnand %p697_p3, %p691_p10 }
  0x24   : > { %701 = shalt.err (!%p698_p4)
}
  0x25   : > { %s702_s23 = scalar_lea.vmem %s1006_s4, 512  ;;  %s905_s26 = smov [#allocation5]  }
  0x26   : > { %p703_p7 = scmp.ne.s32.totalorder %s1006_s4, %s702_s23  ;;  %s707_s27 = sshll.u32 %s905_s26, 4  ;;  %s708_s27 = int_to_ptr.vmem [resolvable:$false] %s707_s27 }
  0x27   : > { %s709_s28 = scalar_lea.vmem %s708_s27, 1024  ;;  %p710_p0 = scmp.lt.s32.totalorder %s1006_s4, %s708_s27 }
  0x28   : > { %p705_p9 = pnand %p703_p7, %p1283_p8  ;;  %p711_p11 = scmp.lt.s32.totalorder %s709_s28, %s702_s23 }
  0x2a   : > { %p706_p2 = pneg %p705_p9  ;;  %p712_p12 = por %p711_p11, %p710_p0 }
  0x2c   : > { %p713_p13 = pnand %p712_p12, %p706_p2 }
  0x2e   : > { %716 = shalt.err (!%p713_p13)
}
  0x2f   : > { %s906_s30 = smov 64   ;;  %s907_s7 = smov 4  }
  0x30   : > { %581 = dma.hbm_to_vmem [thread:$0]  (!%p1010_p5), %s1004_s29, 512, %s1006_s4, %s1015_s6, %s906_s30, %s906_s30, %s907_s7  }
  0x31   : > { %p228_p0 = scmp.lt.s32.totalorder %s903_s22, 5  ;;  %s1051_s9 = sadd.s32 4294967295, %s903_s22  }
  0x32   : > { %s524_s10 = sadd.s32 4294967294, %s903_s22   ;;  %s37_s11 = sadd.s32 1, %s895_s20 }
  0x33   : > { %p1046_p2 = pnand %p534_p6, %p228_p0  ;;  %s41_s25 = sadd.s32 1, %s899_s21 }
  0x34   : > { %p39_p4 = scmp.ge.s32.totalorder %s37_s11, 2  ;;  %s52_s29 = sadd.s32 1, %s883_s17 }
  0x35   : > { %s1304_s8 = scalar_select %p1046_p2, 1, 0 }
  0x36   : > { %p59_p6 = scmp.ne.s32.totalorder %s883_s17, %s879_s16  ;;  %p65_p10 = scmp.ne.s32.totalorder %s879_s16, %s875_s15 }
  0x37   : > { %s1343_s11 = smov (%p39_p4, %s37_s11), 0  ;;  %s1345_s25 = smov (!%p39_p4, %s41_s25), %s899_s21 }
  0x38   : > { %1305 = sst [smem:[#allocation16_spill]] %s1343_s11  ;;  %s46_s4 = ssub.s32 %s895_s20, %s1343_s11 }
  0x39   : > { %p1306_p1 = scmp.eq.s32.totalorder %s903_s22, 0  ;;  %p43_p7 = scmp.ge.s32.totalorder %s1345_s25, 2 }
  0x3a   : > { %p66_p9 = scmp.eq.s32.totalorder %s1051_s9, 0  ;;  %s78_s26 = sadd.s32 1, %s871_s14 }
  0x3b   : > { %p1071_p3 = por %p1306_p1, %p59_p6  ;;  %p145_p11 = scmp.eq.s32.totalorder %s1051_s9, 3 }
  0x3c   : > { %s1347_s25 = smov (%p43_p7, %s1345_s25), 0  ;;  %p1083_p12 = por %p66_p9, %p65_p10 }
  0x3d   : > { %1308 = sst [smem:[#allocation17_spill]] %s1347_s25  ;;  %p1310_p13 = scmp.ne.s32.totalorder %s867_s13, %s863_s12 }
  0x3e   : > { %s1309_s27 = scalar_select %p1083_p12, 1, 0 }
  0x3f   : > { %p1090_p0 = por %p1310_p13, %p66_p9  ;;  %s45_s30 = ssub.s32 %s899_s21, %s1347_s25 }
  0x40   : > { %p1099_p4 = por %p145_p11, %p59_p6  ;;  %s47_s24 = sor.u32 %s46_s4, %s45_s30 }
  0x41   : > { %s1311_s28 = scalar_select %p1090_p0, 1, 0 }
  0x42   : > { %s1313_s7 = scalar_select %p1099_p4, 1, 0 }
  0x43   : > { %1312 = sst [smem:[#allocation18_spill]] %s1311_s28  ;;  %p76_p1 = scmp.eq.s32.totalorder %s45_s30, 0 }
  0x44   : > { %1314 = sst [smem:[#allocation19_spill]] %s1313_s7  ;;  %p50_p7 = scmp.eq.s32.totalorder %s47_s24, 0 }
  0x45   : > { %p151_p8 = scmp.eq.s32.totalorder %s524_s10, 3  ;;  %s171_s25 = sand.u32 1, %s883_s17  }
  0x46   : > { %s1104_s1 = scalar_select %p76_p1, %s871_s14, %s78_s26  }
  0x47   : > { %s1107_s12 = scalar_select %p50_p7, %s883_s17, %s52_s29  }
  0x48   : > { %p1112_p9 = por %p151_p8, %p65_p10  ;;  %s527_s3 = sshll.u32 %s171_s25, 3 }
  0x49   : > { %s528_s19 = sshll.u32 %s899_s21, 1  ;;  %s175_s4 = scalar_lea.vmem [#allocation2], %s527_s3 }
  0x4a   : > { %s1315_s11 = scalar_select %p1112_p9, 1, 0 }
  0x4b   : > { %s181_s7 = sadd.s32 %s895_s20, %s528_s19  ;;  %s185_s18 = sshll.u32 %s175_s4, 4  ;;  %s1119_s18 = int_to_ptr.vmem [resolvable:$true] %s185_s18 }
  0x4c   : > { %s529_s28 = sshll.u32 %s181_s7, 7  ;;  %p1316_p6 = scmp.lt.s32.totalorder %s903_s22, 4 }
  0x4d   : > { %s1124_s26 = scalar_lea.hbm %s1276_s0, %s529_s28  ;;  %s533_s3 = sshll.u32 %s899_s21, 4 }
  0x4e   : > { %p1130_p8 = pnand %p1316_p6, %p1071_p3  ;;  %s1138_s7 = scalar_lea.hbm %s1278_s2, %s533_s3 }
  0x4f   : > { %s172_s28 = scalar_lea.sflag [#allocation3], %s171_s25  ;;  %s717_s4 = scalar_lea.hbm %s1124_s26, 128 }
  0x50   : > { %p718_p10 = scmp.ne.s32.totalorder %s1124_s26, %s717_s4  ;;  %p719_p11 = pneg %p1130_p8 }
  0x51   : > { %s722_s10 = scalar_lea.hbm %s1276_s0, 512  ;;  %p723_p1 = scmp.lt.u32.totalorder %s1124_s26, %s1276_s0 }
  0x52   : > { %p720_p13 = pnand %p719_p11, %p718_p10  ;;  %p724_p7 = scmp.lt.u32.totalorder %s722_s10, %s717_s4 }
  0x53   : > { %p726_p9 = scmp.lt.u32.totalorder %s717_s4, %s1124_s26 }
  0x54   : > { %p721_p3 = pneg %p720_p13  ;;  %p725_p6 = por %p724_p7, %p723_p1 }
  0x56   : > { %p727_p4 = por %p726_p9, %p725_p6 }
  0x58   : > { %p728_p0 = pnand %p727_p4, %p721_p3 }
  0x5a   : > { %731 = shalt.err (!%p728_p0)
}
  0x5b   : > { %s732_s25 = scalar_lea.vmem %s1119_s18, 128  ;;  %s908_s3 = smov [#allocation2]  }
  0x5c   : > { %p733_p10 = scmp.ne.s32.totalorder %s1119_s18, %s732_s25  ;;  %s737_s19 = sshll.u32 %s908_s3, 4  ;;  %s738_s19 = int_to_ptr.vmem [resolvable:$false] %s737_s19 }
  0x5d   : > { %s739_s20 = scalar_lea.vmem %s738_s19, 256  ;;  %p740_p2 = scmp.lt.s32.totalorder %s1119_s18, %s738_s19 }
  0x5e   : > { %p735_p13 = pnand %p733_p10, %p719_p11  ;;  %p741_p1 = scmp.lt.s32.totalorder %s739_s20, %s732_s25 }
  0x60   : > { %p736_p12 = pneg %p735_p13  ;;  %p742_p7 = por %p741_p1, %p740_p2 }
  0x62   : > { %p743_p9 = pnand %p742_p7, %p736_p12 }
  0x64   : > { %746 = shalt.err (!%p743_p9)
}
  0x65   : > { %578 = dma.hbm_to_vmem [thread:$0]  (!%p1130_p8), %s1124_s26, 128, %s1119_s18, %s172_s28  }
  0x66   : > { %s1318_s21 = sand.u32 1, %s871_s14   ;;  %s747_s23 = scalar_lea.hbm %s1138_s7, 16 }
  0x67   : > { %s216_s30 = scalar_lea.vmem [#allocation7], %s1318_s21  ;;  %p748_p0 = scmp.ne.s32.totalorder %s1138_s7, %s747_s23 }
  0x68   : > { %s223_s4 = sshll.u32 %s216_s30, 4  ;;  %p1319_p2 = pneg %p1010_p5  ;;  %s224_s4 = int_to_ptr.vmem [resolvable:$true] %s223_s4 }
  0x69   : > { %s752_s10 = scalar_lea.hbm %s1278_s2, 32  ;;  %p753_p11 = scmp.lt.u32.totalorder %s1138_s7, %s1278_s2 }
  0x6a   : > { %p750_p12 = pnand %p748_p0, %p1319_p2  ;;  %p754_p3 = scmp.lt.u32.totalorder %s752_s10, %s747_s23 }
  0x6b   : > { %p756_p6 = scmp.lt.u32.totalorder %s747_s23, %s1138_s7 }
  0x6c   : > { %p751_p4 = pneg %p750_p12  ;;  %p755_p8 = por %p754_p3, %p753_p11 }
  0x6e   : > { %p757_p10 = por %p756_p6, %p755_p8 }
  0x70   : > { %p758_p13 = pnand %p757_p10, %p751_p4 }
  0x72   : > { %761 = shalt.err (!%p758_p13)
}
  0x73   : > { %s762_s18 = scalar_lea.vmem %s224_s4, 16  ;;  %p1320_p7 = pmov %p1319_p2 }
  0x74   : > { %p763_p1 = scmp.ne.s32.totalorder %s224_s4, %s762_s18  ;;  %s909_s26 = smov [#allocation7]  }
  0x75   : > { %s767_s28 = sshll.u32 %s909_s26, 4  ;;  %s768_s28 = int_to_ptr.vmem [resolvable:$false] %s767_s28 }
  0x76   : > { %p765_p9 = pnand %p763_p1, %p1320_p7  ;;  %s769_s19 = scalar_lea.vmem %s768_s28, 32 }
  0x77   : > { %p770_p2 = scmp.lt.s32.totalorder %s224_s4, %s768_s28  ;;  %p771_p12 = scmp.lt.s32.totalorder %s769_s19, %s762_s18 }
  0x78   : > { %p766_p0 = pneg %p765_p9 }
  0x79   : > { %p772_p3 = por %p771_p12, %p770_p2 }
  0x7b   : > { %p773_p11 = pnand %p772_p3, %p766_p0 }
  0x7d   : > { %776 = shalt.err (!%p773_p11)
}
  0x7e   : > { %584 = dma.hbm_to_vmem [thread:$0]  (!%p1010_p5), %s1138_s7, 16, %s224_s4, %s1015_s6  }
  0x7f   : > { %p1321_p4 = scmp.ne.s32.totalorder %s1304_s8, 0 }
  0x80   : > { %s1190_s20 = sand.u32 (!%p1321_p4), 1, %s879_s16   ;;  %p1322_p8 = scmp.ne.s32.totalorder (!%p1321_p4), %s1309_s27, 0 }
  0x81   : > { %232 = sbr.rel (%p1321_p4) target bundleno = 391 (0x187), region = 32  ;;  %s535_s21 = sshll.u32 (!%p1321_p4), %s1190_s20, 3 }
  0x82   : > { %s235_s30 = scalar_lea.sflag (!%p1321_p4), [#allocation3], %s1190_s20  ;;  %s238_s23 = scalar_lea.vmem (!%p1321_p4), [#allocation2], %s535_s21 }
  0x88   : > { %850 = dma.done.wait (%p1322_p8), %s235_s30, 128  }
  0x89   : > { %852 = vsyncadd (%p1322_p8), %s235_s30, 4294967168  ;;  %s1323_s5 = sld [smem:[#allocation18_spill]]  ;;  %s243_s6 = sand.u32 1, %s1051_s9  }
  0x8a   : > { %s245_s8 = sand.u32 1, %s867_s13   ;;  %s244_s4 = scalar_lea.sflag [#allocation6], %s243_s6 }
  0x8b   : > { %s536_s7 = sshll.u32 %s245_s8, 5 }
  0x8c   : > { %s247_s29 = scalar_lea.vmem [#allocation5], %s536_s7 }
  0x8f   : > { %p1324_p5 = scmp.ne.s32.totalorder %s1323_s5, 0 }
  0x91   : > { %854 = dma.done.wait (%p1324_p5), %s244_s4, 528  }
  0x92   : > { %856 = vsyncadd (%p1324_p5), %s244_s4, 4294966768  ;;  %v910_v0 = vmov 0.0   ;;  %vm911_vm0 = vmmov 0   ;;  %s1325_s24 = sld [smem:[#allocation12_spill]]  ;;  %v683_v1 = vld [vmem:[%s247_s29] sm:$0xff]   ;;  %s1326_s27 = sld [smem:[#allocation13_spill]] }
  0x93   : > { %555 = vmatprep.subr.bf16.mxu0 %v910_v0  ;;  %563 = vmatprep.mubr.msk.bf16.mxu0 %vm911_vm0, %v910_v0  ;;  %v684_v2 = vld [vmem:[%s247_s29 + $0x8] sm:$0xff]   ;;  %v685_v3 = vld [vmem:[%s247_s29 + $0x10] sm:$0xff]   ;;  %v686_v4 = vld [vmem:[%s247_s29 + $0x18] sm:$0xff]   ;;  %vm330_vm1 = vcmask 523264   ;;  %s255_s25 = scalar_lea.vmem [#allocation7], %s245_s8  ;;  %s1327_s3 = sld [smem:[#allocation19_spill]] }
  0x94   : > { %556 = vmatpush3.bf16.msra.mxu0 %v683_v1  ;;  %v289_v5 = vld [vmem:[%s238_s23] sm:$0xff]  ;;  %s286_s26 = scalar_lea.vmem [#allocation8], %s535_s21  ;;  %vm374_vm2 = vcmask 261120   ;;  %s1328_s23 = sld [smem:[#allocation21_spill]] }
  0x95   : > { %557 = vmatprep.subr.bf16.mxu0 %v910_v0  ;;  %v290_v6 = vpack.c.bf16 %v289_v5, %v289_v5  ;;  %v538_v7 = vld [vmem:[%s255_s25] ss:$0 sm:$0xff]  ;;  %s393_s28 = sshll.u32 %s286_s26, 4  ;;  %s377_s6 = scalar_lea.sflag [#allocation4], %s1190_s20  ;;  %s1215_s28 = int_to_ptr.vmem [resolvable:$true] %s393_s28 }
  0x96   : > { %s777_s21 = scalar_lea.vmem %s1215_s28, 128  ;;  %s912_s8 = smov [#allocation8]  }
  0x97   : > { %p778_p6 = scmp.ne.s32.totalorder %s1215_s28, %s777_s21  ;;  %s781_s7 = sshll.u32 %s912_s8, 4  ;;  %s782_s7 = int_to_ptr.vmem [resolvable:$false] %s781_s7 }
  0x98   : > { %558 = vmatpush3.bf16.msra.mxu0 %v684_v2  ;;  %s545_s9 = sshll.u32 %s1325_s24, 1  ;;  %s783_s4 = scalar_lea.vmem %s782_s7, 256 }
  0x99   : > { %559 = vmatprep.subr.bf16.mxu0 %v910_v0  ;;  %s389_s10 = sadd.s32 %s1326_s27, %s545_s9  ;;  %p1329_p10 = scmp.ne.s32.totalorder %s1327_s3, 0 }
  0x9a   : > { %s546_s18 = sshll.u32 %s389_s10, 7  ;;  %p784_p7 = scmp.lt.s32.totalorder %s1215_s28, %s782_s7 }
  0x9b   : > { %s1213_s5 = scalar_lea.hbm %s1328_s23, %s546_s18  ;;  %p779_p13 = pnand %p778_p6, %p1329_p10 }
  0x9c   : > { %560 = vmatpush3.bf16.msra.mxu0 %v685_v3  ;;  %p785_p9 = scmp.lt.s32.totalorder %s783_s4, %s777_s21 }
  0x9d   : > { %561 = vmatprep.subr.bf16.mxu0 %v910_v0  ;;  %p780_p1 = pneg %p779_p13 }
  0x9e   : > { %p786_p0 = por %p785_p9, %p784_p7 }
  0xa0   : > { %562 = vmatpush3.bf16.msra.mxu0 %v686_v4  ;;  %p787_p2 = pnand %p786_p0, %p780_p1 }
  0xa3   : > { %564 = vmatmul.mubr.msk.bf16.vlgmr.msra.gmra.mrb[0].mxu0 %vm330_vm1, %v290_v6 }
 0x176   : > { %v368_v8 = vpop.f32.mrb[0].mxu0 }
 0x177   : > { %v369_v9 = vadd.f32 %v538_v7, %v368_v8  ;;  %v565_v10 = vpop.f32.mrb[1].mxu0 }
 0x178   : > { %v371_v11 = vpop.f32.mrb[2].mxu0 }
 0x179   : > { %v566_v12 = vpop.f32.mrb[3].mxu0  ;;  %375 = vst.msk [vmem:[%s286_s26] sm:$0xff] %vm374_vm2, %v369_v9 }
 0x17a   : > { %790 = shalt.err (!%p787_p2)
}
 0x17b   : > { %s791_s20 = scalar_lea.hbm %s1213_s5, 128  ;;  %s795_s27 = scalar_lea.hbm %s1328_s23, 512 }
 0x17c   : > { %p792_p12 = scmp.ne.s32.totalorder %s1213_s5, %s791_s20  ;;  %p796_p4 = scmp.lt.u32.totalorder %s1213_s5, %s1328_s23 }
 0x17d   : > { %p797_p8 = scmp.lt.u32.totalorder %s795_s27, %s791_s20  ;;  %p799_p6 = scmp.lt.u32.totalorder %s791_s20, %s1213_s5 }
 0x17e   : > { %p793_p3 = pnand %p792_p12, %p1329_p10 }
 0x17f   : > { %p798_p5 = por %p797_p8, %p796_p4 }
 0x180   : > { %p794_p11 = pneg %p793_p3 }
 0x181   : > { %p800_p13 = por %p799_p6, %p798_p5 }
 0x183   : > { %p801_p1 = pnand %p800_p13, %p794_p11 }
 0x185   : > { %804 = shalt.err (!%p801_p1)
}
 0x186   : > { %573 = dma.vmem_to_hbm [thread:$0]  (%p1329_p10), %s1215_s28, 128, %s1213_s5, %s377_s6  }
 0x187 PF: > { %p590_p7 = scmp.ge.s32.totalorder %s903_s22, 2  ;;  %s405_s25 = sand.u32 1, %s875_s15  }
 0x188   : > { %p1330_p9 = scmp.ne.s32.totalorder %s1315_s11, 0  ;;  %s406_s18 = scalar_lea.sflag [#allocation4], %s405_s25 }
 0x18a   : > { %p586_p0 = pnand %p590_p7, %p1330_p9 }
 0x18c   : > { %858 = dma.done.wait (!%p586_p0), %s406_s18, 128  }
 0x18d   : > { %860 = vsyncadd (!%p586_p0), %s406_s18, 4294967168  ;;  %s22_s22 = sadd.s32 1, %s903_s22   ;;  %s1331_s3 = smov %s1107_s12 }
 0x18e   : > { %p19_p2 = scmp.ge.s32.totalorder %s22_s22, 6   ;;  %s1332_s18 = sld [smem:[#allocation14_spill]] }
 0x18f   : > { %s1333_s19 = sld [smem:[#allocation15_spill]]  ;;  %s1334_s20 = sld [smem:[#allocation16_spill]] }
 0x190   : > { %s1335_s21 = sld [smem:[#allocation17_spill]]  ;;  %s1336_s12 = smov %s867_s13 }
 0x191   : > { %s1337_s13 = smov %s871_s14  ;;  %s1338_s14 = smov %s1104_s1 }
 0x192   : > { %s1339_s15 = smov %s879_s16  ;;  %s1340_s16 = smov %s883_s17 }
 0x193   : > { %s1341_s17 = smov %s1331_s3  ;;  %21 = sbr.rel (!%p19_p2) target bundleno = 14 (0xe), region = 101 }
 0x19a   :  { %411 = vsyncpa [#allocation3], 1 }
 0x19b   :  { %413 = vsyncpa [#allocation3 + $0x1], 1 }
 0x19c   :  { %414 = vsyncpa [#allocation6], 1 }
 0x19d   :  { %416 = vsyncpa [#allocation6 + $0x1], 1 }
 0x19e   :  { %417 = vsyncpa [#allocation4], 1 }
 0x19f   :  { %419 = vsyncpa [#allocation4 + $0x1], 1 }

// kernel: vit_encoder_forward.15
= control target key start
LH: loop header
LB: loop body
LE: loop exit
PB: predicated region body
PF: predicated region fallthrough
CT: control target
= control target key end

     0   :  { %s1278_s0 = inlined_call_operand.hbm [shape: bf16[4,48,8], index: 0, kind: input, shape index: {}]   ;;  %s1279_s1 = inlined_call_operand.hbm [shape: bf16[4,8,32], index: 1, kind: input, shape index: {}]   ;;  %s1280_s2 = inlined_call_operand.hbm [shape: f32[1,32], index: 2, kind: input, shape index: {}]   ;;  %s1281_s3 = inlined_call_operand.hbm [shape: f32[48,32], index: 3, kind: input, shape index: {}]   ;;  %s1282_s4 = inlined_call_operand.hbm [shape: f32[48,32], index: 4, kind: output, shape index: {}]  }
   0x1   :  { %1287 = sst [smem:[#allocation17_spill]] %s1278_s0 }
   0x2   :  { %9 = vsyncpa [#allocation4], 0 }
   0x3   :  { %11 = vsyncpa [#allocation4 + $0x1], 0 }
   0x4   :  { %12 = vsyncpa [#allocation7], 0 }
   0x5   :  { %14 = vsyncpa [#allocation7 + $0x1], 0 }
   0x6   :  { %15 = vsyncpa [#allocation10], 0 }
   0x7   :  { %16 = vsyncpa [#allocation5], 0  ;;  %s1015_s15 = smov 0   ;;  %s1017_s16 = smov 0  }
   0x8   :  { %s1019_s17 = smov 0   ;;  %s1021_s18 = smov 0  }
   0x9   :  { %s1023_s19 = smov 0   ;;  %s1025_s20 = smov 0  }
   0xa LB: > { %s1044_s21 = sadd.s32 4294967295, %s974_s20   ;;  %s50_s22 = sadd.s32 1, %s962_s17  ;;  %s974_s20 = sphi %s1025_s20, %s22_s20   ;;  %s970_s19 = sphi %s1023_s19, %s1305_s19   ;;  %s966_s18 = sphi %s1021_s18, %s1304_s18   ;;  %s962_s17 = sphi %s1019_s17, %s1303_s17   ;;  %s958_s16 = sphi %s1017_s16, %s1302_s16   ;;  %s954_s15 = sphi %s1015_s15, %s1301_s15  }
   0xb   : > { %p57_p0 = scmp.ne.s32.totalorder %s962_s17, %s958_s16  ;;  %p58_p1 = scmp.eq.s32.totalorder %s974_s20, 0 }
   0xc   : > { %p63_p2 = scmp.ne.s32.totalorder %s958_s16, %s954_s15  ;;  %p1283_p3 = scmp.eq.s32.totalorder %s1044_s21, 0 }
   0xd   : > { %p59_p4 = por %p58_p1, %p57_p0  ;;  %p619_p5 = scmp.ge.s32.totalorder %s974_s20, 1 }
   0xe   : > { %p1055_p6 = por %p1283_p3, %p63_p2  ;;  %p184_p7 = scmp.lt.s32.totalorder %s974_s20, 5 }
   0xf   : > { %s976_s25 = smov [#allocation8]   ;;  %p698_p10 = scmp.lt.s32.totalorder %s974_s20, 4 }
  0x10   : > { %s1288_s23 = scalar_select %p1055_p6, 1, 0 }
  0x11   : > { %p1060_p8 = pnand %p619_p5, %p184_p7  ;;  %s199_s26 = sshll.u32 %s976_s25, 4  ;;  %s200_s26 = int_to_ptr.vmem [resolvable:$true] %s199_s26 }
  0x12   : > { %p1073_p12 = pnand %p698_p10, %p59_p4  ;;  %s977_s29 = smov [#allocation9]  }
  0x13   : > { %s1289_s24 = scalar_select %p1060_p8, 1, 0 }
  0x14   : > { %p682_p9 = pneg %p1060_p8  ;;  %s213_s30 = sshll.u32 %s977_s29, 4  ;;  %s214_s30 = int_to_ptr.vmem [resolvable:$true] %s213_s30 }
  0x15   : > { %s1291_s28 = scalar_select %p1073_p12, 1, 0 }
  0x16   : > { %p1069_p11 = pnand %p682_p9, %p1283_p3  ;;  %s766_s7 = scalar_lea.hbm %s1280_s2, 16 }
  0x17   : > { %p767_p13 = scmp.ne.s32.totalorder %s1280_s2, %s766_s7  ;;  %p773_p4 = scmp.lt.u32.totalorder %s766_s7, %s1280_s2 }
  0x18   : > { %p768_p0 = pneg %p1069_p11 }
  0x1a   : > { %p769_p1 = pnand %p768_p0, %p767_p13 }
  0x1c   : > { %p770_p2 = pneg %p769_p1 }
  0x1e   : > { %p775_p5 = pnand %p773_p4, %p770_p2 }
  0x20   : > { %778 = shalt.err (!%p775_p5)
}
  0x21   : > { %s779_s12 = scalar_lea.vmem %s200_s26, 16  ;;  %s786_s13 = scalar_lea.vmem %s200_s26, 32 }
  0x22   : > { %p780_p7 = scmp.ne.s32.totalorder %s200_s26, %s779_s12  ;;  %p787_p3 = scmp.lt.s32.totalorder %s200_s26, %s200_s26 }
  0x23   : > { %p788_p6 = scmp.lt.s32.totalorder %s786_s13, %s779_s12 }
  0x24   : > { %p782_p9 = pnand %p780_p7, %p768_p0 }
  0x25   : > { %p789_p8 = por %p788_p6, %p787_p3 }
  0x26   : > { %p783_p10 = pneg %p782_p9 }
  0x28   : > { %p790_p12 = pnand %p789_p8, %p783_p10 }
  0x2a   : > { %793 = shalt.err (!%p790_p12)
}
  0x2b   : > { %685 = dma.hbm_to_vmem [thread:$0]  (!%p1069_p11), %s1280_s2, 16, %s200_s26, [#allocation7]  }
  0x2c   : > { %s794_s5 = scalar_lea.hbm %s1281_s3, 768 }
  0x2d   : > { %p795_p13 = scmp.ne.s32.totalorder %s1281_s3, %s794_s5  ;;  %p801_p8 = scmp.lt.u32.totalorder %s794_s5, %s1281_s3 }
  0x2f   : > { %p797_p3 = pnand %p795_p13, %p768_p0 }
  0x31   : > { %p798_p6 = pneg %p797_p3 }
  0x33   : > { %p803_p12 = pnand %p801_p8, %p798_p6 }
  0x35   : > { %806 = shalt.err (!%p803_p12)
}
  0x36   : > { %s807_s26 = scalar_lea.vmem %s214_s30, 768  ;;  %p815_p5 = scmp.lt.s32.totalorder %s214_s30, %s214_s30 }
  0x37   : > { %p808_p1 = scmp.ne.s32.totalorder %s214_s30, %s807_s26  ;;  %p816_p7 = scmp.lt.s32.totalorder %s807_s26, %s807_s26 }
  0x39   : > { %p810_p2 = pnand %p808_p1, %p768_p0  ;;  %p817_p9 = por %p816_p7, %p815_p5 }
  0x3b   : > { %p811_p4 = pneg %p810_p2 }
  0x3d   : > { %p818_p10 = pnand %p817_p9, %p811_p4 }
  0x3f   : > { %821 = shalt.err (!%p818_p10)
}
  0x40   : > { %s978_s10 = smov 128   ;;  %s979_s11 = smov 8  }
  0x41   : > { %688 = dma.hbm_to_vmem [thread:$0]  (!%p1069_p11), %s1281_s3, 768, %s214_s30, [#allocation10], %s978_s10, %s978_s10, %s979_s11  }
  0x42   : > { %s1120_s14 = sand.u32 1, %s962_s17   ;;  %s34_s15 = sadd.s32 1, %s970_s19 }
  0x43   : > { %p35_p0 = scmp.ge.s32.totalorder %s34_s15, 4  ;;  %s663_s25 = smul.u32 24, %s1120_s14 }
  0x44   : > { %s664_s29 = smul.u32 384, %s970_s19  ;;  %s1292_s0 = sld [smem:[#allocation17_spill]] }
  0x45   : > { %s1307_s15 = smov (%p35_p0, %s34_s15), 0  ;;  %s231_s7 = scalar_lea.vmem [#allocation3], %s663_s25 }
  0x46   : > { %s45_s30 = ssub.s32 %s970_s19, %s1307_s15  ;;  %s240_s8 = sshll.u32 %s231_s7, 4  ;;  %s1134_s8 = int_to_ptr.vmem [resolvable:$true] %s240_s8 }
  0x47   : > { %p48_p11 = scmp.eq.s32.totalorder %s45_s30, 0  ;;  %s250_s9 = sand.u32 1, %s974_s20  }
  0x48   : > { %s228_s10 = scalar_lea.sflag [#allocation4], %s1120_s14  ;;  %p1293_p3 = scmp.ne.s32.totalorder %s1291_s28, 0 }
  0x49   : > { %s1140_s26 = scalar_select %p48_p11, %s962_s17, %s50_s22  }
  0x4a   : > { %s1130_s27 = scalar_lea.hbm %s1292_s0, %s664_s29  ;;  %p824_p6 = pneg %p1293_p3 }
  0x4b   : > { %s822_s11 = scalar_lea.hbm %s1130_s27, 384  ;;  %s827_s25 = scalar_lea.hbm %s1292_s0, 1536 }
  0x4c   : > { %p823_p13 = scmp.ne.s32.totalorder %s1130_s27, %s822_s11  ;;  %p828_p1 = scmp.lt.u32.totalorder %s1130_s27, %s1292_s0 }
  0x4d   : > { %p829_p2 = scmp.lt.u32.totalorder %s827_s25, %s822_s11  ;;  %p831_p5 = scmp.lt.u32.totalorder %s822_s11, %s1130_s27 }
  0x4e   : > { %p825_p8 = pnand %p824_p6, %p823_p13 }
  0x4f   : > { %p830_p4 = por %p829_p2, %p828_p1 }
  0x50   : > { %p826_p12 = pneg %p825_p8 }
  0x51   : > { %p832_p7 = por %p831_p5, %p830_p4 }
  0x53   : > { %p833_p9 = pnand %p832_p7, %p826_p12 }
  0x55   : > { %836 = shalt.err (!%p833_p9)
}
  0x56   : > { %s837_s22 = scalar_lea.vmem %s1134_s8, 384  ;;  %s980_s6 = smov [#allocation3]  }
  0x57   : > { %p838_p10 = scmp.ne.s32.totalorder %s1134_s8, %s837_s22  ;;  %s842_s30 = sshll.u32 %s980_s6, 4  ;;  %s843_s30 = int_to_ptr.vmem [resolvable:$false] %s842_s30 }
  0x58   : > { %s844_s7 = scalar_lea.vmem %s843_s30, 768  ;;  %p845_p13 = scmp.lt.s32.totalorder %s1134_s8, %s843_s30 }
  0x59   : > { %p840_p0 = pnand %p838_p10, %p824_p6  ;;  %p846_p8 = scmp.lt.s32.totalorder %s844_s7, %s837_s22 }
  0x5b   : > { %p841_p11 = pneg %p840_p0  ;;  %p847_p1 = por %p846_p8, %p845_p13 }
  0x5d   : > { %p848_p2 = pnand %p847_p1, %p841_p11 }
  0x5f   : > { %851 = shalt.err (!%p848_p2)
}
  0x60   : > { %s981_s11 = smov 64   ;;  %s982_s12 = smov 4  }
  0x61   : > { %692 = dma.hbm_to_vmem [thread:$0]  (!%p1293_p3), %s1130_s27, 384, %s1134_s8, %s228_s10, %s981_s11, %s981_s11, %s982_s12  }
  0x62   : > { %s624_s13 = sshll.u32 %s1120_s14, 2  ;;  %s625_s25 = sshll.u32 %s970_s19, 6 }
  0x63   : > { %s1175_s22 = scalar_lea.hbm %s1279_s1, %s625_s25  ;;  %s254_s6 = scalar_lea.vmem [#allocation6], %s624_s13 }
  0x64   : > { %s262_s30 = sshll.u32 %s254_s6, 4  ;;  %s251_s7 = scalar_lea.sflag [#allocation7], %s250_s9  ;;  %s263_s30 = int_to_ptr.vmem [resolvable:$true] %s262_s30 }
  0x65   : > { %s852_s0 = scalar_lea.hbm %s1175_s22, 64  ;;  %s857_s8 = scalar_lea.hbm %s1279_s1, 256 }
  0x66   : > { %p853_p12 = scmp.ne.s32.totalorder %s1175_s22, %s852_s0  ;;  %p858_p7 = scmp.lt.u32.totalorder %s1175_s22, %s1279_s1 }
  0x67   : > { %p859_p9 = scmp.lt.u32.totalorder %s857_s8, %s852_s0  ;;  %p861_p0 = scmp.lt.u32.totalorder %s852_s0, %s1175_s22 }
  0x68   : > { %p855_p4 = pnand %p853_p12, %p824_p6 }
  0x69   : > { %p860_p10 = por %p859_p9, %p858_p7 }
  0x6a   : > { %p856_p5 = pneg %p855_p4 }
  0x6b   : > { %p862_p11 = por %p861_p0, %p860_p10 }
  0x6d   : > { %p863_p13 = pnand %p862_p11, %p856_p5 }
  0x6f   : > { %866 = shalt.err (!%p863_p13)
}
  0x70   : > { %s867_s9 = scalar_lea.vmem %s263_s30, 64  ;;  %s983_s12 = smov [#allocation6]  }
  0x71   : > { %p868_p8 = scmp.ne.s32.totalorder %s263_s30, %s867_s9  ;;  %s872_s13 = sshll.u32 %s983_s12, 4  ;;  %s873_s13 = int_to_ptr.vmem [resolvable:$false] %s872_s13 }
  0x72   : > { %s874_s25 = scalar_lea.vmem %s873_s13, 128  ;;  %p875_p12 = scmp.lt.s32.totalorder %s263_s30, %s873_s13 }
  0x73   : > { %p870_p1 = pnand %p868_p8, %p824_p6  ;;  %p876_p4 = scmp.lt.s32.totalorder %s874_s25, %s867_s9 }
  0x75   : > { %p871_p2 = pneg %p870_p1  ;;  %p877_p7 = por %p876_p4, %p875_p12 }
  0x77   : > { %p878_p9 = pnand %p877_p7, %p871_p2 }
  0x79   : > { %881 = shalt.err (!%p878_p9)
}
  0x7a   : > { %695 = dma.hbm_to_vmem [thread:$0]  (!%p1293_p3), %s1175_s22, 64, %s263_s30, %s251_s7  }
  0x7b   : > { %p1294_p5 = scmp.ne.s32.totalorder %s1289_s24, 0 }
  0x7c   : > { %s273_s0 = sand.u32 (!%p1294_p5), 1, %s958_s16   ;;  %p1295_p6 = scmp.ne.s32.totalorder (!%p1294_p5), %s1288_s23, 0 }
  0x7d   : > { %271 = sbr.rel (%p1294_p5) target bundleno = 419 (0x1a3), region = 36  ;;  %s274_s5 = scalar_lea.sflag (!%p1294_p5), [#allocation4], %s273_s0 }
  0x7e   : > { %s665_s29 = smul.u32 (!%p1294_p5), 24, %s273_s0 }
  0x80   : > { %s1201_s6 = scalar_lea.vmem (!%p1294_p5), [#allocation3], %s665_s29 }
  0x84   : > { %933 = dma.done.wait (%p1295_p6), %s274_s5, 384  }
  0x85   : > { %935 = vsyncadd (%p1295_p6), %s274_s5, 4294966912  ;;  %s282_s28 = sand.u32 1, %s1044_s21   ;;  %s627_s14 = sshll.u32 %s273_s0, 2 }
  0x86   : > { %s283_s22 = scalar_lea.sflag [#allocation7], %s282_s28  ;;  %s286_s30 = scalar_lea.vmem [#allocation6], %s627_s14 }
  0x87   : > { %937 = dma.done.wait (%p1295_p6), %s283_s22, 64  }
  0x88   : > { %939 = vsyncadd (%p1295_p6), %s283_s22, 4294967232  ;;  %p1296_p3 = scmp.eq.s32.totalorder %s1044_s21, 0 }
  0x8a   : > { %941 = dma.done.wait (%p1296_p3), [#allocation7], 16   ;;  %p1297_p10 = pmov %p1296_p3 }
  0x8b   : > { %p1298_p0 = pmov %p1296_p3 }
  0x8c   : > { %943 = vsyncadd (%p1297_p10), [#allocation7], 4294967280 }
  0x8d   : > { %945 = dma.done.wait (%p1298_p0), [#allocation10], 768   ;;  %p1299_p11 = pmov %p1298_p0 }
  0x8e   : > { %p630_p13 = scmp.ne.s32.totalorder %s966_s18, 0 }
  0x8f   : > { %947 = vsyncadd (%p1299_p11), [#allocation10], 4294966528  ;;  %vm327_vm0 = vcmask (!%p630_p13), 261120   ;;  %v984_v0 = vmov (!%p630_p13), 0.0  }
  0x90   : > { %326 = sbr.rel (%p630_p13) target bundleno = 151 (0x97), region = 56  ;;  %328 = vst.msk [vmem:[#allocation2] sm:$0xff] (!%p630_p13), %vm327_vm0, %v984_v0  ;;  %329 = vst.msk [vmem:[#allocation2 + $0x8] sm:$0xff] (!%p630_p13), %vm327_vm0, %v984_v0 }
  0x91   : > { %330 = vst.msk [vmem:[#allocation2 + $0x10] sm:$0xff] (!%p630_p13), %vm327_vm0, %v984_v0  ;;  %331 = vst.msk [vmem:[#allocation2 + $0x18] sm:$0xff] (!%p630_p13), %vm327_vm0, %v984_v0 }
  0x92   : > { %332 = vst.msk [vmem:[#allocation2 + $0x20] sm:$0xff] (!%p630_p13), %vm327_vm0, %v984_v0  ;;  %333 = vst.msk [vmem:[#allocation2 + $0x28] sm:$0xff] (!%p630_p13), %vm327_vm0, %v984_v0 }
  0x97 PF: > { %v346_v1 = vld [vmem:[%s286_s30] sm:$0xf]  ;;  %vm372_vm1 = vcmask 1043456   ;;  %v985_v2 = vmov 0.0   ;;  %vm986_vm2 = vmmov 0   ;;  %v763_v4 = vld [vmem:[%s1201_s6 + $0x8] sm:$0xff]  }
  0x98   : > { %661 = vmatprep.subr.bf16.mxu1 %v985_v2  ;;  %v374_v3 = vsel %vm372_vm1, %v346_v1, 0  ;;  %653 = vmatprep.mubr.msk.bf16.mxu1 %vm986_vm2, %v985_v2  ;;  %vm362_vm3 = vcmask 64512   ;;  %v764_v5 = vld [vmem:[%s1201_s6] sm:$0xff]   ;;  %v765_v6 = vld [vmem:[%s1201_s6 + $0x10] sm:$0xff]   ;;  %vm439_vm4 = vcmask 261120   ;;  %p637_p8 = scmp.ne.s32.totalorder %s966_s18, 3 }
  0x99   : > { %662 = vmatpush3.bf16.msra.mxu1 %v374_v3  ;;  %647 = vmatprep.subr.bf16.mxu0 %v985_v2  ;;  %v336_v7 = vld [vmem:[#allocation2 + $0x10] sm:$0xff]  ;;  %v334_v8 = vld [vmem:[#allocation2] sm:$0xff]  ;;  %v337_v10 = vld [vmem:[#allocation2 + $0x18] sm:$0xff] }
  0x9a   : > { %648 = vmatpush3.bf16.msra.mxu0 %v374_v3  ;;  %649 = vmatprep.mubr.msk.bf16.mxu0 %vm986_vm2, %v985_v2  ;;  %v335_v14 = vld [vmem:[#allocation2 + $0x8] sm:$0xff]  ;;  %v338_v23 = vld [vmem:[#allocation2 + $0x20] sm:$0xff]  ;;  %v470_v36 = vld [vmem:[#allocation9 + $0x8] sm:$0xff] (!%p637_p8) }
  0x9b   : > { %v339_v25 = vld [vmem:[#allocation2 + $0x28] sm:$0xff]  ;;  %v471_v40 = vld [vmem:[#allocation9 + $0x10] sm:$0xff] (!%p637_p8)  ;;  %v474_v52 = vld [vmem:[#allocation9 + $0x28] sm:$0xff] (!%p637_p8) }
  0x9c   : > { %654 = vmatmul.mubr.msk.bf16.vlgmr.msra.gmra.mrb[0].mxu1 %vm362_vm3, %v763_v4  ;;  %v638_v32 = vld [vmem:[#allocation8] ss:$0 sm:$0xff] (!%p637_p8)  ;;  %v469_v33 = vld [vmem:[#allocation9] sm:$0xff] (!%p637_p8) }
  0x9d   : > { %650 = vmatmul.mubr.msk.bf16.vlgmr.msra.gmra.mrb[0].mxu0 %vm362_vm3, %v764_v5  ;;  %657 = vmatprep.mubr.msk.bf16.mxu1 %vm986_vm2, %v985_v2  ;;  %v472_v42 = vld [vmem:[#allocation9 + $0x18] sm:$0xff] (!%p637_p8)  ;;  %v473_v46 = vld [vmem:[#allocation9 + $0x20] sm:$0xff] (!%p637_p8) }
  0xa4   : > { %658 = vmatmul.mubr.msk.bf16.gmra.mrb[4].mxu1 %vm362_vm3, %v765_v6 }
 0x16f   : > { %v418_v9 = vpop.f32.mrb[0].mxu1 }
 0x170   : > { %v435_v11 = vadd.f32 %v418_v9, %v336_v7  ;;  %v655_v12 = vpop.f32.mrb[1].mxu1  ;;  %v410_v13 = vpop.f32.mrb[0].mxu0 }
 0x171   : > { %v421_v15 = vpop.f32.mrb[2].mxu1  ;;  %v433_v16 = vadd.f32 %v410_v13, %v334_v8  ;;  %v651_v17 = vpop.f32.mrb[1].mxu0 }
 0x172   : > { %442 = vst.msk [vmem:[#allocation2 + $0x10] sm:$0xff] %vm439_vm4, %v435_v11  ;;  %v436_v18 = vadd.f32 %v421_v15, %v337_v10  ;;  %v656_v19 = vpop.f32.mrb[3].mxu1  ;;  %v413_v20 = vpop.f32.mrb[2].mxu0 }
 0x173   : > { %440 = vst.msk [vmem:[#allocation2] sm:$0xff] %vm439_vm4, %v433_v16  ;;  %v434_v21 = vadd.f32 %v413_v20, %v335_v14  ;;  %v652_v22 = vpop.f32.mrb[3].mxu0 }
 0x174   : > { %443 = vst.msk [vmem:[#allocation2 + $0x18] sm:$0xff] %vm439_vm4, %v436_v18 }
 0x175   : > { %441 = vst.msk [vmem:[#allocation2 + $0x8] sm:$0xff] %vm439_vm4, %v434_v21 }
 0x176   : > { %449 = sbr.rel (%p637_p8) target bundleno = 393 (0x189), region = 60 }
 0x177   : > { %v426_v24 = vpop.f32.mrb[4].mxu1 }
 0x178   : > { %v437_v26 = vadd.f32 %v426_v24, %v338_v23  ;;  %v659_v27 = vpop.f32.mrb[5].mxu1 }
 0x179   : > { %v429_v28 = vpop.f32.mrb[6].mxu1  ;;  %v452_v37 = vld [vmem:[#allocation2 + $0x10] sm:$0xff] (!%p637_p8) }
 0x17a   : > { %444 = vst.msk [vmem:[#allocation2 + $0x20] sm:$0xff] %vm439_vm4, %v437_v26  ;;  %v438_v29 = vadd.f32 %v429_v28, %v339_v25  ;;  %v660_v30 = vpop.f32.mrb[7].mxu1  ;;  %v450_v31 = vld [vmem:[#allocation2] sm:$0xff] (!%p637_p8)  ;;  %v465_v39 = vadd.f32 (!%p637_p8), %v638_v32, %v452_v37 }
 0x17b   : > { %v463_v34 = vadd.f32 (!%p637_p8), %v638_v32, %v450_v31  ;;  %v453_v41 = vld [vmem:[#allocation2 + $0x18] sm:$0xff] (!%p637_p8) }
 0x17c   : > { %445 = vst.msk [vmem:[#allocation2 + $0x28] sm:$0xff] %vm439_vm4, %v438_v29  ;;  %v451_v35 = vld [vmem:[#allocation2 + $0x8] sm:$0xff] (!%p637_p8)  ;;  %v466_v44 = vadd.f32 (!%p637_p8), %v638_v32, %v453_v41  ;;  %v477_v49 = vadd.f32 (!%p637_p8), %v471_v40, %v465_v39 }
 0x17d   : > { %v464_v38 = vadd.f32 %v638_v32, %v451_v35  ;;  %v475_v43 = vadd.f32 %v469_v33, %v463_v34 }
 0x17e   : > { %v478_v53 = vadd.f32 %v472_v42, %v466_v44  ;;  %483 = vst.msk [vmem:[#allocation11 + $0x10] sm:$0xff] %vm439_vm4, %v477_v49 }
 0x17f   : > { %v476_v48 = vadd.f32 %v470_v36, %v464_v38  ;;  %481 = vst.msk [vmem:[#allocation11] sm:$0xff] %vm439_vm4, %v475_v43 }
 0x180   : > { %484 = vst.msk [vmem:[#allocation11 + $0x18] sm:$0xff] %vm439_vm4, %v478_v53 }
 0x181   : > { %v454_v45 = vld [vmem:[#allocation2 + $0x20] sm:$0xff]  ;;  %482 = vst.msk [vmem:[#allocation11 + $0x8] sm:$0xff] %vm439_vm4, %v476_v48 }
 0x182   : > { %v467_v50 = vadd.f32 %v638_v32, %v454_v45 }
 0x183   : > { %v455_v47 = vld [vmem:[#allocation2 + $0x28] sm:$0xff] }
 0x184   : > { %v468_v51 = vadd.f32 %v638_v32, %v455_v47  ;;  %v479_v54 = vadd.f32 %v473_v46, %v467_v50 }
 0x186   : > { %v480_v55 = vadd.f32 %v474_v52, %v468_v51  ;;  %485 = vst.msk [vmem:[#allocation11 + $0x20] sm:$0xff] %vm439_vm4, %v479_v54 }
 0x188   : > { %486 = vst.msk [vmem:[#allocation11 + $0x28] sm:$0xff] %vm439_vm4, %v480_v55 }
 0x189 PF: > { %p701_p1 = scmp.eq.s32.totalorder %s1044_s21, 3  ;;  %s987_s18 = smov [#allocation11]  }
 0x18a   : > { %s497_s23 = sshll.u32 %s987_s18, 4  ;;  %s498_s23 = int_to_ptr.vmem [resolvable:$true] %s497_s23 }
 0x18b   : > { %s882_s24 = scalar_lea.vmem %s498_s23, 768  ;;  %p889_p7 = scmp.lt.s32.totalorder %s498_s23, %s498_s23 }
 0x18c   : > { %p883_p2 = scmp.ne.s32.totalorder %s498_s23, %s882_s24  ;;  %p890_p9 = scmp.lt.s32.totalorder %s882_s24, %s882_s24 }
 0x18e   : > { %p884_p12 = pnand %p883_p2, %p701_p1  ;;  %p891_p5 = por %p890_p9, %p889_p7 }
 0x190   : > { %p885_p4 = pneg %p884_p12 }
 0x192   : > { %p892_p6 = pnand %p891_p5, %p885_p4 }
 0x194   : > { %895 = shalt.err (!%p892_p6)
}
 0x195   : > { %s896_s8 = scalar_lea.hbm %s1282_s4, 768 }
 0x196   : > { %p897_p3 = scmp.ne.s32.totalorder %s1282_s4, %s896_s8  ;;  %p902_p11 = scmp.lt.u32.totalorder %s896_s8, %s1282_s4 }
 0x198   : > { %p898_p10 = pnand %p897_p3, %p701_p1 }
 0x19a   : > { %p899_p0 = pneg %p898_p10 }
 0x19c   : > { %p904_p13 = pnand %p902_p11, %p899_p0 }
 0x19e   : > { %907 = shalt.err (!%p904_p13)
}
 0x19f   : > { %s988_s13 = smov 128   ;;  %s989_s25 = smov 8  }
 0x1a0   : > { %679 = dma.vmem_to_hbm [thread:$0]  (%p701_p1), %s498_s23, 768, %s1282_s4, [#allocation5], %s988_s13, %s988_s13, %s989_s25  }
 0x1a1   : > { %949 = dma.done.wait (%p701_p1), [#allocation5], 768  }
 0x1a2   : > { %951 = vsyncadd (%p701_p1), [#allocation5], 4294966528 }
 0x1a3 PF: > { %s22_s20 = sadd.s32 1, %s974_s20   ;;  %s1300_s5 = smov %s1307_s15 }
 0x1a4   : > { %p19_p8 = scmp.ge.s32.totalorder %s22_s20, 6   ;;  %s1301_s15 = smov %s958_s16 }
 0x1a5   : > { %s1302_s16 = smov %s962_s17  ;;  %s1303_s17 = smov %s1140_s26 }
 0x1a6   : > { %s1304_s18 = smov %s970_s19  ;;  %s1305_s19 = smov %s1300_s5 }
 0x1a7   :  { %21 = sbr.rel (!%p19_p8) target bundleno = 10 (0xa), region = 105 }
 0x1ae   :  { %513 = vsyncpa [#allocation4], 1 }
 0x1af   :  { %515 = vsyncpa [#allocation4 + $0x1], 1 }
 0x1b0   :  { %516 = vsyncpa [#allocation7], 1 }
 0x1b1   :  { %518 = vsyncpa [#allocation7 + $0x1], 1 }
 0x1b2   :  { %519 = vsyncpa [#allocation10], 1 }
 0x1b3   :  { %520 = vsyncpa [#allocation5], 1 }
 0x1b4   :  { %522 = vsyncpa [#allocation5 + $0x1], 1 }

// kernel: vit_encoder_forward.13
= control target key start
LH: loop header
LB: loop body
LE: loop exit
PB: predicated region body
PF: predicated region fallthrough
CT: control target
= control target key end

     0   :  { %s1541_s0 = inlined_call_operand.hbm [shape: f32[48,32], index: 0, kind: input, shape index: {}]   ;;  %s1542_s1 = inlined_call_operand.hbm [shape: bf16[12,32,8], index: 1, kind: input, shape index: {}]   ;;  %s1543_s2 = inlined_call_operand.hbm [shape: f32[12,1,8], index: 2, kind: input, shape index: {}]   ;;  %s1544_s3 = inlined_call_operand.hbm [shape: f32[1,32], index: 3, kind: input, shape index: {}]   ;;  %s1545_s4 = inlined_call_operand.hbm [shape: f32[1,32], index: 4, kind: input, shape index: {}]   ;;  %s1546_s5 = inlined_call_operand.hbm [shape: bf16[12,48,8], index: 5, kind: output, shape index: {}]  }
   0x1   :  { %1562 = sst [smem:[#allocation22_spill]] %s1542_s1 }
   0x2   :  { %1563 = sst [smem:[#allocation23_spill]] %s1544_s3 }
   0x3   :  { %10 = vsyncpa [#allocation4], 0 }
   0x4   :  { %11 = vsyncpa [#allocation7], 0 }
   0x5   :  { %13 = vsyncpa [#allocation7 + $0x1], 0 }
   0x6   :  { %14 = vsyncpa [#allocation10], 0 }
   0x7   :  { %15 = vsyncpa [#allocation5], 0 }
   0x8   :  { %17 = vsyncpa [#allocation5 + $0x1], 0  ;;  %s1203_s18 = smov 0   ;;  %s1205_s19 = smov 0  }
   0x9   :  { %s1207_s20 = smov 0   ;;  %s1209_s21 = smov 0  }
   0xa   :  { %s1211_s22 = smov 0   ;;  %s1213_s23 = smov 0  }
   0xb LB: > { %1564 = sst [smem:[#allocation17_spill]] %s1137_s18  ;;  %s1234_s24 = sadd.s32 4294967295, %s1157_s23   ;;  %s1157_s23 = sphi %s1213_s23, %s23_s23   ;;  %s1153_s22 = sphi %s1211_s22, %s1603_s22   ;;  %s1149_s21 = sphi %s1209_s21, %s1602_s21   ;;  %s1145_s20 = sphi %s1207_s20, %s1601_s20   ;;  %s1141_s19 = sphi %s1205_s19, %s1600_s19   ;;  %s1137_s18 = sphi %s1203_s18, %s1599_s18  }
   0xc   : > { %1565 = sst [smem:[#allocation18_spill]] %s1157_s23  ;;  %s736_s25 = sadd.s32 4294967294, %s1157_s23  }
   0xd   : > { %p81_p0 = scmp.ne.s32.totalorder %s1141_s19, %s1137_s18  ;;  %p1547_p1 = scmp.eq.s32.totalorder %s1234_s24, 0 }
   0xe   : > { %p181_p3 = scmp.eq.s32.totalorder %s736_s25, 11  ;;  %p737_p5 = scmp.ge.s32.totalorder %s1157_s23, 1 }
   0xf   : > { %p1243_p4 = por %p1547_p1, %p81_p0  ;;  %p188_p7 = scmp.lt.s32.totalorder %s1157_s23, 13 }
  0x10   : > { %p1248_p6 = por %p181_p3, %p81_p0  ;;  %s1159_s29 = smov [#allocation9]  }
  0x11   : > { %s1566_s26 = scalar_select %p1243_p4, 1, 0 }
  0x12   : > { %s1567_s27 = scalar_select %p1248_p6, 1, 0 }
  0x13   : > { %p1253_p8 = pnand %p737_p5, %p188_p7  ;;  %s217_s30 = sshll.u32 %s1159_s29, 4  ;;  %s218_s30 = int_to_ptr.vmem [resolvable:$true] %s217_s30 }
  0x14   : > { %1568 = sst [smem:[#allocation19_spill]] %s1567_s27  ;;  %s32_s7 = sadd.s32 1, %s1153_s22 }
  0x15   : > { %s1569_s28 = scalar_select %p1253_p8, 1, 0 }
  0x16   : > { %p821_p9 = pneg %p1253_p8  ;;  %s68_s8 = sadd.s32 1, %s1145_s20 }
  0x17   : > { %p1267_p11 = scmp.ge.s32.totalorder %s32_s7, 12  ;;  %s1572_s3 = sld [smem:[#allocation23_spill]] }
  0x18   : > { %p1261_p10 = pnand %p821_p9, %p1547_p1 }
  0x19   : > { %s1571_s9 = scalar_select %p1267_p11, 1, 0 }
  0x1a   : > { %s1570_s6 = scalar_select %p1261_p10, 1, 0 }
  0x1b   : > { %p1279_p13 = pneg %p1261_p10 }
  0x1d   : > { %s923_s12 = scalar_lea.hbm %s1572_s3, 16 }
  0x1e   : > { %p924_p12 = scmp.ne.s32.totalorder %s1572_s3, %s923_s12  ;;  %p930_p5 = scmp.lt.u32.totalorder %s923_s12, %s1572_s3 }
  0x20   : > { %p926_p0 = pnand %p1279_p13, %p924_p12 }
  0x22   : > { %p927_p3 = pneg %p926_p0 }
  0x24   : > { %p932_p7 = pnand %p930_p5, %p927_p3 }
  0x26   : > { %935 = shalt.err (!%p932_p7)
}
  0x27   : > { %s936_s25 = scalar_lea.vmem %s218_s30, 16  ;;  %s943_s29 = scalar_lea.vmem %s218_s30, 32 }
  0x28   : > { %p937_p9 = scmp.ne.s32.totalorder %s218_s30, %s936_s25  ;;  %p944_p6 = scmp.lt.s32.totalorder %s218_s30, %s218_s30 }
  0x29   : > { %p945_p4 = scmp.lt.s32.totalorder %s943_s29, %s936_s25 }
  0x2a   : > { %p939_p1 = pnand %p937_p9, %p1279_p13 }
  0x2b   : > { %p946_p8 = por %p945_p4, %p944_p6 }
  0x2c   : > { %p940_p2 = pneg %p939_p1 }
  0x2e   : > { %p947_p11 = pnand %p946_p8, %p940_p2 }
  0x30   : > { %950 = shalt.err (!%p947_p11)
}
  0x31   : > { %827 = dma.hbm_to_vmem [thread:$0]  (!%p1261_p10), %s1572_s3, 16, %s218_s30, [#allocation10]  }
  0x32   : > { %p1574_p1 = scmp.ne.s32.totalorder %s1571_s9, 0  ;;  %p75_p2 = scmp.ne.s32.totalorder %s1145_s20, %s1141_s19 }
  0x33   : > { %p76_p4 = scmp.eq.s32.totalorder %s1157_s23, 0  ;;  %p845_p6 = scmp.lt.s32.totalorder %s1157_s23, 12 }
  0x34   : > { %s1605_s7 = smov (%p1574_p1, %s32_s7), 0  ;;  %p1576_p12 = scmp.eq.s32.totalorder %s1234_s24, 11 }
  0x35   : > { %1575 = sst [smem:[#allocation20_spill]] %s1605_s7  ;;  %s65_s12 = ssub.s32 %s1153_s22, %s1605_s7 }
  0x36   : > { %p66_p8 = scmp.eq.s32.totalorder %s65_s12, 0  ;;  %p77_p11 = por %p76_p4, %p75_p2 }
  0x37   : > { %p1307_p0 = por %p1576_p12, %p75_p2  ;;  %s239_s14 = sand.u32 1, %s1157_s23  }
  0x38   : > { %s1315_s16 = scalar_select %p66_p8, %s1145_s20, %s68_s8  }
  0x39   : > { %s1577_s13 = scalar_select %p1307_p0, 1, 0 }
  0x3a   : > { %1578 = sst [smem:[#allocation21_spill]] %s1315_s16  ;;  %s1550_s30 = sand.u32 1, %s1145_s20  }
  0x3b   : > { %s742_s9 = sshll.u32 %s1550_s30, 4  ;;  %s769_s17 = sshll.u32 %s1153_s22, 8 }
  0x3c   : > { %s1579_s1 = sld [smem:[#allocation22_spill]]  ;;  %s243_s11 = scalar_lea.vmem [#allocation6], %s742_s9 }
  0x3d   : > { %s250_s12 = sshll.u32 %s243_s11, 4  ;;  %p1326_p3 = pnand %p845_p6, %p77_p11  ;;  %s1330_s12 = int_to_ptr.vmem [resolvable:$true] %s250_s12 }
  0x3e   : > { %s1332_s8 = scalar_lea.sflag [#allocation7], %s239_s14 }
  0x3f   : > { %s1580_s3 = scalar_select %p1326_p3, 1, 0 }
  0x40   : > { %p1556_p7 = pneg %p1326_p3 }
  0x42   : > { %s1324_s10 = scalar_lea.hbm %s1579_s1, %s769_s17  ;;  %s956_s25 = scalar_lea.hbm %s1579_s1, 3072 }
  0x43   : > { %s951_s30 = scalar_lea.hbm %s1324_s10, 256  ;;  %p957_p2 = scmp.lt.u32.totalorder %s1324_s10, %s1579_s1 }
  0x44   : > { %p952_p5 = scmp.ne.s32.totalorder %s1324_s10, %s951_s30  ;;  %p958_p4 = scmp.lt.u32.totalorder %s956_s25, %s951_s30 }
  0x45   : > { %p960_p8 = scmp.lt.u32.totalorder %s951_s30, %s1324_s10 }
  0x46   : > { %p954_p9 = pnand %p1556_p7, %p952_p5  ;;  %p959_p6 = por %p958_p4, %p957_p2 }
  0x48   : > { %p955_p1 = pneg %p954_p9  ;;  %p961_p11 = por %p960_p8, %p959_p6 }
  0x4a   : > { %p962_p12 = pnand %p961_p11, %p955_p1 }
  0x4c   : > { %965 = shalt.err (!%p962_p12)
}
  0x4d   : > { %s966_s14 = scalar_lea.vmem %s1330_s12, 256  ;;  %s1160_s9 = smov [#allocation6]  }
  0x4e   : > { %p967_p5 = scmp.ne.s32.totalorder %s1330_s12, %s966_s14  ;;  %s971_s17 = sshll.u32 %s1160_s9, 4  ;;  %s972_s17 = int_to_ptr.vmem [resolvable:$false] %s971_s17 }
  0x4f   : > { %s973_s29 = scalar_lea.vmem %s972_s17, 512  ;;  %p974_p10 = scmp.lt.s32.totalorder %s1330_s12, %s972_s17 }
  0x50   : > { %p969_p9 = pnand %p967_p5, %p1556_p7  ;;  %p975_p2 = scmp.lt.s32.totalorder %s973_s29, %s966_s14 }
  0x52   : > { %p970_p0 = pneg %p969_p9  ;;  %p976_p4 = por %p975_p2, %p974_p10 }
  0x54   : > { %p977_p6 = pnand %p976_p4, %p970_p0 }
  0x56   : > { %980 = shalt.err (!%p977_p6)
}
  0x57   : > { %s1161_s30 = smov 64   ;;  %s1162_s25 = smov 4  }
  0x58   : > { %834 = dma.hbm_to_vmem [thread:$0]  (!%p1326_p3), %s1324_s10, 256, %s1330_s12, %s1332_s8, %s1161_s30, %s1161_s30, %s1162_s25  }
  0x59   : > { %s1163_s11 = smov [#allocation3]   ;;  %s981_s17 = scalar_lea.hbm %s1541_s0, 768 }
  0x5a   : > { %s203_s1 = sshll.u32 %s1163_s11, 4  ;;  %p982_p10 = scmp.ne.s32.totalorder %s1541_s0, %s981_s17  ;;  %s204_s1 = int_to_ptr.vmem [resolvable:$true] %s203_s1 }
  0x5b   : > { %p988_p8 = scmp.lt.u32.totalorder %s981_s17, %s1541_s0 }
  0x5c   : > { %p984_p0 = pnand %p982_p10, %p1279_p13 }
  0x5e   : > { %p985_p1 = pneg %p984_p0 }
  0x60   : > { %p990_p11 = pnand %p988_p8, %p985_p1 }
  0x62   : > { %993 = shalt.err (!%p990_p11)
}
  0x63   : > { %s994_s10 = scalar_lea.vmem %s204_s1, 768  ;;  %p1002_p2 = scmp.lt.s32.totalorder %s204_s1, %s204_s1 }
  0x64   : > { %p995_p12 = scmp.ne.s32.totalorder %s204_s1, %s994_s10  ;;  %p1003_p4 = scmp.lt.s32.totalorder %s994_s10, %s994_s10 }
  0x66   : > { %p997_p5 = pnand %p995_p12, %p1279_p13  ;;  %p1004_p6 = por %p1003_p4, %p1002_p2 }
  0x68   : > { %p998_p9 = pneg %p997_p5 }
  0x6a   : > { %p1005_p7 = pnand %p1004_p6, %p998_p9 }
  0x6c   : > { %1008 = shalt.err (!%p1005_p7)
}
  0x6d   : > { %s1164_s7 = smov 128   ;;  %s1165_s12 = smov 8  }
  0x6e   : > { %p1581_p10 = scmp.ne.s32.totalorder %s1570_s6, 0  ;;  %s1166_s30 = smov [#allocation11]  }
  0x6f   : > { %s228_s25 = sshll.u32 %s1166_s30, 4  ;;  %s745_s11 = sshll.u32 %s1153_s22, 4  ;;  %s229_s25 = int_to_ptr.vmem [resolvable:$true] %s228_s25 }
  0x70   : > { %824 = dma.hbm_to_vmem [thread:$0]  (!%p1581_p10), %s1541_s0, 768, %s204_s1, [#allocation4], %s1164_s7, %s1164_s7, %s1165_s12  }
  0x71   : > { %s1009_s14 = scalar_lea.hbm %s1545_s4, 16 }
  0x72   : > { %p1010_p7 = scmp.ne.s32.totalorder %s1545_s4, %s1009_s14  ;;  %p1016_p8 = scmp.lt.u32.totalorder %s1009_s14, %s1545_s4 }
  0x74   : > { %p1012_p0 = pnand %p1010_p7, %p1279_p13 }
  0x76   : > { %p1013_p1 = pneg %p1012_p0 }
  0x78   : > { %p1018_p11 = pnand %p1016_p8, %p1013_p1 }
  0x7a   : > { %1021 = shalt.err (!%p1018_p11)
}
  0x7b   : > { %s1022_s1 = scalar_lea.vmem %s229_s25, 16  ;;  %s1029_s7 = scalar_lea.vmem %s229_s25, 32 }
  0x7c   : > { %p1023_p12 = scmp.ne.s32.totalorder %s229_s25, %s1022_s1  ;;  %p1030_p2 = scmp.lt.s32.totalorder %s229_s25, %s229_s25 }
  0x7d   : > { %p1031_p4 = scmp.lt.s32.totalorder %s1029_s7, %s1022_s1 }
  0x7e   : > { %p1025_p5 = pnand %p1023_p12, %p1279_p13 }
  0x7f   : > { %p1032_p6 = por %p1031_p4, %p1030_p2 }
  0x80   : > { %p1026_p9 = pneg %p1025_p5 }
  0x82   : > { %p1033_p3 = pnand %p1032_p6, %p1026_p9 }
  0x84   : > { %1036 = shalt.err (!%p1033_p3)
}
  0x85   : > { %830 = dma.hbm_to_vmem [thread:$0]  (!%p1581_p10), %s1545_s4, 16, %s229_s25, [#allocation10]  }
  0x86   : > { %s1400_s15 = scalar_lea.hbm %s1543_s2, %s745_s11  ;;  %s1582_s16 = sand.u32 1, %s1145_s20  }
  0x87   : > { %s263_s30 = scalar_lea.vmem [#allocation8], %s1582_s16  ;;  %s1037_s6 = scalar_lea.hbm %s1400_s15, 16 }
  0x88   : > { %s270_s9 = sshll.u32 %s263_s30, 4  ;;  %p1038_p13 = scmp.ne.s32.totalorder %s1400_s15, %s1037_s6  ;;  %s271_s9 = int_to_ptr.vmem [resolvable:$true] %s270_s9 }
  0x89   : > { %p1583_p3 = scmp.ne.s32.totalorder %s1580_s3, 0  ;;  %s1042_s14 = scalar_lea.hbm %s1543_s2, 192 }
  0x8a   : > { %p1043_p10 = scmp.lt.u32.totalorder %s1400_s15, %s1543_s2  ;;  %p1044_p8 = scmp.lt.u32.totalorder %s1042_s14, %s1037_s6 }
  0x8b   : > { %p1584_p7 = pneg %p1583_p3  ;;  %p1046_p12 = scmp.lt.u32.totalorder %s1037_s6, %s1400_s15 }
  0x8c   : > { %p1045_p11 = por %p1044_p8, %p1043_p10 }
  0x8d   : > { %p1040_p0 = pnand %p1038_p13, %p1584_p7 }
  0x8e   : > { %p1047_p5 = por %p1046_p12, %p1045_p11 }
  0x8f   : > { %p1041_p1 = pneg %p1040_p0 }
  0x91   : > { %p1048_p9 = pnand %p1047_p5, %p1041_p1 }
  0x93   : > { %1051 = shalt.err (!%p1048_p9)
}
  0x94   : > { %s1052_s10 = scalar_lea.vmem %s271_s9, 16  ;;  %p1585_p4 = pmov %p1584_p7 }
  0x95   : > { %p1053_p2 = scmp.ne.s32.totalorder %s271_s9, %s1052_s10  ;;  %s1167_s1 = smov [#allocation8]  }
  0x96   : > { %s1057_s7 = sshll.u32 %s1167_s1, 4  ;;  %s1058_s7 = int_to_ptr.vmem [resolvable:$false] %s1057_s7 }
  0x97   : > { %p1055_p6 = pnand %p1053_p2, %p1585_p4  ;;  %s1059_s12 = scalar_lea.vmem %s1058_s7, 32 }
  0x98   : > { %p1060_p7 = scmp.lt.s32.totalorder %s271_s9, %s1058_s7  ;;  %p1061_p0 = scmp.lt.s32.totalorder %s1059_s12, %s1052_s10 }
  0x99   : > { %p1056_p13 = pneg %p1055_p6 }
  0x9a   : > { %p1062_p8 = por %p1061_p0, %p1060_p7 }
  0x9c   : > { %p1063_p10 = pnand %p1062_p8, %p1056_p13 }
  0x9e   : > { %1066 = shalt.err (!%p1063_p10)
}
  0x9f   : > { %837 = dma.hbm_to_vmem [thread:$0]  (!%p1583_p3), %s1400_s15, 16, %s271_s9, %s1332_s8  }
  0xa0   : > { %p1586_p1 = scmp.ne.s32.totalorder %s1569_s28, 0 }
  0xa1   : > { %p1587_p11 = scmp.eq.s32.totalorder (!%p1586_p1), %s1234_s24, 0 }
  0xa2   : > { %279 = sbr.rel (%p1586_p1) target bundleno = 758 (0x2f6), region = 40 }
  0xa9   : > { %1120 = dma.done.wait (%p1587_p11), [#allocation4], 768   ;;  %p1588_p12 = pmov %p1587_p11 }
  0xaa   : > { %s285_s27 = sand.u32 1, %s1234_s24   ;;  %s1432_s18 = sand.u32 1, %s1141_s19  }
  0xab   : > { %1122 = vsyncadd (%p1588_p12), [#allocation4], 4294966528  ;;  %s748_s3 = sshll.u32 %s1432_s18, 4  ;;  %s286_s23 = scalar_lea.sflag [#allocation7], %s285_s27 }
  0xac   : > { %s1435_s16 = scalar_lea.vmem [#allocation6], %s748_s3  ;;  %p1589_p3 = scmp.ne.s32.totalorder %s1566_s26, 0 }
  0xae   : > { %1124 = dma.done.wait (%p1589_p3), %s286_s23, 272  }
  0xaf   : > { %1126 = vsyncadd (%p1589_p3), %s286_s23, 4294967024  ;;  %s297_s28 = scalar_lea.vmem [#allocation8], %s1432_s18  ;;  %p1590_p5 = pmov %p1587_p11 }
  0xb1   : > { %1128 = dma.done.wait (%p1590_p5), [#allocation10], 32   ;;  %p1591_p9 = pmov %p1590_p5 }
  0xb2   : > { %s801_s8 = smul.u32 24, %s1432_s18  ;;  %p751_p2 = scmp.ne.s32.totalorder %s1149_s21, 0 }
  0xb3   : > { %1130 = vsyncadd (%p1591_p9), [#allocation10], 4294967264  ;;  %v343_v0 = vld [vmem:[#allocation3] sm:$0xff] (!%p751_p2)  ;;  %vm351_vm0 = vcmask (!%p751_p2), 261120   ;;  %v345_v1 = vld [vmem:[#allocation3 + $0x10] sm:$0xff] (!%p751_p2) }
  0xb4   : > { %s1447_s15 = scalar_lea.vmem [#allocation12], %s801_s8  ;;  %342 = sbr.rel (%p751_p2) target bundleno = 508 (0x1fc), region = 64  ;;  %v344_v2 = vld [vmem:[#allocation3 + $0x8] sm:$0xff] (!%p751_p2)  ;;  %v352_v3 = vsel (!%p751_p2), %vm351_vm0, %v343_v0, 0.0  ;;  %v358_v4 = vsel (!%p751_p2), %vm351_vm0, %v345_v1, 0.0  ;;  %v346_v5 = vld [vmem:[#allocation3 + $0x18] sm:$0xff] (!%p751_p2) }
  0xb5   : > { %353 = vadd.xlane.f32.xlu0 (!%p751_p2), %v352_v3  ;;  %359 = vadd.xlane.f32.xlu1 (!%p751_p2), %v358_v4  ;;  %v355_v6 = vsel (!%p751_p2), %vm351_vm0, %v344_v2, 0.0  ;;  %v361_v7 = vsel (!%p751_p2), %vm351_vm0, %v346_v5, 0.0  ;;  %v347_v8 = vld [vmem:[#allocation3 + $0x20] sm:$0xff] (!%p751_p2)  ;;  %v348_v9 = vld [vmem:[#allocation3 + $0x28] sm:$0xff] (!%p751_p2)  ;;  %v752_v62 = vld [vmem:[#allocation9] ss:$0 sm:$0xff] (!%p751_p2) }
  0xb6   : > { %v364_v10 = vsel (!%p751_p2), %vm351_vm0, %v347_v8, 0.0  ;;  %v367_v11 = vsel (!%p751_p2), %vm351_vm0, %v348_v9, 0.0  ;;  %v753_v3 = vld [vmem:[#allocation11] ss:$0 sm:$0xff] (!%p751_p2) }
  0xb9   : > { %356 = vadd.xlane.f32.xlu0 (!%p751_p2), %v355_v6  ;;  %362 = vadd.xlane.f32.xlu1 (!%p751_p2), %v361_v7 }
  0xbd   : > { %365 = vadd.xlane.f32.xlu0 %v364_v10  ;;  %368 = vadd.xlane.f32.xlu1 %v367_v11 }
 0x142   : > { %v354_v12 = vpop.xlane.xlu0 %353  ;;  %v360_v13 = vpop.xlane.xlu1 %359 }
 0x143   : > { %v371_v14 = vmul.f32 0.03125, %v354_v12  ;;  %v373_v15 = vmul.f32 0.03125, %v360_v13 }
 0x145   : > { %v377_v16 = vsub.f32 %v343_v0, %v371_v14  ;;  %v1456_v17 = vsub.f32 %v345_v1, %v373_v15 }
 0x146   : > { %v357_v18 = vpop.xlane.xlu0 %356  ;;  %v363_v19 = vpop.xlane.xlu1 %362 }
 0x147   : > { %v372_v20 = vmul.f32 0.03125, %v357_v18  ;;  %v374_v21 = vmul.f32 0.03125, %v363_v19  ;;  %v383_v22 = vmul.f32 %v377_v16, %v377_v16  ;;  %v385_v23 = vmul.f32 %v1456_v17, %v1456_v17 }
 0x149   : > { %v378_v24 = vsub.f32 %v344_v2, %v372_v20  ;;  %v380_v25 = vsub.f32 %v346_v5, %v374_v21  ;;  %v389_v26 = vsel %vm351_vm0, %v383_v22, 0.0  ;;  %v395_v29 = vsel %vm351_vm0, %v385_v23, 0.0 }
 0x14a   : > { %390 = vadd.xlane.f32.xlu0 %v389_v26  ;;  %v366_v27 = vpop.xlane.xlu0 %365  ;;  %v369_v28 = vpop.xlane.xlu1 %368 }
 0x14b   : > { %v375_v30 = vmul.f32 0.03125, %v366_v27  ;;  %v376_v31 = vmul.f32 0.03125, %v369_v28  ;;  %v384_v32 = vmul.f32 %v378_v24, %v378_v24  ;;  %v386_v33 = vmul.f32 %v380_v25, %v380_v25 }
 0x14d   : > { %v381_v34 = vsub.f32 %v347_v8, %v375_v30  ;;  %v382_v35 = vsub.f32 %v348_v9, %v376_v31  ;;  %v392_v36 = vsel %vm351_vm0, %v384_v32, 0.0  ;;  %v398_v37 = vsel %vm351_vm0, %v386_v33, 0.0 }
 0x14e   : > { %396 = vadd.xlane.f32.xlu0 %v395_v29  ;;  %393 = vadd.xlane.f32.xlu1 %v392_v36 }
 0x14f   : > { %v387_v38 = vmul.f32 %v381_v34, %v381_v34  ;;  %v388_v39 = vmul.f32 %v382_v35, %v382_v35 }
 0x151   : > { %v401_v40 = vsel %vm351_vm0, %v387_v38, 0.0  ;;  %v404_v41 = vsel %vm351_vm0, %v388_v39, 0.0 }
 0x152   : > { %399 = vadd.xlane.f32.xlu1 %v398_v37  ;;  %402 = vadd.xlane.f32.xlu0 %v401_v40 }
 0x156   : > { %405 = vadd.xlane.f32.xlu1 %v404_v41 }
 0x1d7   : > { %v391_v42 = vpop.xlane.xlu0 %390 }
 0x1d8   : > { %v407_v43 = vmul.f32 0.03125, %v391_v42 }
 0x1da   : > { %v413_v44 = vadd.f32 1e-05, %v407_v43 }
 0x1db   : > { %v394_v45 = vpop.xlane.xlu1 %393  ;;  %v397_v46 = vpop.xlane.xlu0 %396 }
 0x1dc   : > { %909 = vrsqrt.f32 %v413_v44  ;;  %v408_v47 = vmul.f32 0.03125, %v394_v45  ;;  %v409_v48 = vmul.f32 0.03125, %v397_v46 }
 0x1de   : > { %v414_v49 = vadd.f32 1e-05, %v408_v47  ;;  %v415_v50 = vadd.f32 1e-05, %v409_v48 }
 0x1df   : > { %v400_v51 = vpop.xlane.xlu1 %399  ;;  %v403_v52 = vpop.xlane.xlu0 %402 }
 0x1e0   : > { %911 = vrsqrt.f32 %v414_v49  ;;  %v410_v53 = vmul.f32 0.03125, %v400_v51  ;;  %v411_v54 = vmul.f32 0.03125, %v403_v52 }
 0x1e1   : > { %913 = vrsqrt.f32 %v415_v50 }
 0x1e2   : > { %v416_v55 = vadd.f32 1e-05, %v410_v53  ;;  %v417_v56 = vadd.f32 1e-05, %v411_v54 }
 0x1e3   : > { %v406_v57 = vpop.xlane.xlu1 %405 }
 0x1e4   : > { %915 = vrsqrt.f32 %v416_v55  ;;  %v412_v58 = vmul.f32 0.03125, %v406_v57 }
 0x1e5   : > { %917 = vrsqrt.f32 %v417_v56 }
 0x1e6   : > { %v910_v59 = vpop.eup %909  ;;  %v418_v60 = vadd.f32 1e-05, %v412_v58 }
 0x1e7   : > { %v425_v61 = vmul.f32 %v910_v59, %v377_v16 }
 0x1e8   : > { %919 = vrsqrt.f32 %v418_v60 }
 0x1e9   : > { %v437_v1 = vmul.f32 %v752_v62, %v425_v61 }
 0x1ea   : > { %v912_v63 = vpop.eup %911 }
 0x1eb   : > { %v914_v0 = vpop.eup %913  ;;  %v426_v2 = vmul.f32 %v912_v63, %v378_v24  ;;  %v449_v8 = vadd.f32 %v753_v3, %v437_v1 }
 0x1ec   : > { %v427_v4 = vmul.f32 %v914_v0, %v1456_v17 }
 0x1ed   : > { %v438_v5 = vmul.f32 %v752_v62, %v426_v2 }
 0x1ee   : > { %v916_v6 = vpop.eup %915  ;;  %v439_v10 = vmul.f32 %v752_v62, %v427_v4 }
 0x1ef   : > { %v918_v7 = vpop.eup %917  ;;  %v450_v9 = vadd.f32 %v753_v3, %v438_v5  ;;  %v428_v11 = vmul.f32 %v916_v6, %v380_v25 }
 0x1f0   : > { %v429_v12 = vmul.f32 %v918_v7, %v381_v34  ;;  %v451_v16 = vadd.f32 %v753_v3, %v439_v10 }
 0x1f1   : > { %v455_v13 = vpack.c.bf16 %v450_v9, %v449_v8  ;;  %v440_v14 = vmul.f32 %v752_v62, %v428_v11 }
 0x1f2   : > { %v920_v15 = vpop.eup %919  ;;  %v441_v19 = vmul.f32 %v752_v62, %v429_v12 }
 0x1f3   : > { %458 = vst.msk [vmem:[#allocation2] sm:$0xff] %vm351_vm0, %v455_v13  ;;  %v452_v18 = vadd.f32 %v753_v3, %v440_v14  ;;  %v430_v20 = vmul.f32 %v920_v15, %v382_v35 }
 0x1f4   : > { %v453_v17 = vadd.f32 %v753_v3, %v441_v19 }
 0x1f5   : > { %v456_v21 = vpack.c.bf16 %v452_v18, %v451_v16  ;;  %v442_v22 = vmul.f32 %v752_v62, %v430_v20 }
 0x1f7   : > { %459 = vst.msk [vmem:[#allocation2 + $0x8] sm:$0xff] %vm351_vm0, %v456_v21  ;;  %v454_v23 = vadd.f32 %v753_v3, %v442_v22 }
 0x1f9   : > { %v457_v24 = vpack.c.bf16 %v454_v23, %v453_v17 }
 0x1fb   : > { %460 = vst.msk [vmem:[#allocation2 + $0x10] sm:$0xff] %vm351_vm0, %v457_v24 }
 0x1fc PF: > { %v921_v25 = vld [vmem:[%s1435_s16] sm:$0xff]   ;;  %v1168_v26 = vmov 0.0   ;;  %v922_v27 = vld [vmem:[%s1435_s16 + $0x8] sm:$0xff]   ;;  %vm1169_vm1 = vmmov 0   ;;  %vm487_vm2 = vcmask 261120   ;;  %vm578_vm3 = vcmask 60416  }
 0x1fd   : > { %797 = vmatprep.subr.bf16.mxu1 %v1168_v26  ;;  %781 = vmatprep.subr.bf16.mxu0 %v1168_v26  ;;  %v461_v29 = vld [vmem:[#allocation2] sm:$0xff]  ;;  %s802_s24 = smul.u32 384, %s1149_s21  ;;  %s601_s26 = sshll.u32 %s1447_s15, 4  ;;  %s1489_s26 = int_to_ptr.vmem [resolvable:$true] %s601_s26 }
 0x1fe   : > { %799 = vmatpush3.bf16.msra.mxu1 %v921_v25  ;;  %782 = vmatpush3.bf16.msra.mxu0 %v921_v25  ;;  %v462_v28 = vld [vmem:[#allocation2 + $0x8] sm:$0xff]  ;;  %v754_v31 = vld [vmem:[%s297_s28] ss:$0 sm:$0xff]  ;;  %s586_s21 = scalar_lea.sflag [#allocation5], %s1432_s18  ;;  %s1067_s25 = scalar_lea.vmem %s1489_s26, 384 }
 0x1ff   : > { %798 = vmatprep.subr.bf16.mxu1 %v1168_v26  ;;  %789 = vmatprep.mubr.msk.bf16.mxu1 %vm1169_vm1, %v1168_v26  ;;  %s1487_s6 = scalar_lea.hbm %s1546_s5, %s802_s24  ;;  %p1068_p4 = scmp.ne.s32.totalorder %s1489_s26, %s1067_s25 }
 0x200   : > { %783 = vmatprep.subr.bf16.mxu0 %v1168_v26  ;;  %785 = vmatprep.mubr.msk.bf16.mxu0 %vm1169_vm1, %v1168_v26  ;;  %p1592_p6 = scmp.ne.s32.totalorder %s1577_s13, 0  ;;  %s1170_s17 = smov [#allocation12]  }
 0x201   : > { %s1071_s14 = sshll.u32 %s1170_s17, 4  ;;  %s1072_s14 = int_to_ptr.vmem [resolvable:$false] %s1071_s14 }
 0x202   : > { %800 = vmatpush3.bf16.msra.mxu1 %v922_v27  ;;  %784 = vmatpush3.bf16.msra.mxu0 %v922_v27  ;;  %v463_v30 = vld [vmem:[#allocation2 + $0x10] sm:$0xff]  ;;  %p1069_p13 = pnand %p1068_p4, %p1592_p6  ;;  %s1073_s11 = scalar_lea.vmem %s1072_s14, 768 }
 0x203   : > { %p1074_p0 = scmp.lt.s32.totalorder %s1489_s26, %s1072_s14  ;;  %p1075_p8 = scmp.lt.s32.totalorder %s1073_s11, %s1067_s25 }
 0x204   : > { %p1070_p7 = pneg %p1069_p13 }
 0x205   : > { %790 = vmatmul.mubr.msk.bf16.vlgmr.msra.gmra.mrb[0].mxu1 %vm487_vm2, %v462_v28  ;;  %786 = vmatmul.mubr.msk.bf16.vlgmr.msra.gmra.mrb[0].mxu0 %vm487_vm2, %v461_v29  ;;  %p1076_p10 = por %p1075_p8, %p1074_p0 }
 0x206   : > { %793 = vmatprep.mubr.msk.bf16.mxu1 %vm1169_vm1, %v1168_v26 }
 0x207   : > { %p1077_p1 = pnand %p1076_p10, %p1070_p7 }
 0x20d   : > { %794 = vmatmul.mubr.msk.bf16.gmra.mrb[4].mxu1 %vm487_vm2, %v463_v30 }
 0x2d8   : > { %v539_v32 = vpop.f32.mrb[0].mxu1  ;;  %v531_v33 = vpop.f32.mrb[0].mxu0 }
 0x2d9   : > { %v540_v34 = vadd.f32 %v754_v31, %v539_v32  ;;  %v791_v35 = vpop.f32.mrb[1].mxu1  ;;  %v532_v36 = vadd.f32 %v754_v31, %v531_v33  ;;  %v787_v37 = vpop.f32.mrb[1].mxu0 }
 0x2da   : > { %v542_v38 = vpop.f32.mrb[2].mxu1  ;;  %v534_v39 = vpop.f32.mrb[2].mxu0 }
 0x2db   : > { %v772_v40 = vpack.c.bf16 %v540_v34, %v540_v34  ;;  %v543_v41 = vadd.f32 %v754_v31, %v542_v38  ;;  %v792_v42 = vpop.f32.mrb[3].mxu1  ;;  %v770_v43 = vpack.c.bf16 %v532_v36, %v532_v36  ;;  %v535_v44 = vadd.f32 %v754_v31, %v534_v39  ;;  %v788_v45 = vpop.f32.mrb[3].mxu0 }
 0x2dd   : > { %581 = vst.msk [vmem:[%s1447_s15 + $0x8] sm:$0xf] %vm578_vm3, %v772_v40  ;;  %v773_v46 = vpack.c.bf16 %v543_v41, %v543_v41  ;;  %579 = vst.msk [vmem:[%s1447_s15] sm:$0xf] %vm578_vm3, %v770_v43  ;;  %v771_v47 = vpack.c.bf16 %v535_v44, %v535_v44 }
 0x2df   : > { %582 = vst.msk [vmem:[%s1447_s15 + $0xc] sm:$0xf] %vm578_vm3, %v773_v46  ;;  %580 = vst.msk [vmem:[%s1447_s15 + $0x4] sm:$0xf] %vm578_vm3, %v771_v47 }
 0x2e0   : > { %v547_v48 = vpop.f32.mrb[4].mxu1 }
 0x2e1   : > { %v548_v49 = vadd.f32 %v754_v31, %v547_v48  ;;  %v795_v50 = vpop.f32.mrb[5].mxu1 }
 0x2e2   : > { %v550_v51 = vpop.f32.mrb[6].mxu1 }
 0x2e3   : > { %v774_v52 = vpack.c.bf16 %v548_v49, %v548_v49  ;;  %v551_v53 = vadd.f32 %v754_v31, %v550_v51  ;;  %v796_v54 = vpop.f32.mrb[7].mxu1 }
 0x2e5   : > { %583 = vst.msk [vmem:[%s1447_s15 + $0x10] sm:$0xf] %vm578_vm3, %v774_v52  ;;  %v775_v55 = vpack.c.bf16 %v551_v53, %v551_v53 }
 0x2e7   : > { %584 = vst.msk [vmem:[%s1447_s15 + $0x14] sm:$0xf] %vm578_vm3, %v775_v55 }
 0x2e8   : > { %1080 = shalt.err (!%p1077_p1)
}
 0x2e9   : > { %s1081_s29 = scalar_lea.hbm %s1487_s6, 384  ;;  %s1085_s7 = scalar_lea.hbm %s1546_s5, 4608 }
 0x2ea   : > { %p1082_p11 = scmp.ne.s32.totalorder %s1487_s6, %s1081_s29  ;;  %p1086_p5 = scmp.lt.u32.totalorder %s1487_s6, %s1546_s5 }
 0x2eb   : > { %p1087_p9 = scmp.lt.u32.totalorder %s1085_s7, %s1081_s29  ;;  %p1089_p4 = scmp.lt.u32.totalorder %s1081_s29, %s1487_s6 }
 0x2ec   : > { %p1083_p12 = pnand %p1082_p11, %p1592_p6 }
 0x2ed   : > { %p1088_p2 = por %p1087_p9, %p1086_p5 }
 0x2ee   : > { %p1084_p3 = pneg %p1083_p12 }
 0x2ef   : > { %p1090_p13 = por %p1089_p4, %p1088_p2 }
 0x2f1   : > { %p1091_p7 = pnand %p1090_p13, %p1084_p3 }
 0x2f3   : > { %1094 = shalt.err (!%p1091_p7)
}
 0x2f4   : > { %s1171_s3 = smov 64   ;;  %s1172_s23 = smov 4  }
 0x2f5   : > { %819 = dma.vmem_to_hbm [thread:$0]  (%p1592_p6), %s1489_s26, 384, %s1487_s6, %s586_s21, %s1171_s3, %s1171_s3, %s1172_s23  }
 0x2f6 PF: > { %s1593_s16 = sld [smem:[#allocation18_spill]]  ;;  %s1594_s28 = sld [smem:[#allocation17_spill]] }
 0x2f7   : > { %s1595_s8 = sld [smem:[#allocation19_spill]] }
 0x2fc   : > { %p849_p0 = scmp.ge.s32.totalorder %s1593_s16, 2  ;;  %s616_s15 = sand.u32 1, %s1594_s28  }
 0x2fd   : > { %p1596_p8 = scmp.ne.s32.totalorder %s1595_s8, 0  ;;  %s617_s24 = scalar_lea.sflag [#allocation5], %s616_s15 }
 0x2ff   : > { %p839_p10 = pnand %p849_p0, %p1596_p8 }
 0x301   : > { %1132 = dma.done.wait (!%p839_p10), %s617_s24, 384  }
 0x302   : > { %1134 = vsyncadd (!%p839_p10), %s617_s24, 4294966912  ;;  %s23_s23 = sadd.s32 1, %s1593_s16   ;;  %s1597_s30 = sld [smem:[#allocation21_spill]] }
 0x303   : > { %p20_p1 = scmp.ge.s32.totalorder %s23_s23, 14   ;;  %s1598_s13 = sld [smem:[#allocation20_spill]] }
 0x304   : > { %s1599_s18 = smov %s1141_s19  ;;  %s1600_s19 = smov %s1145_s20 }
 0x305   : > { %s1602_s21 = smov %s1153_s22  ;;  %22 = sbr.rel (!%p20_p1) target bundleno = 11 (0xb), region = 114 }
 0x308   : > { %s1601_s20 = smov %s1597_s30 }
 0x309   : > { %s1603_s22 = smov %s1598_s13 }
 0x30c   :  { %622 = vsyncpa [#allocation4], 1 }
 0x30d   :  { %624 = vsyncpa [#allocation4 + $0x1], 1 }
 0x30e   :  { %625 = vsyncpa [#allocation7], 1 }
 0x30f   :  { %627 = vsyncpa [#allocation7 + $0x1], 1 }
 0x310   :  { %628 = vsyncpa [#allocation10], 1 }
 0x311   :  { %629 = vsyncpa [#allocation5], 1 }
 0x312   :  { %631 = vsyncpa [#allocation5 + $0x1], 1 }

// kernel: vit_encoder_forward.17
= control target key start
LH: loop header
LB: loop body
LE: loop exit
PB: predicated region body
PF: predicated region fallthrough
CT: control target
= control target key end

     0   :  { %9 = vsyncpa [#allocation3], 0  ;;  %s544_s0 = inlined_call_operand.hbm [shape: bf16[48,64], index: 0, kind: input, shape index: {}]   ;;  %s545_s1 = inlined_call_operand.hbm [shape: bf16[64,32], index: 1, kind: input, shape index: {}]   ;;  %s546_s2 = inlined_call_operand.hbm [shape: f32[1,32], index: 2, kind: input, shape index: {}]   ;;  %s547_s3 = inlined_call_operand.hbm [shape: f32[48,32], index: 3, kind: input, shape index: {}]   ;;  %s548_s4 = inlined_call_operand.hbm [shape: f32[48,32], index: 4, kind: output, shape index: {}]  }
   0x1   :  { %10 = vsyncpa [#allocation6], 0 }
   0x2   :  { %11 = vsyncpa [#allocation9], 0 }
   0x3   :  { %12 = vsyncpa [#allocation4], 0  ;;  %s419_s15 = smov [#allocation5]   ;;  %s420_s17 = smov [#allocation2]  }
   0x4   :  { %s30_s16 = sshll.u32 %s419_s15, 4  ;;  %s18_s18 = sshll.u32 %s420_s17, 4  ;;  %s31_s16 = int_to_ptr.vmem [resolvable:$true] %s30_s16  ;;  %s455_s18 = int_to_ptr.vmem [resolvable:$true] %s18_s18 }
   0x5   :  { %s301_s21 = scalar_lea.hbm %s545_s1, 512 }
   0x6   :  { %p302_p0 = scmp.ne.s32.totalorder %s545_s1, %s301_s21  ;;  %p305_p1 = scmp.lt.u32.totalorder %s301_s21, %s545_s1 }
   0x8   :  { %p307_p2 = pnand %p305_p1, %p302_p0 }
   0xa   :  { %310 = shalt.err (!%p307_p2)
}
   0xb   :  { %s311_s26 = scalar_lea.vmem %s31_s16, 512  ;;  %p316_p4 = scmp.lt.s32.totalorder %s31_s16, %s31_s16 }
   0xc   :  { %p312_p3 = scmp.ne.s32.totalorder %s31_s16, %s311_s26  ;;  %p317_p5 = scmp.lt.s32.totalorder %s311_s26, %s311_s26 }
   0xe   :  { %p318_p6 = por %p317_p5, %p316_p4 }
  0x10   :  { %p319_p7 = pnand %p318_p6, %p312_p3 }
  0x12   :  { %322 = shalt.err (!%p319_p7)
}
  0x13   :  { %s421_s27 = smov 64   ;;  %s422_s28 = smov 4  }
  0x14   :  { %36 = dma.hbm_to_vmem [thread:$0]  %s545_s1, 512, %s31_s16, [#allocation6], %s421_s27, %s421_s27, %s422_s28  }
  0x15   :  { %s323_s7 = scalar_lea.hbm %s544_s0, 384 }
  0x16   :  { %p324_p8 = scmp.ne.s32.totalorder %s544_s0, %s323_s7  ;;  %p327_p9 = scmp.lt.u32.totalorder %s323_s7, %s544_s0 }
  0x18   :  { %p329_p10 = pnand %p327_p9, %p324_p8 }
  0x1a   :  { %332 = shalt.err (!%p329_p10)
}
  0x1b   :  { %s333_s12 = scalar_lea.vmem %s455_s18, 384  ;;  %p338_p12 = scmp.lt.s32.totalorder %s455_s18, %s455_s18 }
  0x1c   :  { %p334_p11 = scmp.ne.s32.totalorder %s455_s18, %s333_s12  ;;  %p339_p13 = scmp.lt.s32.totalorder %s333_s12, %s333_s12 }
  0x1e   :  { %p340_p0 = por %p339_p13, %p338_p12 }
  0x20   :  { %p341_p1 = pnand %p340_p0, %p334_p11 }
  0x22   :  { %344 = shalt.err (!%p341_p1)
}
  0x23   :  { %24 = dma.hbm_to_vmem [thread:$0]  %s544_s0, 384, %s455_s18, [#allocation3], %s421_s27, %s421_s27, %s422_s28  }
  0x24   :  { %s423_s14 = smov [#allocation7]   ;;  %s424_s16 = smov [#allocation8]  }
  0x25   :  { %s43_s15 = sshll.u32 %s423_s14, 4  ;;  %s52_s17 = sshll.u32 %s424_s16, 4  ;;  %s44_s15 = int_to_ptr.vmem [resolvable:$true] %s43_s15  ;;  %s486_s17 = int_to_ptr.vmem [resolvable:$true] %s52_s17 }
  0x26   :  { %s345_s21 = scalar_lea.hbm %s546_s2, 16 }
  0x27   :  { %p346_p2 = scmp.ne.s32.totalorder %s546_s2, %s345_s21  ;;  %p349_p3 = scmp.lt.u32.totalorder %s345_s21, %s546_s2 }
  0x29   :  { %p351_p4 = pnand %p349_p3, %p346_p2 }
  0x2b   :  { %354 = shalt.err (!%p351_p4)
}
  0x2c   :  { %s355_s0 = scalar_lea.vmem %s44_s15, 16  ;;  %s359_s18 = scalar_lea.vmem %s44_s15, 32 }
  0x2d   :  { %p356_p5 = scmp.ne.s32.totalorder %s44_s15, %s355_s0  ;;  %p360_p6 = scmp.lt.s32.totalorder %s44_s15, %s44_s15 }
  0x2e   :  { %p361_p7 = scmp.lt.s32.totalorder %s359_s18, %s355_s0 }
  0x30   :  { %p362_p8 = por %p361_p7, %p360_p6 }
  0x32   :  { %p363_p9 = pnand %p362_p8, %p356_p5 }
  0x34   :  { %366 = shalt.err (!%p363_p9)
}
  0x35   :  { %46 = dma.hbm_to_vmem [thread:$0]  %s546_s2, 16, %s44_s15, [#allocation6]  }
  0x36   :  { %s367_s30 = scalar_lea.hbm %s547_s3, 768 }
  0x37   :  { %p368_p10 = scmp.ne.s32.totalorder %s547_s3, %s367_s30  ;;  %p371_p11 = scmp.lt.u32.totalorder %s367_s30, %s547_s3 }
  0x39   :  { %p373_p12 = pnand %p371_p11, %p368_p10 }
  0x3b   :  { %376 = shalt.err (!%p373_p12)
}
  0x3c   :  { %s377_s9 = scalar_lea.vmem %s486_s17, 768  ;;  %p382_p0 = scmp.lt.s32.totalorder %s486_s17, %s486_s17 }
  0x3d   :  { %p378_p13 = scmp.ne.s32.totalorder %s486_s17, %s377_s9  ;;  %p383_p1 = scmp.lt.s32.totalorder %s377_s9, %s377_s9 }
  0x3f   :  { %p384_p2 = por %p383_p1, %p382_p0 }
  0x41   :  { %p385_p3 = pnand %p384_p2, %p378_p13 }
  0x43   :  { %388 = shalt.err (!%p385_p3)
}
  0x44   :  { %s425_s2 = smov 128   ;;  %s426_s10 = smov 8  }
  0x45   :  { %58 = dma.hbm_to_vmem [thread:$0]  %s547_s3, 768, %s486_s17, [#allocation9], %s425_s2, %s425_s2, %s426_s10  }
  0x46   :  { %411 = dma.done.wait [#allocation3], 384  }
  0x47   :  { %412 = vsyncadd [#allocation3], 4294966912 }
  0x48   :  { %413 = dma.done.wait [#allocation6], 528  }
  0x49   :  { %414 = vsyncadd [#allocation6], 4294966768 }
  0x4a   :  { %415 = dma.done.wait [#allocation9], 768  }
  0x4b   :  { %416 = vsyncadd [#allocation9], 4294966528  ;;  %v427_v0 = vmov 0.0   ;;  %vm428_vm0 = vmmov 0   ;;  %v294_v1 = vld [vmem:[#allocation5] sm:$0xff]   ;;  %v295_v2 = vld [vmem:[#allocation5 + $0x8] sm:$0xff]  }
  0x4c   :  { %275 = vmatprep.subr.bf16.mxu1 %v427_v0  ;;  %255 = vmatprep.subr.bf16.mxu0 %v427_v0  ;;  %v296_v3 = vld [vmem:[#allocation5 + $0x10] sm:$0xff]   ;;  %v297_v4 = vld [vmem:[#allocation5 + $0x18] sm:$0xff]   ;;  %v299_v6 = vld [vmem:[#allocation2] sm:$0xff]   ;;  %vm132_vm1 = vcmask 523264   ;;  %vm211_vm2 = vcmask 261120   ;;  %s429_s3 = smov [#allocation10]  }
  0x4d   :  { %267 = vmatprep.mubr.msk.bf16.mxu1 %vm428_vm0, %v427_v0  ;;  %263 = vmatprep.mubr.msk.bf16.mxu0 %vm428_vm0, %v427_v0  ;;  %v298_v5 = vld [vmem:[#allocation2 + $0x8] sm:$0xff]   ;;  %v300_v7 = vld [vmem:[#allocation2 + $0x10] sm:$0xff]   ;;  %v237_v8 = vld [vmem:[#allocation7] ss:$0 sm:$0xff]  ;;  %s223_s1 = sshll.u32 %s429_s3, 4  ;;  %s224_s1 = int_to_ptr.vmem [resolvable:$true] %s223_s1 }
  0x4e   :  { %279 = vmatpush3.bf16.msra.mxu1 %v294_v1  ;;  %256 = vmatpush3.bf16.msra.mxu0 %v294_v1  ;;  %v201_v10 = vld [vmem:[#allocation8 + $0x10] sm:$0xff]  ;;  %v199_v12 = vld [vmem:[#allocation8] sm:$0xff]  ;;  %v202_v18 = vld [vmem:[#allocation8 + $0x18] sm:$0xff]  ;;  %s389_s13 = scalar_lea.vmem %s224_s1, 768  ;;  %p394_p5 = scmp.lt.s32.totalorder %s224_s1, %s224_s1 }
  0x4f   :  { %276 = vmatprep.subr.bf16.mxu1 %v427_v0  ;;  %257 = vmatprep.subr.bf16.mxu0 %v427_v0  ;;  %v200_v20 = vld [vmem:[#allocation8 + $0x8] sm:$0xff]  ;;  %v203_v30 = vld [vmem:[#allocation8 + $0x20] sm:$0xff]  ;;  %p390_p4 = scmp.ne.s32.totalorder %s224_s1, %s389_s13  ;;  %p395_p6 = scmp.lt.s32.totalorder %s389_s13, %s389_s13 }
  0x50   :  { %v204_v34 = vld [vmem:[#allocation8 + $0x28] sm:$0xff] }
  0x51   :  { %p396_p7 = por %p395_p6, %p394_p5 }
  0x52   :  { %280 = vmatpush3.bf16.msra.mxu1 %v295_v2  ;;  %258 = vmatpush3.bf16.msra.mxu0 %v295_v2 }
  0x53   :  { %277 = vmatprep.subr.bf16.mxu1 %v427_v0  ;;  %259 = vmatprep.subr.bf16.mxu0 %v427_v0  ;;  %p397_p8 = pnand %p396_p7, %p390_p4 }
  0x56   :  { %281 = vmatpush3.bf16.msra.mxu1 %v296_v3  ;;  %260 = vmatpush3.bf16.msra.mxu0 %v296_v3 }
  0x57   :  { %278 = vmatprep.subr.bf16.mxu1 %v427_v0  ;;  %261 = vmatprep.subr.bf16.mxu0 %v427_v0 }
  0x5a   :  { %282 = vmatpush3.bf16.msra.mxu1 %v297_v4  ;;  %262 = vmatpush3.bf16.msra.mxu0 %v297_v4 }
  0x5d   :  { %268 = vmatmul.mubr.msk.bf16.vlgmr.msra.gmra.mrb[0].mxu1 %vm132_vm1, %v298_v5  ;;  %264 = vmatmul.mubr.msk.bf16.vlgmr.msra.gmra.mrb[0].mxu0 %vm132_vm1, %v299_v6 }
  0x5e   :  { %271 = vmatprep.mubr.msk.bf16.mxu1 %vm428_vm0, %v427_v0 }
  0x65   :  { %272 = vmatmul.mubr.msk.bf16.gmra.mrb[4].mxu1 %vm132_vm1, %v300_v7 }
 0x130   :  { %v184_v9 = vpop.f32.mrb[0].mxu1  ;;  %v176_v11 = vpop.f32.mrb[0].mxu0 }
 0x131   :  { %v185_v13 = vadd.f32 %v237_v8, %v184_v9  ;;  %v269_v14 = vpop.f32.mrb[1].mxu1  ;;  %v177_v15 = vadd.f32 %v237_v8, %v176_v11  ;;  %v265_v16 = vpop.f32.mrb[1].mxu0 }
 0x132   :  { %v187_v17 = vpop.f32.mrb[2].mxu1  ;;  %v179_v19 = vpop.f32.mrb[2].mxu0 }
 0x133   :  { %v207_v21 = vadd.f32 %v201_v10, %v185_v13  ;;  %v188_v22 = vadd.f32 %v237_v8, %v187_v17  ;;  %v270_v23 = vpop.f32.mrb[3].mxu1  ;;  %v205_v24 = vadd.f32 %v199_v12, %v177_v15  ;;  %v180_v25 = vadd.f32 %v237_v8, %v179_v19  ;;  %v266_v26 = vpop.f32.mrb[3].mxu0 }
 0x135   :  { %214 = vst.msk [vmem:[#allocation10 + $0x10] sm:$0xff] %vm211_vm2, %v207_v21  ;;  %v208_v27 = vadd.f32 %v202_v18, %v188_v22  ;;  %212 = vst.msk [vmem:[#allocation10] sm:$0xff] %vm211_vm2, %v205_v24  ;;  %v206_v28 = vadd.f32 %v200_v20, %v180_v25 }
 0x137   :  { %215 = vst.msk [vmem:[#allocation10 + $0x18] sm:$0xff] %vm211_vm2, %v208_v27  ;;  %213 = vst.msk [vmem:[#allocation10 + $0x8] sm:$0xff] %vm211_vm2, %v206_v28 }
 0x138   :  { %v192_v29 = vpop.f32.mrb[4].mxu1 }
 0x139   :  { %v193_v31 = vadd.f32 %v237_v8, %v192_v29  ;;  %v273_v32 = vpop.f32.mrb[5].mxu1 }
 0x13a   :  { %v195_v33 = vpop.f32.mrb[6].mxu1 }
 0x13b   :  { %v209_v35 = vadd.f32 %v203_v30, %v193_v31  ;;  %v196_v36 = vadd.f32 %v237_v8, %v195_v33  ;;  %v274_v37 = vpop.f32.mrb[7].mxu1 }
 0x13d   :  { %216 = vst.msk [vmem:[#allocation10 + $0x20] sm:$0xff] %vm211_vm2, %v209_v35  ;;  %v210_v38 = vadd.f32 %v204_v34, %v196_v36 }
 0x13f   :  { %217 = vst.msk [vmem:[#allocation10 + $0x28] sm:$0xff] %vm211_vm2, %v210_v38 }
 0x140   :  { %400 = shalt.err (!%p397_p8)
}
 0x141   :  { %s401_s16 = scalar_lea.hbm %s548_s4, 768 }
 0x142   :  { %p402_p9 = scmp.ne.s32.totalorder %s548_s4, %s401_s16  ;;  %p405_p10 = scmp.lt.u32.totalorder %s401_s16, %s548_s4 }
 0x144   :  { %p407_p11 = pnand %p405_p10, %p402_p9 }
 0x146   :  { %410 = shalt.err (!%p407_p11)
}
 0x147   :  { %229 = dma.vmem_to_hbm [thread:$0]  %s224_s1, 768, %s548_s4, [#allocation4], %s425_s2, %s425_s2, %s426_s10  }
 0x148   :  { %417 = dma.done.wait [#allocation4], 768  }
 0x149   :  { %418 = vsyncadd [#allocation4], 4294966528 }
 0x14a   :  { %233 = vsyncpa [#allocation3], 1 }
 0x14b   :  { %234 = vsyncpa [#allocation6], 1 }
 0x14c   :  { %235 = vsyncpa [#allocation9], 1 }
 0x14d   :  { %236 = vsyncpa [#allocation4], 1 }

// kernel: vit_encoder_forward.16
= control target key start
LH: loop header
LB: loop body
LE: loop exit
PB: predicated region body
PF: predicated region fallthrough
CT: control target
= control target key end

     0   :  { %10 = vsyncpa [#allocation4], 0  ;;  %s810_s0 = inlined_call_operand.hbm [shape: f32[48,32], index: 0, kind: input, shape index: {}]   ;;  %s811_s1 = inlined_call_operand.hbm [shape: bf16[32,64], index: 1, kind: input, shape index: {}]   ;;  %s812_s2 = inlined_call_operand.hbm [shape: f32[1,64], index: 2, kind: input, shape index: {}]   ;;  %s813_s3 = inlined_call_operand.hbm [shape: f32[1,32], index: 3, kind: input, shape index: {}]   ;;  %s814_s4 = inlined_call_operand.hbm [shape: f32[1,32], index: 4, kind: input, shape index: {}]   ;;  %s815_s5 = inlined_call_operand.hbm [shape: bf16[48,64], index: 5, kind: output, shape index: {}]  }
   0x1   :  { %11 = vsyncpa [#allocation7], 0 }
   0x2   :  { %12 = vsyncpa [#allocation10], 0 }
   0x3   :  { %13 = vsyncpa [#allocation5], 0  ;;  %s626_s18 = smov [#allocation6]   ;;  %s486_s22 = scalar_lea.hbm %s811_s1, 256 }
   0x4   :  { %s31_s19 = sshll.u32 %s626_s18, 4  ;;  %p487_p0 = scmp.ne.s32.totalorder %s811_s1, %s486_s22  ;;  %s32_s19 = int_to_ptr.vmem [resolvable:$true] %s31_s19 }
   0x5   :  { %p490_p1 = scmp.lt.u32.totalorder %s486_s22, %s811_s1 }
   0x7   :  { %p492_p2 = pnand %p490_p1, %p487_p0 }
   0x9   :  { %495 = shalt.err (!%p492_p2)
}
   0xa   :  { %s496_s27 = scalar_lea.vmem %s32_s19, 256  ;;  %p501_p4 = scmp.lt.s32.totalorder %s32_s19, %s32_s19 }
   0xb   :  { %p497_p3 = scmp.ne.s32.totalorder %s32_s19, %s496_s27  ;;  %p502_p5 = scmp.lt.s32.totalorder %s496_s27, %s496_s27 }
   0xd   :  { %p503_p6 = por %p502_p5, %p501_p4 }
   0xf   :  { %p504_p7 = pnand %p503_p6, %p497_p3 }
  0x11   :  { %507 = shalt.err (!%p504_p7)
}
  0x12   :  { %s627_s28 = smov 64   ;;  %s628_s29 = smov 4  }
  0x13   :  { %37 = dma.hbm_to_vmem [thread:$0]  %s811_s1, 256, %s32_s19, [#allocation7], %s627_s28, %s627_s28, %s628_s29  }
  0x14   :  { %s629_s7 = smov [#allocation9]   ;;  %s630_s9 = smov [#allocation3]  }
  0x15   :  { %s54_s8 = sshll.u32 %s629_s7, 4  ;;  %s19_s10 = sshll.u32 %s630_s9, 4  ;;  %s55_s8 = int_to_ptr.vmem [resolvable:$true] %s54_s8  ;;  %s20_s10 = int_to_ptr.vmem [resolvable:$true] %s19_s10 }
  0x16   :  { %s508_s13 = scalar_lea.hbm %s813_s3, 16 }
  0x17   :  { %p509_p8 = scmp.ne.s32.totalorder %s813_s3, %s508_s13  ;;  %p512_p9 = scmp.lt.u32.totalorder %s508_s13, %s813_s3 }
  0x19   :  { %p514_p10 = pnand %p512_p9, %p509_p8 }
  0x1b   :  { %517 = shalt.err (!%p514_p10)
}
  0x1c   :  { %s518_s1 = scalar_lea.vmem %s55_s8, 16  ;;  %s522_s18 = scalar_lea.vmem %s55_s8, 32 }
  0x1d   :  { %p519_p11 = scmp.ne.s32.totalorder %s55_s8, %s518_s1  ;;  %p523_p12 = scmp.lt.s32.totalorder %s55_s8, %s55_s8 }
  0x1e   :  { %p524_p13 = scmp.lt.s32.totalorder %s522_s18, %s518_s1 }
  0x20   :  { %p525_p0 = por %p524_p13, %p523_p12 }
  0x22   :  { %p526_p1 = pnand %p525_p0, %p519_p11 }
  0x24   :  { %529 = shalt.err (!%p526_p1)
}
  0x25   :  { %57 = dma.hbm_to_vmem [thread:$0]  %s813_s3, 16, %s55_s8, [#allocation10]  }
  0x26   :  { %s530_s23 = scalar_lea.hbm %s810_s0, 768 }
  0x27   :  { %p531_p2 = scmp.ne.s32.totalorder %s810_s0, %s530_s23  ;;  %p534_p3 = scmp.lt.u32.totalorder %s530_s23, %s810_s0 }
  0x29   :  { %p536_p4 = pnand %p534_p3, %p531_p2 }
  0x2b   :  { %539 = shalt.err (!%p536_p4)
}
  0x2c   :  { %s540_s30 = scalar_lea.vmem %s20_s10, 768  ;;  %p545_p6 = scmp.lt.s32.totalorder %s20_s10, %s20_s10 }
  0x2d   :  { %p541_p5 = scmp.ne.s32.totalorder %s20_s10, %s540_s30  ;;  %p546_p7 = scmp.lt.s32.totalorder %s540_s30, %s540_s30 }
  0x2f   :  { %p547_p8 = por %p546_p7, %p545_p6 }
  0x31   :  { %p548_p9 = pnand %p547_p8, %p541_p5 }
  0x33   :  { %551 = shalt.err (!%p548_p9)
}
  0x34   :  { %s631_s3 = smov 128   ;;  %s632_s6 = smov 8  }
  0x35   :  { %25 = dma.hbm_to_vmem [thread:$0]  %s810_s0, 768, %s20_s10, [#allocation4], %s631_s3, %s631_s3, %s632_s6  }
  0x36   :  { %s633_s9 = smov [#allocation8]   ;;  %s634_s12 = smov [#allocation11]  }
  0x37   :  { %s44_s11 = sshll.u32 %s633_s9, 4  ;;  %s64_s13 = sshll.u32 %s634_s12, 4  ;;  %s45_s11 = int_to_ptr.vmem [resolvable:$true] %s44_s11  ;;  %s65_s13 = int_to_ptr.vmem [resolvable:$true] %s64_s13 }
  0x38   :  { %s552_s16 = scalar_lea.hbm %s812_s2, 16 }
  0x39   :  { %p553_p10 = scmp.ne.s32.totalorder %s812_s2, %s552_s16  ;;  %p556_p11 = scmp.lt.u32.totalorder %s552_s16, %s812_s2 }
  0x3b   :  { %p558_p12 = pnand %p556_p11, %p553_p10 }
  0x3d   :  { %561 = shalt.err (!%p558_p12)
}
  0x3e   :  { %s562_s0 = scalar_lea.vmem %s45_s11, 16  ;;  %s566_s10 = scalar_lea.vmem %s45_s11, 32 }
  0x3f   :  { %p563_p13 = scmp.ne.s32.totalorder %s45_s11, %s562_s0  ;;  %p567_p0 = scmp.lt.s32.totalorder %s45_s11, %s45_s11 }
  0x40   :  { %p568_p1 = scmp.lt.s32.totalorder %s566_s10, %s562_s0 }
  0x42   :  { %p569_p2 = por %p568_p1, %p567_p0 }
  0x44   :  { %p570_p3 = pnand %p569_p2, %p563_p13 }
  0x46   :  { %573 = shalt.err (!%p570_p3)
}
  0x47   :  { %47 = dma.hbm_to_vmem [thread:$0]  %s812_s2, 16, %s45_s11, [#allocation7]  }
  0x48   :  { %s574_s24 = scalar_lea.hbm %s814_s4, 16 }
  0x49   :  { %p575_p4 = scmp.ne.s32.totalorder %s814_s4, %s574_s24  ;;  %p578_p5 = scmp.lt.u32.totalorder %s574_s24, %s814_s4 }
  0x4b   :  { %p580_p6 = pnand %p578_p5, %p575_p4 }
  0x4d   :  { %583 = shalt.err (!%p580_p6)
}
  0x4e   :  { %s584_s3 = scalar_lea.vmem %s65_s13, 16  ;;  %s588_s6 = scalar_lea.vmem %s65_s13, 32 }
  0x4f   :  { %p585_p7 = scmp.ne.s32.totalorder %s65_s13, %s584_s3  ;;  %p589_p8 = scmp.lt.s32.totalorder %s65_s13, %s65_s13 }
  0x50   :  { %p590_p9 = scmp.lt.s32.totalorder %s588_s6, %s584_s3 }
  0x52   :  { %p591_p10 = por %p590_p9, %p589_p8 }
  0x54   :  { %p592_p11 = pnand %p591_p10, %p585_p7 }
  0x56   :  { %595 = shalt.err (!%p592_p11)
}
  0x57   :  { %67 = dma.hbm_to_vmem [thread:$0]  %s814_s4, 16, %s65_s13, [#allocation10]  }
  0x58   :  { %618 = dma.done.wait [#allocation4], 768  }
  0x59   :  { %619 = vsyncadd [#allocation4], 4294966528 }
  0x5a   :  { %620 = dma.done.wait [#allocation7], 272  }
  0x5b   :  { %621 = vsyncadd [#allocation7], 4294967024 }
  0x5c   :  { %622 = dma.done.wait [#allocation10], 32  }
  0x5d   :  { %623 = vsyncadd [#allocation10], 4294967264  ;;  %vm96_vm0 = vcmask 261120   ;;  %v90_v0 = vld [vmem:[#allocation3 + $0x10] sm:$0xff]  ;;  %v91_v1 = vld [vmem:[#allocation3 + $0x18] sm:$0xff]  ;;  %v635_v43 = vmov 0.0  }
  0x5e   :  { %v88_v2 = vld [vmem:[#allocation3] sm:$0xff]  ;;  %v103_v3 = vsel %vm96_vm0, %v90_v0, 0.0  ;;  %v89_v5 = vld [vmem:[#allocation3 + $0x8] sm:$0xff]  ;;  %v106_v6 = vsel %vm96_vm0, %v91_v1, 0.0  ;;  %v460_v42 = vld [vmem:[#allocation6] sm:$0xff]   ;;  %444 = vmatprep.subr.bf16.mxu1 %v635_v43  ;;  %428 = vmatprep.subr.bf16.mxu0 %v635_v43  ;;  %vm636_vm1 = vmmov 0  }
  0x5f   :  { %v97_v4 = vsel %vm96_vm0, %v88_v2, 0.0  ;;  %104 = vadd.xlane.f32.xlu0 %v103_v3  ;;  %v100_v7 = vsel %vm96_vm0, %v89_v5, 0.0  ;;  %v92_v8 = vld [vmem:[#allocation3 + $0x20] sm:$0xff]  ;;  %v93_v9 = vld [vmem:[#allocation3 + $0x28] sm:$0xff]  ;;  %446 = vmatpush3.bf16.msra.mxu1 %v460_v42  ;;  %v461_v44 = vld [vmem:[#allocation6 + $0x8] sm:$0xff]   ;;  %vm377_vm2 = vcmask 519168  }
  0x60   :  { %98 = vadd.xlane.f32.xlu1 %v97_v4  ;;  %v109_v10 = vsel %vm96_vm0, %v92_v8, 0.0  ;;  %v112_v11 = vsel %vm96_vm0, %v93_v9, 0.0  ;;  %429 = vmatpush3.bf16.msra.mxu0 %v460_v42  ;;  %s637_s4 = smov [#allocation12]  }
  0x61   :  { %445 = vmatprep.subr.bf16.mxu1 %v635_v43  ;;  %430 = vmatprep.subr.bf16.mxu0 %v635_v43  ;;  %s389_s8 = sshll.u32 %s637_s4, 4  ;;  %s390_s8 = int_to_ptr.vmem [resolvable:$true] %s389_s8 }
  0x62   :  { %436 = vmatprep.mubr.msk.bf16.mxu1 %vm636_vm1, %v635_v43  ;;  %432 = vmatprep.mubr.msk.bf16.mxu0 %vm636_vm1, %v635_v43  ;;  %s596_s9 = scalar_lea.vmem %s390_s8, 384  ;;  %p601_p13 = scmp.lt.s32.totalorder %s390_s8, %s390_s8 }
  0x63   :  { %107 = vadd.xlane.f32.xlu0 %v106_v6  ;;  %447 = vmatpush3.bf16.msra.mxu1 %v461_v44  ;;  %p597_p12 = scmp.ne.s32.totalorder %s390_s8, %s596_s9  ;;  %p602_p0 = scmp.lt.s32.totalorder %s596_s9, %s596_s9 }
  0x64   :  { %101 = vadd.xlane.f32.xlu1 %v100_v7  ;;  %431 = vmatpush3.bf16.msra.mxu0 %v461_v44  ;;  %v404_v7 = vld [vmem:[#allocation11] ss:$0 sm:$0xff] }
  0x65   :  { %p603_p1 = por %p602_p0, %p601_p13 }
  0x67   :  { %110 = vadd.xlane.f32.xlu0 %v109_v10  ;;  %p604_p2 = pnand %p603_p1, %p597_p12 }
  0x68   :  { %113 = vadd.xlane.f32.xlu1 %v112_v11 }
  0xec   :  { %v105_v12 = vpop.xlane.xlu0 %104 }
  0xed   :  { %v99_v13 = vpop.xlane.xlu1 %98  ;;  %v118_v14 = vmul.f32 0.03125, %v105_v12 }
  0xee   :  { %v116_v15 = vmul.f32 0.03125, %v99_v13 }
  0xef   :  { %v737_v16 = vsub.f32 %v90_v0, %v118_v14 }
  0xf0   :  { %v739_v17 = vsub.f32 %v88_v2, %v116_v15  ;;  %v108_v18 = vpop.xlane.xlu0 %107 }
  0xf1   :  { %v102_v19 = vpop.xlane.xlu1 %101  ;;  %v119_v20 = vmul.f32 0.03125, %v108_v18  ;;  %v130_v21 = vmul.f32 %v737_v16, %v737_v16 }
  0xf2   :  { %v117_v22 = vmul.f32 0.03125, %v102_v19  ;;  %v128_v23 = vmul.f32 %v739_v17, %v739_v17 }
  0xf3   :  { %v745_v24 = vsub.f32 %v91_v1, %v119_v20  ;;  %v140_v25 = vsel %vm96_vm0, %v130_v21, 0.0  ;;  %v403_v1 = vld [vmem:[#allocation9] ss:$0 sm:$0xff] }
  0xf4   :  { %v748_v26 = vsub.f32 %v89_v5, %v117_v22  ;;  %141 = vadd.xlane.f32.xlu0 %v140_v25  ;;  %v111_v27 = vpop.xlane.xlu0 %110  ;;  %v134_v28 = vsel %vm96_vm0, %v128_v23, 0.0 }
  0xf5   :  { %v114_v29 = vpop.xlane.xlu1 %113  ;;  %v120_v30 = vmul.f32 0.03125, %v111_v27  ;;  %v131_v31 = vmul.f32 %v745_v24, %v745_v24 }
  0xf6   :  { %v121_v32 = vmul.f32 0.03125, %v114_v29  ;;  %v129_v33 = vmul.f32 %v748_v26, %v748_v26 }
  0xf7   :  { %v755_v34 = vsub.f32 %v92_v8, %v120_v30  ;;  %v143_v35 = vsel %vm96_vm0, %v131_v31, 0.0  ;;  %v405_v31 = vld [vmem:[#allocation8] ss:$0 sm:$0xff] }
  0xf8   :  { %v758_v36 = vsub.f32 %v93_v9, %v121_v32  ;;  %144 = vadd.xlane.f32.xlu1 %v143_v35  ;;  %135 = vadd.xlane.f32.xlu0 %v134_v28  ;;  %v137_v38 = vsel %vm96_vm0, %v129_v33, 0.0 }
  0xf9   :  { %v132_v37 = vmul.f32 %v755_v34, %v755_v34 }
  0xfa   :  { %v133_v39 = vmul.f32 %v758_v36, %v758_v36 }
  0xfb   :  { %v146_v40 = vsel %vm96_vm0, %v132_v37, 0.0 }
  0xfc   :  { %147 = vadd.xlane.f32.xlu0 %v146_v40  ;;  %138 = vadd.xlane.f32.xlu1 %v137_v38  ;;  %v149_v41 = vsel %vm96_vm0, %v133_v39, 0.0 }
 0x100   :  { %150 = vadd.xlane.f32.xlu1 %v149_v41 }
 0x181   :  { %v142_v45 = vpop.xlane.xlu0 %141 }
 0x182   :  { %v154_v46 = vmul.f32 0.03125, %v142_v45 }
 0x184   :  { %v160_v47 = vadd.f32 1e-05, %v154_v46 }
 0x185   :  { %v136_v48 = vpop.xlane.xlu0 %135  ;;  %v145_v49 = vpop.xlane.xlu1 %144 }
 0x186   :  { %462 = vrsqrt.f32 %v160_v47  ;;  %v152_v50 = vmul.f32 0.03125, %v136_v48  ;;  %v155_v51 = vmul.f32 0.03125, %v145_v49 }
 0x188   :  { %v158_v52 = vadd.f32 1e-05, %v152_v50  ;;  %v161_v53 = vadd.f32 1e-05, %v155_v51 }
 0x189   :  { %v148_v54 = vpop.xlane.xlu0 %147  ;;  %v139_v55 = vpop.xlane.xlu1 %138 }
 0x18a   :  { %464 = vrsqrt.f32 %v158_v52  ;;  %v156_v56 = vmul.f32 0.03125, %v148_v54  ;;  %v153_v57 = vmul.f32 0.03125, %v139_v55 }
 0x18b   :  { %466 = vrsqrt.f32 %v161_v53 }
 0x18c   :  { %v162_v58 = vadd.f32 1e-05, %v156_v56  ;;  %v159_v59 = vadd.f32 1e-05, %v153_v57 }
 0x18d   :  { %v151_v60 = vpop.xlane.xlu1 %150 }
 0x18e   :  { %468 = vrsqrt.f32 %v162_v58  ;;  %v157_v61 = vmul.f32 0.03125, %v151_v60 }
 0x18f   :  { %470 = vrsqrt.f32 %v159_v59 }
 0x190   :  { %v463_v62 = vpop.eup %462  ;;  %v163_v63 = vadd.f32 1e-05, %v157_v61 }
 0x191   :  { %v172_v0 = vmul.f32 %v463_v62, %v737_v16 }
 0x192   :  { %472 = vrsqrt.f32 %v163_v63 }
 0x193   :  { %v184_v4 = vmul.f32 %v403_v1, %v172_v0 }
 0x194   :  { %v465_v2 = vpop.eup %464 }
 0x195   :  { %v467_v3 = vpop.eup %466  ;;  %v170_v5 = vmul.f32 %v465_v2, %v739_v17  ;;  %v196_v12 = vadd.f32 %v404_v7, %v184_v4 }
 0x196   :  { %v173_v6 = vmul.f32 %v467_v3, %v745_v24 }
 0x197   :  { %v182_v13 = vmul.f32 %v403_v1, %v170_v5 }
 0x198   :  { %v469_v8 = vpop.eup %468  ;;  %v185_v9 = vmul.f32 %v403_v1, %v173_v6 }
 0x199   :  { %v471_v10 = vpop.eup %470  ;;  %v174_v11 = vmul.f32 %v469_v8, %v755_v34  ;;  %v194_v17 = vadd.f32 %v404_v7, %v182_v13 }
 0x19a   :  { %v197_v14 = vadd.f32 %v404_v7, %v185_v9  ;;  %v171_v15 = vmul.f32 %v471_v10, %v748_v26 }
 0x19b   :  { %v186_v20 = vmul.f32 %v403_v1, %v174_v11 }
 0x19c   :  { %v473_v16 = vpop.eup %472  ;;  %v201_v18 = vpack.c.bf16 %v197_v14, %v196_v12  ;;  %v183_v19 = vmul.f32 %v403_v1, %v171_v15 }
 0x19d   :  { %v175_v21 = vmul.f32 %v473_v16, %v758_v36  ;;  %v198_v25 = vadd.f32 %v404_v7, %v186_v20 }
 0x19e   :  { %204 = vst.msk [vmem:[#allocation2 + $0x8] sm:$0xff] %vm96_vm0, %v201_v18  ;;  %v195_v22 = vadd.f32 %v404_v7, %v183_v19 }
 0x19f   :  { %v187_v23 = vmul.f32 %v403_v1, %v175_v21 }
 0x1a0   :  { %v200_v24 = vpack.c.bf16 %v195_v22, %v194_v17 }
 0x1a1   :  { %v199_v27 = vadd.f32 %v404_v7, %v187_v23 }
 0x1a2   :  { %203 = vst.msk [vmem:[#allocation2] sm:$0xff] %vm96_vm0, %v200_v24 }
 0x1a3   :  { %v202_v28 = vpack.c.bf16 %v199_v27, %v198_v25 }
 0x1a5   :  { %205 = vst.msk [vmem:[#allocation2 + $0x10] sm:$0xff] %vm96_vm0, %v202_v28  ;;  %v207_v26 = vld [vmem:[#allocation2 + $0x8] sm:$0xff] }
 0x1a6   :  { %437 = vmatmul.mubr.msk.bf16.vlgmr.msra.gmra.mrb[0].mxu1 %vm96_vm0, %v207_v26 }
 0x1a7   :  { %440 = vmatprep.mubr.msk.bf16.mxu1 %vm636_vm1, %v635_v43 }
 0x1a9   :  { %v206_v29 = vld [vmem:[#allocation2] sm:$0xff] }
 0x1aa   :  { %433 = vmatmul.mubr.msk.bf16.vlgmr.msra.gmra.mrb[0].mxu0 %vm96_vm0, %v206_v29 }
 0x1ac   :  { %v208_v30 = vld [vmem:[#allocation2 + $0x10] sm:$0xff] }
 0x1ae   :  { %441 = vmatmul.mubr.msk.bf16.gmra.mrb[4].mxu1 %vm96_vm0, %v208_v30 }
 0x279   :  { %v284_v32 = vpop.f32.mrb[0].mxu1 }
 0x27a   :  { %v285_v33 = vadd.f32 %v405_v31, %v284_v32  ;;  %v438_v34 = vpop.f32.mrb[1].mxu1 }
 0x27b   :  { %v287_v35 = vpop.f32.mrb[2].mxu1 }
 0x27c   :  { %v307_v36 = vmul.f32 0.044715, %v285_v33  ;;  %v288_v37 = vadd.f32 %v405_v31, %v287_v35  ;;  %v439_v38 = vpop.f32.mrb[3].mxu1  ;;  %v301_v18 = vmul.f32 0.5, %v285_v33 }
 0x27d   :  { %v276_v39 = vpop.f32.mrb[0].mxu0 }
 0x27e   :  { %v313_v40 = vmul.f32 %v307_v36, %v285_v33  ;;  %v308_v41 = vmul.f32 0.044715, %v288_v37  ;;  %v277_v42 = vadd.f32 %v405_v31, %v276_v39  ;;  %v434_v44 = vpop.f32.mrb[1].mxu0  ;;  %v302_v17 = vmul.f32 0.5, %v288_v37 }
 0x27f   :  { %v279_v43 = vpop.f32.mrb[2].mxu0 }
 0x280   :  { %v319_v45 = vmul.f32 %v313_v40, %v285_v33  ;;  %v314_v46 = vmul.f32 %v308_v41, %v288_v37  ;;  %v305_v47 = vmul.f32 0.044715, %v277_v42  ;;  %v435_v48 = vpop.f32.mrb[3].mxu0  ;;  %v280_v49 = vadd.f32 %v405_v31, %v279_v43 }
 0x281   :  { %v292_v50 = vpop.f32.mrb[4].mxu1  ;;  %v299_v27 = vmul.f32 0.5, %v277_v42 }
 0x282   :  { %v325_v51 = vadd.f32 %v319_v45, %v285_v33  ;;  %v320_v52 = vmul.f32 %v314_v46, %v288_v37  ;;  %v311_v53 = vmul.f32 %v305_v47, %v277_v42  ;;  %v293_v54 = vadd.f32 %v405_v31, %v292_v50  ;;  %v442_v55 = vpop.f32.mrb[5].mxu1 }
 0x283   :  { %v306_v56 = vmul.f32 0.044715, %v280_v49  ;;  %v295_v57 = vpop.f32.mrb[6].mxu1 }
 0x284   :  { %v331_v58 = vmul.f32 0.7978846, %v325_v51  ;;  %v326_v59 = vadd.f32 %v320_v52, %v288_v37  ;;  %v317_v60 = vmul.f32 %v311_v53, %v277_v42  ;;  %v443_v61 = vpop.f32.mrb[7].mxu1  ;;  %v309_v63 = vmul.f32 0.044715, %v293_v54 }
 0x285   :  { %v312_v62 = vmul.f32 %v306_v56, %v280_v49  ;;  %v296_v0 = vadd.f32 %v405_v31, %v295_v57  ;;  %v300_v31 = vmul.f32 0.5, %v280_v49  ;;  %v303_v36 = vmul.f32 0.5, %v293_v54 }
 0x286   :  { %474 = vtanh.f32 %v331_v58  ;;  %v332_v1 = vmul.f32 0.7978846, %v326_v59  ;;  %v323_v2 = vadd.f32 %v317_v60, %v277_v42  ;;  %v315_v4 = vmul.f32 %v309_v63, %v293_v54 }
 0x287   :  { %v318_v3 = vmul.f32 %v312_v62, %v280_v49  ;;  %v310_v5 = vmul.f32 0.044715, %v296_v0  ;;  %v304_v41 = vmul.f32 0.5, %v296_v0 }
 0x288   :  { %476 = vtanh.f32 %v332_v1  ;;  %v329_v6 = vmul.f32 0.7978846, %v323_v2  ;;  %v321_v8 = vmul.f32 %v315_v4, %v293_v54 }
 0x289   :  { %v324_v7 = vadd.f32 %v318_v3, %v280_v49  ;;  %v316_v9 = vmul.f32 %v310_v5, %v296_v0 }
 0x28a   :  { %478 = vtanh.f32 %v329_v6  ;;  %v327_v11 = vadd.f32 %v321_v8, %v293_v54 }
 0x28b   :  { %v330_v10 = vmul.f32 0.7978846, %v324_v7  ;;  %v322_v12 = vmul.f32 %v316_v9, %v296_v0 }
 0x28c   :  { %v333_v13 = vmul.f32 0.7978846, %v327_v11 }
 0x28d   :  { %480 = vtanh.f32 %v330_v10  ;;  %v328_v14 = vadd.f32 %v322_v12, %v296_v0 }
 0x28e   :  { %482 = vtanh.f32 %v333_v13 }
 0x28f   :  { %v334_v15 = vmul.f32 0.7978846, %v328_v14 }
 0x290   :  { %v475_v16 = vpop.eup %474 }
 0x291   :  { %v343_v19 = vadd.f32 1.0, %v475_v16  ;;  %484 = vtanh.f32 %v334_v15 }
 0x292   :  { %v477_v20 = vpop.eup %476 }
 0x293   :  { %v349_v21 = vmul.f32 %v343_v19, %v301_v18  ;;  %v344_v22 = vadd.f32 1.0, %v477_v20 }
 0x294   :  { %v479_v23 = vpop.eup %478 }
 0x295   :  { %v419_v24 = vpack.c.bf16 %v349_v21, %v349_v21  ;;  %v350_v25 = vmul.f32 %v344_v22, %v302_v17  ;;  %v341_v28 = vadd.f32 1.0, %v479_v23 }
 0x297   :  { %v481_v26 = vpop.eup %480  ;;  %v420_v29 = vpack.c.bf16 %v350_v25, %v350_v25  ;;  %v347_v30 = vmul.f32 %v341_v28, %v299_v27  ;;  %380 = vst.msk [vmem:[#allocation12 + $0x8] sm:$0xf] %vm377_vm2, %v419_v24 }
 0x298   :  { %v342_v32 = vadd.f32 1.0, %v481_v26  ;;  %v483_v33 = vpop.eup %482 }
 0x299   :  { %v417_v34 = vpack.c.bf16 %v347_v30, %v347_v30  ;;  %381 = vst.msk [vmem:[#allocation12 + $0xc] sm:$0xf] %vm377_vm2, %v420_v29  ;;  %v345_v37 = vadd.f32 1.0, %v483_v33 }
 0x29a   :  { %v348_v35 = vmul.f32 %v342_v32, %v300_v31 }
 0x29b   :  { %v485_v38 = vpop.eup %484  ;;  %378 = vst.msk [vmem:[#allocation12] sm:$0xf] %vm377_vm2, %v417_v34  ;;  %v351_v40 = vmul.f32 %v345_v37, %v303_v36 }
 0x29c   :  { %v418_v39 = vpack.c.bf16 %v348_v35, %v348_v35  ;;  %v346_v42 = vadd.f32 1.0, %v485_v38 }
 0x29d   :  { %v421_v44 = vpack.c.bf16 %v351_v40, %v351_v40 }
 0x29e   :  { %v352_v43 = vmul.f32 %v346_v42, %v304_v41  ;;  %379 = vst.msk [vmem:[#allocation12 + $0x4] sm:$0xf] %vm377_vm2, %v418_v39 }
 0x29f   :  { %382 = vst.msk [vmem:[#allocation12 + $0x10] sm:$0xf] %vm377_vm2, %v421_v44 }
 0x2a0   :  { %v422_v45 = vpack.c.bf16 %v352_v43, %v352_v43 }
 0x2a2   :  { %383 = vst.msk [vmem:[#allocation12 + $0x14] sm:$0xf] %vm377_vm2, %v422_v45 }
 0x2a3   :  { %607 = shalt.err (!%p604_p2)
}
 0x2a4   :  { %s608_s13 = scalar_lea.hbm %s815_s5, 384 }
 0x2a5   :  { %p609_p3 = scmp.ne.s32.totalorder %s815_s5, %s608_s13  ;;  %p612_p4 = scmp.lt.u32.totalorder %s608_s13, %s815_s5 }
 0x2a7   :  { %p614_p5 = pnand %p612_p4, %p609_p3 }
 0x2a9   :  { %617 = shalt.err (!%p614_p5)
}
 0x2aa   :  { %395 = dma.vmem_to_hbm [thread:$0]  %s390_s8, 384, %s815_s5, [#allocation5], %s627_s28, %s627_s28, %s628_s29  }
 0x2ab   :  { %624 = dma.done.wait [#allocation5], 384  }
 0x2ac   :  { %625 = vsyncadd [#allocation5], 4294966912 }
 0x2ad   :  { %399 = vsyncpa [#allocation4], 1 }
 0x2ae   :  { %400 = vsyncpa [#allocation7], 1 }
 0x2af   :  { %401 = vsyncpa [#allocation10], 1 }
 0x2b0   :  { %402 = vsyncpa [#allocation5], 1 }

// kernel: vit_encoder_forward.23
= control target key start
LH: loop header
LB: loop body
LE: loop exit
PB: predicated region body
PF: predicated region fallthrough
CT: control target
= control target key end

     0   :  { %8 = vsyncpa [#allocation3], 0  ;;  %s417_s0 = inlined_call_operand.hbm [shape: f32[48,32], index: 0, kind: input, shape index: {}]   ;;  %s418_s1 = inlined_call_operand.hbm [shape: f32[1,32], index: 1, kind: input, shape index: {}]   ;;  %s419_s2 = inlined_call_operand.hbm [shape: f32[1,32], index: 2, kind: input, shape index: {}]   ;;  %s420_s3 = inlined_call_operand.hbm [shape: f32[48,32], index: 3, kind: output, shape index: {}]  }
   0x1   :  { %9 = vsyncpa [#allocation6], 0 }
   0x2   :  { %10 = vsyncpa [#allocation4], 0  ;;  %s302_s12 = smov [#allocation5]   ;;  %s303_s14 = smov [#allocation2]  }
   0x3   :  { %s29_s13 = sshll.u32 %s302_s12, 4  ;;  %s16_s15 = sshll.u32 %s303_s14, 4  ;;  %s30_s13 = int_to_ptr.vmem [resolvable:$true] %s29_s13  ;;  %s328_s15 = int_to_ptr.vmem [resolvable:$true] %s16_s15 }
   0x4   :  { %s208_s18 = scalar_lea.hbm %s418_s1, 16 }
   0x5   :  { %p209_p0 = scmp.ne.s32.totalorder %s418_s1, %s208_s18  ;;  %p212_p1 = scmp.lt.u32.totalorder %s208_s18, %s418_s1 }
   0x7   :  { %p214_p2 = pnand %p212_p1, %p209_p0 }
   0x9   :  { %217 = shalt.err (!%p214_p2)
}
   0xa   :  { %s218_s23 = scalar_lea.vmem %s30_s13, 16  ;;  %s222_s24 = scalar_lea.vmem %s30_s13, 32 }
   0xb   :  { %p219_p3 = scmp.ne.s32.totalorder %s30_s13, %s218_s23  ;;  %p223_p4 = scmp.lt.s32.totalorder %s30_s13, %s30_s13 }
   0xc   :  { %p224_p5 = scmp.lt.s32.totalorder %s222_s24, %s218_s23 }
   0xe   :  { %p225_p6 = por %p224_p5, %p223_p4 }
  0x10   :  { %p226_p7 = pnand %p225_p6, %p219_p3 }
  0x12   :  { %229 = shalt.err (!%p226_p7)
}
  0x13   :  { %32 = dma.hbm_to_vmem [thread:$0]  %s418_s1, 16, %s30_s13, [#allocation6]  }
  0x14   :  { %s230_s29 = scalar_lea.hbm %s417_s0, 768 }
  0x15   :  { %p231_p8 = scmp.ne.s32.totalorder %s417_s0, %s230_s29  ;;  %p234_p9 = scmp.lt.u32.totalorder %s230_s29, %s417_s0 }
  0x17   :  { %p236_p10 = pnand %p234_p9, %p231_p8 }
  0x19   :  { %239 = shalt.err (!%p236_p10)
}
  0x1a   :  { %s240_s7 = scalar_lea.vmem %s328_s15, 768  ;;  %p245_p12 = scmp.lt.s32.totalorder %s328_s15, %s328_s15 }
  0x1b   :  { %p241_p11 = scmp.ne.s32.totalorder %s328_s15, %s240_s7  ;;  %p246_p13 = scmp.lt.s32.totalorder %s240_s7, %s240_s7 }
  0x1d   :  { %p247_p0 = por %p246_p13, %p245_p12 }
  0x1f   :  { %p248_p1 = pnand %p247_p0, %p241_p11 }
  0x21   :  { %251 = shalt.err (!%p248_p1)
}
  0x22   :  { %s304_s1 = smov 128   ;;  %s305_s8 = smov 8  }
  0x23   :  { %22 = dma.hbm_to_vmem [thread:$0]  %s417_s0, 768, %s328_s15, [#allocation3], %s304_s1, %s304_s1, %s305_s8  }
  0x24   :  { %s306_s11 = smov [#allocation7]   ;;  %s252_s16 = scalar_lea.hbm %s419_s2, 16 }
  0x25   :  { %s39_s12 = sshll.u32 %s306_s11, 4  ;;  %p253_p2 = scmp.ne.s32.totalorder %s419_s2, %s252_s16  ;;  %s40_s12 = int_to_ptr.vmem [resolvable:$true] %s39_s12 }
  0x26   :  { %p256_p3 = scmp.lt.u32.totalorder %s252_s16, %s419_s2 }
  0x28   :  { %p258_p4 = pnand %p256_p3, %p253_p2 }
  0x2a   :  { %261 = shalt.err (!%p258_p4)
}
  0x2b   :  { %s262_s21 = scalar_lea.vmem %s40_s12, 16  ;;  %s266_s0 = scalar_lea.vmem %s40_s12, 32 }
  0x2c   :  { %p263_p5 = scmp.ne.s32.totalorder %s40_s12, %s262_s21  ;;  %p267_p6 = scmp.lt.s32.totalorder %s40_s12, %s40_s12 }
  0x2d   :  { %p268_p7 = scmp.lt.s32.totalorder %s266_s0, %s262_s21 }
  0x2f   :  { %p269_p8 = por %p268_p7, %p267_p6 }
  0x31   :  { %p270_p9 = pnand %p269_p8, %p263_p5 }
  0x33   :  { %273 = shalt.err (!%p270_p9)
}
  0x34   :  { %42 = dma.hbm_to_vmem [thread:$0]  %s419_s2, 16, %s40_s12, [#allocation6]  }
  0x35   :  { %296 = dma.done.wait [#allocation3], 768  }
  0x36   :  { %297 = vsyncadd [#allocation3], 4294966528 }
  0x37   :  { %298 = dma.done.wait [#allocation6], 32  }
  0x38   :  { %299 = vsyncadd [#allocation6], 4294967264  ;;  %vm60_vm0 = vcmask 261120   ;;  %v52_v0 = vld [vmem:[#allocation2] sm:$0xff]  ;;  %v54_v1 = vld [vmem:[#allocation2 + $0x10] sm:$0xff]  ;;  %s307_s2 = smov [#allocation8]  }
  0x39   :  { %v53_v2 = vld [vmem:[#allocation2 + $0x8] sm:$0xff]  ;;  %v61_v3 = vsel %vm60_vm0, %v52_v0, 0.0  ;;  %v67_v4 = vsel %vm60_vm0, %v54_v1, 0.0  ;;  %v55_v5 = vld [vmem:[#allocation2 + $0x18] sm:$0xff]  ;;  %v56_v8 = vld [vmem:[#allocation2 + $0x20] sm:$0xff]  ;;  %s175_s23 = sshll.u32 %s307_s2, 4  ;;  %s176_s23 = int_to_ptr.vmem [resolvable:$true] %s175_s23 }
  0x3a   :  { %62 = vadd.xlane.f32.xlu0 %v61_v3  ;;  %68 = vadd.xlane.f32.xlu1 %v67_v4  ;;  %v64_v6 = vsel %vm60_vm0, %v53_v2, 0.0  ;;  %v70_v7 = vsel %vm60_vm0, %v55_v5, 0.0  ;;  %v57_v9 = vld [vmem:[#allocation2 + $0x28] sm:$0xff]  ;;  %v73_v10 = vsel %vm60_vm0, %v56_v8, 0.0  ;;  %v188_v60 = vld [vmem:[#allocation5] ss:$0 sm:$0xff]  ;;  %p279_p11 = scmp.lt.s32.totalorder %s176_s23, %s176_s23 }
  0x3b   :  { %v76_v11 = vsel %vm60_vm0, %v57_v9, 0.0  ;;  %v189_v63 = vld [vmem:[#allocation7] ss:$0 sm:$0xff]  ;;  %s274_s24 = scalar_lea.vmem %s176_s23, 768 }
  0x3c   :  { %p275_p10 = scmp.ne.s32.totalorder %s176_s23, %s274_s24  ;;  %p280_p12 = scmp.lt.s32.totalorder %s274_s24, %s274_s24 }
  0x3e   :  { %65 = vadd.xlane.f32.xlu0 %v64_v6  ;;  %71 = vadd.xlane.f32.xlu1 %v70_v7  ;;  %p281_p13 = por %p280_p12, %p279_p11 }
  0x40   :  { %p282_p0 = pnand %p281_p13, %p275_p10 }
  0x42   :  { %74 = vadd.xlane.f32.xlu0 %v73_v10  ;;  %77 = vadd.xlane.f32.xlu1 %v76_v11 }
  0xc7   :  { %v63_v12 = vpop.xlane.xlu0 %62  ;;  %v69_v13 = vpop.xlane.xlu1 %68 }
  0xc8   :  { %v80_v14 = vmul.f32 0.03125, %v63_v12  ;;  %v82_v15 = vmul.f32 0.03125, %v69_v13 }
  0xca   :  { %v86_v16 = vsub.f32 %v52_v0, %v80_v14  ;;  %v380_v17 = vsub.f32 %v54_v1, %v82_v15 }
  0xcb   :  { %v66_v18 = vpop.xlane.xlu0 %65  ;;  %v72_v19 = vpop.xlane.xlu1 %71 }
  0xcc   :  { %v81_v20 = vmul.f32 0.03125, %v66_v18  ;;  %v83_v21 = vmul.f32 0.03125, %v72_v19  ;;  %v92_v22 = vmul.f32 %v86_v16, %v86_v16  ;;  %v94_v23 = vmul.f32 %v380_v17, %v380_v17 }
  0xce   :  { %v87_v24 = vsub.f32 %v53_v2, %v81_v20  ;;  %v384_v25 = vsub.f32 %v55_v5, %v83_v21  ;;  %v98_v26 = vsel %vm60_vm0, %v92_v22, 0.0  ;;  %v104_v29 = vsel %vm60_vm0, %v94_v23, 0.0 }
  0xcf   :  { %99 = vadd.xlane.f32.xlu0 %v98_v26  ;;  %v75_v27 = vpop.xlane.xlu0 %74  ;;  %v78_v28 = vpop.xlane.xlu1 %77 }
  0xd0   :  { %v84_v30 = vmul.f32 0.03125, %v75_v27  ;;  %v85_v31 = vmul.f32 0.03125, %v78_v28  ;;  %v93_v32 = vmul.f32 %v87_v24, %v87_v24  ;;  %v95_v33 = vmul.f32 %v384_v25, %v384_v25 }
  0xd2   :  { %v90_v34 = vsub.f32 %v56_v8, %v84_v30  ;;  %v91_v35 = vsub.f32 %v57_v9, %v85_v31  ;;  %v101_v36 = vsel %vm60_vm0, %v93_v32, 0.0  ;;  %v107_v37 = vsel %vm60_vm0, %v95_v33, 0.0 }
  0xd3   :  { %105 = vadd.xlane.f32.xlu0 %v104_v29  ;;  %102 = vadd.xlane.f32.xlu1 %v101_v36 }
  0xd4   :  { %v96_v38 = vmul.f32 %v90_v34, %v90_v34  ;;  %v97_v39 = vmul.f32 %v91_v35, %v91_v35 }
  0xd6   :  { %v110_v40 = vsel %vm60_vm0, %v96_v38, 0.0  ;;  %v113_v41 = vsel %vm60_vm0, %v97_v39, 0.0 }
  0xd7   :  { %108 = vadd.xlane.f32.xlu1 %v107_v37  ;;  %111 = vadd.xlane.f32.xlu0 %v110_v40 }
  0xdb   :  { %114 = vadd.xlane.f32.xlu1 %v113_v41 }
 0x15c   :  { %v100_v42 = vpop.xlane.xlu0 %99 }
 0x15d   :  { %v116_v43 = vmul.f32 0.03125, %v100_v42 }
 0x15f   :  { %v122_v44 = vadd.f32 1e-05, %v116_v43 }
 0x160   :  { %v103_v45 = vpop.xlane.xlu1 %102  ;;  %v106_v46 = vpop.xlane.xlu0 %105 }
 0x161   :  { %196 = vrsqrt.f32 %v122_v44  ;;  %v117_v47 = vmul.f32 0.03125, %v103_v45  ;;  %v118_v48 = vmul.f32 0.03125, %v106_v46 }
 0x163   :  { %v123_v49 = vadd.f32 1e-05, %v117_v47  ;;  %v124_v50 = vadd.f32 1e-05, %v118_v48 }
 0x164   :  { %v109_v51 = vpop.xlane.xlu1 %108  ;;  %v112_v52 = vpop.xlane.xlu0 %111 }
 0x165   :  { %198 = vrsqrt.f32 %v123_v49  ;;  %v119_v53 = vmul.f32 0.03125, %v109_v51  ;;  %v120_v54 = vmul.f32 0.03125, %v112_v52 }
 0x166   :  { %200 = vrsqrt.f32 %v124_v50 }
 0x167   :  { %v125_v55 = vadd.f32 1e-05, %v119_v53  ;;  %v126_v56 = vadd.f32 1e-05, %v120_v54 }
 0x168   :  { %v115_v57 = vpop.xlane.xlu1 %114 }
 0x169   :  { %202 = vrsqrt.f32 %v125_v55  ;;  %v121_v58 = vmul.f32 0.03125, %v115_v57 }
 0x16a   :  { %204 = vrsqrt.f32 %v126_v56 }
 0x16b   :  { %v197_v59 = vpop.eup %196  ;;  %v127_v61 = vadd.f32 1e-05, %v121_v58 }
 0x16c   :  { %v134_v62 = vmul.f32 %v197_v59, %v86_v16 }
 0x16d   :  { %206 = vrsqrt.f32 %v127_v61 }
 0x16e   :  { %v146_v0 = vmul.f32 %v188_v60, %v134_v62 }
 0x16f   :  { %v199_v1 = vpop.eup %198 }
 0x170   :  { %v201_v2 = vpop.eup %200  ;;  %v158_v3 = vadd.f32 %v189_v63, %v146_v0  ;;  %v135_v4 = vmul.f32 %v199_v1, %v87_v24 }
 0x171   :  { %v136_v5 = vmul.f32 %v201_v2, %v380_v17 }
 0x172   :  { %164 = vst.msk [vmem:[#allocation8] sm:$0xff] %vm60_vm0, %v158_v3  ;;  %v147_v6 = vmul.f32 %v188_v60, %v135_v4 }
 0x173   :  { %v203_v7 = vpop.eup %202  ;;  %v148_v8 = vmul.f32 %v188_v60, %v136_v5 }
 0x174   :  { %v205_v9 = vpop.eup %204  ;;  %v159_v10 = vadd.f32 %v189_v63, %v147_v6  ;;  %v137_v11 = vmul.f32 %v203_v7, %v384_v25 }
 0x175   :  { %v160_v12 = vadd.f32 %v189_v63, %v148_v8  ;;  %v138_v13 = vmul.f32 %v205_v9, %v90_v34 }
 0x176   :  { %165 = vst.msk [vmem:[#allocation8 + $0x8] sm:$0xff] %vm60_vm0, %v159_v10  ;;  %v149_v14 = vmul.f32 %v188_v60, %v137_v11 }
 0x177   :  { %v207_v15 = vpop.eup %206  ;;  %166 = vst.msk [vmem:[#allocation8 + $0x10] sm:$0xff] %vm60_vm0, %v160_v12  ;;  %v150_v16 = vmul.f32 %v188_v60, %v138_v13 }
 0x178   :  { %v161_v18 = vadd.f32 %v189_v63, %v149_v14  ;;  %v139_v17 = vmul.f32 %v207_v15, %v91_v35 }
 0x179   :  { %v162_v19 = vadd.f32 %v189_v63, %v150_v16 }
 0x17a   :  { %167 = vst.msk [vmem:[#allocation8 + $0x18] sm:$0xff] %vm60_vm0, %v161_v18  ;;  %v151_v20 = vmul.f32 %v188_v60, %v139_v17 }
 0x17b   :  { %168 = vst.msk [vmem:[#allocation8 + $0x20] sm:$0xff] %vm60_vm0, %v162_v19 }
 0x17c   :  { %v163_v21 = vadd.f32 %v189_v63, %v151_v20 }
 0x17e   :  { %169 = vst.msk [vmem:[#allocation8 + $0x28] sm:$0xff] %vm60_vm0, %v163_v21 }
 0x17f   :  { %285 = shalt.err (!%p282_p0)
}
 0x180   :  { %s286_s27 = scalar_lea.hbm %s420_s3, 768 }
 0x181   :  { %p287_p1 = scmp.ne.s32.totalorder %s420_s3, %s286_s27  ;;  %p290_p2 = scmp.lt.u32.totalorder %s286_s27, %s420_s3 }
 0x183   :  { %p292_p3 = pnand %p290_p2, %p287_p1 }
 0x185   :  { %295 = shalt.err (!%p292_p3)
}
 0x186   :  { %181 = dma.vmem_to_hbm [thread:$0]  %s176_s23, 768, %s420_s3, [#allocation4], %s304_s1, %s304_s1, %s305_s8  }
 0x187   :  { %300 = dma.done.wait [#allocation4], 768  }
 0x188   :  { %301 = vsyncadd [#allocation4], 4294966528 }
 0x189   :  { %185 = vsyncpa [#allocation3], 1 }
 0x18a   :  { %186 = vsyncpa [#allocation6], 1 }
 0x18b   :  { %187 = vsyncpa [#allocation4], 1 }

</bundles_post_ra>
